<compile_context>
chip_gen: v7x
topology: tpu7x:2x2x1
jax: 0.10.0
libtpu: 0.0.40
codegen_flags: <defaults>
</compile_context>

<pallas_src>
import math

import jax
import jax.numpy as jnp
import numpy as np
from jax.experimental import pallas as pl
from jax.experimental.pallas import tpu as pltpu

# ---- constants from MelModel.__init__ / properties -------------------------
SAMPLE_RATE = 44100
N_FFT = 2048
WIN_LENGTH = 2048
HOP_LENGTH = 1024
F_MIN = 20.0
F_MAX = 16000.0
N_MELS = 128
N_MFCC = 40
MIN_DB = -80.0
NORM_MEAN = -4.2677393
NORM_STD = 4.5689974

N_FREQS = N_FFT // 2 + 1          # 1025 onesided rfft bins
HALF = N_FFT // 2                 # 1024 (radix-2 half-frame length)
N_MFCC_PAD = 128                  # lane-dense output width (slice to 40 in wrapper)
TM_MAX = 256                      # max frame rows per grid step
MEL_FLOOR = 10.0 ** (MIN_DB / 10.0)

assert HOP_LENGTH == N_FFT // 2   # reshape-based framing relies on 50% overlap


def _round_up(x, m):
    return -(-x // m) * m


# ---- deterministic parameter construction (matches torchaudio formulas) ----
def _hz_to_mel_htk(f):
    return 2595.0 * np.log10(1.0 + np.asarray(f, np.float64) / 700.0)


def _mel_to_hz_htk(m):
    return 700.0 * (10.0 ** (np.asarray(m, np.float64) / 2595.0) - 1.0)


def _full_mel_filterbank():
    # torchaudio.functional.melscale_fbanks(norm=None, mel_scale='htk') -> (n_freqs, n_mels)
    all_freqs = np.linspace(0.0, SAMPLE_RATE / 2.0, N_FREQS)
    m_pts = np.linspace(_hz_to_mel_htk(F_MIN), _hz_to_mel_htk(F_MAX), N_MELS + 2)
    f_pts = _mel_to_hz_htk(m_pts)
    f_diff = f_pts[1:] - f_pts[:-1]                       # (n_mels+1,)
    slopes = f_pts[None, :] - all_freqs[:, None]          # (n_freqs, n_mels+2)
    down = -slopes[:, :-2] / f_diff[:-1]
    up = slopes[:, 2:] / f_diff[1:]
    return np.maximum(0.0, np.minimum(down, up))          # (n_freqs, n_mels) f64


def _dct_matrix():
    # torchaudio.functional.create_dct(n_mfcc, n_mels, norm='ortho') -> (n_mels, n_mfcc)
    n = np.arange(N_MELS, dtype=np.float64)
    k = np.arange(N_MFCC, dtype=np.float64)[:, None]
    dct = np.cos(np.pi / N_MELS * (n + 0.5) * k)          # (n_mfcc, n_mels)
    dct[0] *= 1.0 / math.sqrt(2.0)
    dct *= math.sqrt(2.0 / N_MELS)
    return dct.T                                          # (n_mels, n_mfcc) f64


def build_constants():
    """Returns (kernel constants, raw pieces for the independent reference)."""
    # periodic Hann window (torch.hann_window default)
    win = 0.5 - 0.5 * np.cos(2.0 * np.pi * np.arange(N_FFT) / N_FFT)
    fb_full = _full_mel_filterbank()                      # (1025, 128)
    dct = _dct_matrix()                                   # (128, 40)
    scale2 = 1.0 / float(np.sum(win ** 2))                # normalized='window' on power

    # only bins with a nonzero mel weight matter (f_max=16kHz -> 744 of 1025 bins)
    nz = np.nonzero(fb_full.any(axis=1))[0]
    n_keep = int(nz[-1]) + 1 if nz.size else N_FREQS
    f_half = max(128, _round_up(-(-n_keep // 2), 128))    # even/odd bins each, lane-padded

    # radix-2 DIF matrices: even bins = DFT_1024 of (z_lo+z_hi) at freq 2j,
    # odd bins = DFT_1024 of (z_lo-z_hi) at freq 2j+1 (twiddle folded in).
    m = np.arange(HALF, dtype=np.float64)[:, None]        # (1024, 1)
    je = 2.0 * np.arange(f_half, dtype=np.float64)[None, :]
    ang_e = 2.0 * np.pi * m * je / N_FFT
    ang_o = 2.0 * np.pi * m * (je + 1.0) / N_FFT
    dft_even = np.concatenate([np.cos(ang_e), -np.sin(ang_e)], axis=1)  # (1024, 2*f_half)
    dft_odd = np.concatenate([np.cos(ang_o), -np.sin(ang_o)], axis=1)   # (1024, 2*f_half)

    # mel filterbanks restricted to even / odd bins, stacked to match [re^2 | im^2] layout,
    # with the 1/sum(win^2) spectrogram normalization folded in.
    even_idx = 2 * np.arange(f_half)
    odd_idx = even_idx + 1
    fb_even = np.zeros((f_half, N_MELS), np.float64)
    fb_odd = np.zeros((f_half, N_MELS), np.float64)
    m_e = even_idx < N_FREQS
    m_o = odd_idx < N_FREQS
    fb_even[m_e] = fb_full[even_idx[m_e]]
    fb_odd[m_o] = fb_full[odd_idx[m_o]]
    fb_even2 = np.vstack([fb_even, fb_even]) * scale2     # (2*f_half, n_mels)
    fb_odd2 = np.vstack([fb_odd, fb_odd]) * scale2

    # fold dB scale (10/ln10) and (x - mean)/std into DCT + bias; lane-pad 40 -> 128
    a = 10.0 / (math.log(10.0) * NORM_STD)
    dct_scaled = np.zeros((N_MELS, N_MFCC_PAD), np.float64)
    dct_scaled[:, :N_MFCC] = dct * a
    bias = np.zeros((1, N_MFCC_PAD), np.float64)
    bias[0, :N_MFCC] = (NORM_MEAN / NORM_STD) * dct.sum(axis=0)

    bf16 = jnp.bfloat16
    kernel_consts = (jnp.asarray(dft_even, bf16), jnp.asarray(dft_odd, bf16),
                     jnp.asarray(fb_even2, bf16), jnp.asarray(fb_odd2, bf16),
                     jnp.asarray(dct_scaled, jnp.float32), jnp.asarray(bias, jnp.float32),
                     jnp.asarray(win, jnp.float32))
    ref_consts = (jnp.asarray(win, jnp.float32),
                  jnp.asarray(fb_full, jnp.float32),
                  jnp.asarray(dct, jnp.float32))
    return kernel_consts, ref_consts


# ---- Pallas kernel ----------------------------------------------------------
def mel_mfcc_kernel(u_ref, d_ref, dfte_ref, dfto_ref, fbe_ref, fbo_ref,
                    dct_ref, bias_ref, out_ref):
    # radix-2 DIF: even rfft bins from u = z_lo+z_hi, odd bins from d = z_lo-z_hi
    ye = jnp.dot(u_ref[...], dfte_ref[...], preferred_element_type=jnp.float32)
    yo = jnp.dot(d_ref[...], dfto_ref[...], preferred_element_type=jnp.float32)
    pe = (ye * ye).astype(jnp.bfloat16)        # [re^2 | im^2] even bins
    po = (yo * yo).astype(jnp.bfloat16)        # [re^2 | im^2] odd bins
    # stacked filterbanks do re^2+im^2 and the mel projection in one MXU pass each
    mel = (jnp.dot(pe, fbe_ref[...], preferred_element_type=jnp.float32)
           + jnp.dot(po, fbo_ref[...], preferred_element_type=jnp.float32))
    mel = jnp.maximum(mel, MEL_FLOOR)
    logmel = jnp.log(mel)                      # EUP
    # dB scale + normalization affine folded into dct_ref / bias_ref
    out_ref[...] = (jnp.dot(logmel, dct_ref[...], preferred_element_type=jnp.float32)
                    - bias_ref[...])


def mel_model_forward(audio, consts, *, tm_max=TM_MAX):
    """audio: (B, 1, N) float32 in [-1, 1] -> (B, n_mfcc, n_frames)."""
    dft_even, dft_odd, fb_even2, fb_odd2, dct_scaled, bias, window = consts

    B, _, N = audio.shape
    x = audio[:, 0, :].astype(jnp.float32)
    pad = N_FFT // 2
    x = jnp.pad(x, ((0, 0), (pad, pad)), mode="reflect")   # center=True, reflect

    n_frames = 1 + N // HOP_LENGTH
    # reshape-based framing (hop == n_fft/2): adjacent half-frames, no gather
    L = x.shape[1]
    L_pad = _round_up(L, HALF)
    if L_pad > L:
        x = jnp.pad(x, ((0, 0), (0, L_pad - L)))
    halves = x.reshape(B, L_pad // HALF, HALF)
    z_lo = halves[:, :n_frames] * window[:HALF]             # windowed first half
    z_hi = halves[:, 1:n_frames + 1] * window[HALF:]        # windowed second half
    # radix-2 butterflies in f32, streamed into the kernel as bf16
    u = (z_lo + z_hi).reshape(B * n_frames, HALF).astype(jnp.bfloat16)
    d = (z_lo - z_hi).reshape(B * n_frames, HALF).astype(jnp.bfloat16)

    # adaptive row tile: big enough to fill the MXU for large M, but never padding
    # small M up to 256 rows; >= 2 grid steps whenever M > 8 (v7x has 2 TensorCores).
    M = B * n_frames
    tm = min(tm_max, max(8, _round_up(-(-M // 2), 8)))
    M_pad = _round_up(M, tm)
    if M_pad > M:
        u = jnp.pad(u, ((0, M_pad - M), (0, 0)))
        d = jnp.pad(d, ((0, M_pad - M), (0, 0)))

    f2 = dft_even.shape[1]                                  # 2 * f_half (768)

    out = pl.pallas_call(
        mel_mfcc_kernel,
        out_shape=jax.ShapeDtypeStruct((M_pad, N_MFCC_PAD), jnp.float32),
        grid_spec=pltpu.PrefetchScalarGridSpec(
            num_scalar_prefetch=0,
            grid=(M_pad // tm,),
            in_specs=[
                pl.BlockSpec((tm, HALF), lambda i: (i, 0)),        # u
                pl.BlockSpec((tm, HALF), lambda i: (i, 0)),        # d
                pl.BlockSpec((HALF, f2), lambda i: (0, 0)),        # dft_even (bf16)
                pl.BlockSpec((HALF, f2), lambda i: (0, 0)),        # dft_odd  (bf16)
                pl.BlockSpec((f2, N_MELS), lambda i: (0, 0)),      # fb_even2 (bf16)
                pl.BlockSpec((f2, N_MELS), lambda i: (0, 0)),      # fb_odd2  (bf16)
                pl.BlockSpec((N_MELS, N_MFCC_PAD), lambda i: (0, 0)),
                pl.BlockSpec((1, N_MFCC_PAD), lambda i: (0, 0)),
            ],
            out_specs=pl.BlockSpec((tm, N_MFCC_PAD), lambda i: (i, 0)),
        ),
        compiler_params=pltpu.CompilerParams(
            dimension_semantics=("parallel",),
            vmem_limit_bytes=32 * 1024 * 1024,
        ),
    )(u, d, dft_even, dft_odd, fb_even2, fb_odd2, dct_scaled, bias)

    mfcc = out[:M, :N_MFCC].reshape(B, n_frames, N_MFCC)
    return jnp.transpose(mfcc, (0, 2, 1))                   # (B, n_mfcc, n_frames)


# ---- independent pure-JAX reference (f32 rfft path, full filterbank) --------
def reference_forward(audio, win, fb_full, dct):
    B, _, N = audio.shape
    x = audio[:, 0, :]
    pad = N_FFT // 2
    xp = jnp.pad(x, ((0, 0), (pad, pad)), mode="reflect")
    n_frames = 1 + N // HOP_LENGTH
    idx = HOP_LENGTH * jnp.arange(n_frames)[:, None] + jnp.arange(N_FFT)[None, :]
    frames = xp[:, idx] * win[None, None, :]
    spec = jnp.fft.rfft(frames, n=N_FFT, axis=-1)
    spec = spec / jnp.sqrt(jnp.sum(win ** 2))               # normalized='window'
    power = jnp.abs(spec) ** 2
    mel = jnp.einsum("bfk,km->bfm", power, fb_full)
    mel = jnp.maximum(mel, MEL_FLOOR)
    mel_db = 10.0 * jnp.log10(mel)
    mel_n = (mel_db - NORM_MEAN) / NORM_STD
    mfcc = jnp.einsum("bfm,mc->bfc", mel_n, dct)
    return jnp.transpose(mfcc, (0, 2, 1))


if __name__ == "__main__":
    # small-but-consistent shapes: batch=2, 1 channel, 8192 samples -> 9 frames
    B, N = 2, 8192
    key = jax.random.PRNGKey(0)
    audio = jax.random.uniform(key, (B, 1, N), jnp.float32, -1.0, 1.0)

    kernel_consts, (win, fb_full, dct) = build_constants()

    fwd = jax.jit(mel_model_forward)
    out = jax.block_until_ready(fwd(audio, kernel_consts))

    n_frames = 1 + N // HOP_LENGTH
    assert out.shape == (B, N_MFCC, n_frames), out.shape
    assert bool(jnp.all(jnp.isfinite(out)))

    ref = reference_forward(audio, win, fb_full, dct)
    # bf16 MXU path introduces ~0.5% relative error on the pre-log power spectrum,
    # which lands at ~1e-2 absolute on the MFCCs; tolerance sized accordingly.
    if not bool(jnp.allclose(out, ref, atol=1e-1, rtol=5e-2)):
        err = float(jnp.max(jnp.abs(out - ref)))
        raise AssertionError(f"Pallas output does not match JAX reference, max err {err}")

    print("KERNEL_OK")
</pallas_src>

<mosaic_0001>
module attributes {stable_mosaic.version = 11 : i64} {
  func.func @mel_mfcc_kernel(%arg0: i32, %arg1: memref<16x1024xbf16, #tpu.memory_space<vmem>>, %arg2: memref<16x1024xbf16, #tpu.memory_space<vmem>>, %arg3: memref<1024x768xbf16, #tpu.memory_space<vmem>>, %arg4: memref<1024x768xbf16, #tpu.memory_space<vmem>>, %arg5: memref<768x128xbf16, #tpu.memory_space<vmem>>, %arg6: memref<768x128xbf16, #tpu.memory_space<vmem>>, %arg7: memref<128x128xf32, #tpu.memory_space<vmem>>, %arg8: memref<1x128xf32, #tpu.memory_space<vmem>>, %arg9: memref<16x128xf32, #tpu.memory_space<vmem>>) attributes {dimension_semantics = [#tpu.dimension_semantics<parallel>], iteration_bounds = array<i64: 2>, scalar_prefetch = 0 : i64, scratch_operands = 0 : i64, tpu.core_type = #tpu.core_type<tc>, window_params = [{transform_indices = @transform_0, window_bounds = array<i64: 16, 1024>}, {transform_indices = @transform_1, window_bounds = array<i64: 16, 1024>}, {pipeline_mode = #tpu.pipeline_mode<synchronous>, transform_indices = @transform_2, window_bounds = array<i64: 1024, 768>}, {pipeline_mode = #tpu.pipeline_mode<synchronous>, transform_indices = @transform_3, window_bounds = array<i64: 1024, 768>}, {pipeline_mode = #tpu.pipeline_mode<synchronous>, transform_indices = @transform_4, window_bounds = array<i64: 768, 128>}, {pipeline_mode = #tpu.pipeline_mode<synchronous>, transform_indices = @transform_5, window_bounds = array<i64: 768, 128>}, {pipeline_mode = #tpu.pipeline_mode<synchronous>, transform_indices = @transform_6, window_bounds = array<i64: 128, 128>}, {pipeline_mode = #tpu.pipeline_mode<synchronous>, transform_indices = @transform_7, window_bounds = array<i64: 1, 128>}, {transform_indices = @transform_8, window_bounds = array<i64: 16, 128>}]} {
    %c0 = arith.constant 0 : index
    %c0_0 = arith.constant 0 : index
    %0 = vector.load %arg1[%c0, %c0_0] : memref<16x1024xbf16, #tpu.memory_space<vmem>>, vector<16x1024xbf16>
    %c0_1 = arith.constant 0 : index
    %c0_2 = arith.constant 0 : index
    %1 = vector.load %arg3[%c0_1, %c0_2] : memref<1024x768xbf16, #tpu.memory_space<vmem>>, vector<1024x768xbf16>
    %cst = arith.constant dense<0.000000e+00> : vector<16x768xf32>
    %2 = tpu.matmul %0, %1, %cst {dimension_numbers = #tpu.dot_dimension_numbers<[1], [0], [0], [1], [0, 0, 1, 1], [], []>} : vector<16x1024xbf16>, vector<1024x768xbf16>, vector<16x768xf32> -> vector<16x768xf32>
    %c0_3 = arith.constant 0 : index
    %c0_4 = arith.constant 0 : index
    %3 = vector.load %arg2[%c0_3, %c0_4] : memref<16x1024xbf16, #tpu.memory_space<vmem>>, vector<16x1024xbf16>
    %c0_5 = arith.constant 0 : index
    %c0_6 = arith.constant 0 : index
    %4 = vector.load %arg4[%c0_5, %c0_6] : memref<1024x768xbf16, #tpu.memory_space<vmem>>, vector<1024x768xbf16>
    %cst_7 = arith.constant dense<0.000000e+00> : vector<16x768xf32>
    %5 = tpu.matmul %3, %4, %cst_7 {dimension_numbers = #tpu.dot_dimension_numbers<[1], [0], [0], [1], [0, 0, 1, 1], [], []>} : vector<16x1024xbf16>, vector<1024x768xbf16>, vector<16x768xf32> -> vector<16x768xf32>
    %6 = arith.mulf %2, %2 : vector<16x768xf32>
    %7 = arith.truncf %6 : vector<16x768xf32> to vector<16x768xbf16>
    %8 = arith.mulf %5, %5 : vector<16x768xf32>
    %9 = arith.truncf %8 : vector<16x768xf32> to vector<16x768xbf16>
    %c0_8 = arith.constant 0 : index
    %c0_9 = arith.constant 0 : index
    %10 = vector.load %arg5[%c0_8, %c0_9] : memref<768x128xbf16, #tpu.memory_space<vmem>>, vector<768x128xbf16>
    %cst_10 = arith.constant dense<0.000000e+00> : vector<16x128xf32>
    %11 = tpu.matmul %7, %10, %cst_10 {dimension_numbers = #tpu.dot_dimension_numbers<[1], [0], [0], [1], [0, 0, 1, 1], [], []>} : vector<16x768xbf16>, vector<768x128xbf16>, vector<16x128xf32> -> vector<16x128xf32>
    %c0_11 = arith.constant 0 : index
    %c0_12 = arith.constant 0 : index
    %12 = vector.load %arg6[%c0_11, %c0_12] : memref<768x128xbf16, #tpu.memory_space<vmem>>, vector<768x128xbf16>
    %cst_13 = arith.constant dense<0.000000e+00> : vector<16x128xf32>
    %13 = tpu.matmul %9, %12, %cst_13 {dimension_numbers = #tpu.dot_dimension_numbers<[1], [0], [0], [1], [0, 0, 1, 1], [], []>} : vector<16x768xbf16>, vector<768x128xbf16>, vector<16x128xf32> -> vector<16x128xf32>
    %14 = arith.addf %11, %13 : vector<16x128xf32>
    %cst_14 = arith.constant 9.99999993E-9 : f32
    %15 = vector.broadcast %cst_14 : f32 to vector<16x128xf32>
    %16 = arith.maximumf %14, %15 : vector<16x128xf32>
    %17 = math.log %16 : vector<16x128xf32>
    %c0_15 = arith.constant 0 : index
    %c0_16 = arith.constant 0 : index
    %18 = vector.load %arg7[%c0_15, %c0_16] : memref<128x128xf32, #tpu.memory_space<vmem>>, vector<128x128xf32>
    %cst_17 = arith.constant dense<0.000000e+00> : vector<16x128xf32>
    %19 = tpu.matmul %17, %18, %cst_17 {dimension_numbers = #tpu.dot_dimension_numbers<[1], [0], [0], [1], [0, 0, 1, 1], [], []>} : vector<16x128xf32>, vector<128x128xf32>, vector<16x128xf32> -> vector<16x128xf32>
    %c0_18 = arith.constant 0 : index
    %c0_19 = arith.constant 0 : index
    %20 = vector.load %arg8[%c0_18, %c0_19] : memref<1x128xf32, #tpu.memory_space<vmem>>, vector<1x128xf32>
    %21 = vector.broadcast %20 : vector<1x128xf32> to vector<16x128xf32>
    %22 = arith.subf %19, %21 : vector<16x128xf32>
    %c0_20 = arith.constant 0 : index
    %c0_21 = arith.constant 0 : index
    %23 = vector.load %arg9[%c0_20, %c0_21] : memref<16x128xf32, #tpu.memory_space<vmem>>, vector<16x128xf32>
    tpu.vector_store %arg9[%c0_20, %c0_21], %22 {strides = array<i32>} : memref<16x128xf32, #tpu.memory_space<vmem>>, vector<16x128xf32>,
    return
  }
  func.func @transform_0(%arg0: i32) -> (i32, i32) {
    %c0_i32 = arith.constant 0 : i32
    %c0_i32_0 = arith.constant 0 : i32
    return %arg0, %c0_i32 : i32, i32
  }
  func.func @transform_1(%arg0: i32) -> (i32, i32) {
    %c0_i32 = arith.constant 0 : i32
    %c0_i32_0 = arith.constant 0 : i32
    return %arg0, %c0_i32 : i32, i32
  }
  func.func @transform_2(%arg0: i32) -> (i32, i32) {
    %c0_i32 = arith.constant 0 : i32
    %c0_i32_0 = arith.constant 0 : i32
    %c0_i32_1 = arith.constant 0 : i32
    return %c0_i32, %c0_i32_0 : i32, i32
  }
  func.func @transform_3(%arg0: i32) -> (i32, i32) {
    %c0_i32 = arith.constant 0 : i32
    %c0_i32_0 = arith.constant 0 : i32
    %c0_i32_1 = arith.constant 0 : i32
    return %c0_i32, %c0_i32_0 : i32, i32
  }
  func.func @transform_4(%arg0: i32) -> (i32, i32) {
    %c0_i32 = arith.constant 0 : i32
    %c0_i32_0 = arith.constant 0 : i32
    %c0_i32_1 = arith.constant 0 : i32
    return %c0_i32, %c0_i32_0 : i32, i32
  }
  func.func @transform_5(%arg0: i32) -> (i32, i32) {
    %c0_i32 = arith.constant 0 : i32
    %c0_i32_0 = arith.constant 0 : i32
    %c0_i32_1 = arith.constant 0 : i32
    return %c0_i32, %c0_i32_0 : i32, i32
  }
  func.func @transform_6(%arg0: i32) -> (i32, i32) {
    %c0_i32 = arith.constant 0 : i32
    %c0_i32_0 = arith.constant 0 : i32
    %c0_i32_1 = arith.constant 0 : i32
    return %c0_i32, %c0_i32_0 : i32, i32
  }
  func.func @transform_7(%arg0: i32) -> (i32, i32) {
    %c0_i32 = arith.constant 0 : i32
    %c0_i32_0 = arith.constant 0 : i32
    %c0_i32_1 = arith.constant 0 : i32
    return %c0_i32, %c0_i32_0 : i32, i32
  }
  func.func @transform_8(%arg0: i32) -> (i32, i32) {
    %c0_i32 = arith.constant 0 : i32
    %c0_i32_0 = arith.constant 0 : i32
    return %arg0, %c0_i32 : i32, i32
  }
}

</mosaic_0001>

<bundles_post_ra>
// kernel: mel_model_forward.1
= control target key start
LH: loop header
LB: loop body
LE: loop exit
PB: predicated region body
PF: predicated region fallthrough
CT: control target
= control target key end

     0   :  { %13 = vsyncpa [#allocation3], 0  ;;  %s10766_s0 = inlined_call_operand.vmem [shape: bf16[32,1024], index: 0, kind: input, shape index: {}]   ;;  %s10767_s1 = inlined_call_operand.vmem [shape: bf16[32,1024], index: 1, kind: input, shape index: {}]   ;;  %s10768_s2 = inlined_call_operand.hbm [shape: bf16[1024,768], index: 2, kind: input, shape index: {}]   ;;  %s10769_s3 = inlined_call_operand.hbm [shape: bf16[1024,768], index: 3, kind: input, shape index: {}]   ;;  %s10770_s4 = inlined_call_operand.vmem [shape: bf16[768,128], index: 4, kind: input, shape index: {}]   ;;  %s10771_s5 = inlined_call_operand.vmem [shape: bf16[768,128], index: 5, kind: input, shape index: {}]   ;;  %s10772_s6 = inlined_call_operand.hbm [shape: f32[128,128], index: 6, kind: input, shape index: {}]   ;;  %s10773_s7 = inlined_call_operand.hbm [shape: f32[1,128], index: 7, kind: input, shape index: {}]   ;;  %s10774_s8 = inlined_call_operand.vmem [shape: f32[32,128], index: 8, kind: output, shape index: {}]  }
   0x1   :  { %14 = vsyncpa [#allocation5], 0 }
   0x2   :  { %15 = vsyncpa [#allocation8], 0  ;;  %s10083_s27 = smov 0  }
   0x3 LB: > { %s7398_s28 = sadd.s32 4294967295, %s10028_s27   ;;  %p7400_p0 = scmp.ge.s32.totalorder %s10028_s27, 1  ;;  %s10028_s27 = sphi %s10083_s27, %s21_s27  }
   0x4   : > { %p230_p1 = scmp.lt.s32.totalorder %s10028_s27, 3  ;;  %p10093_p2 = scmp.eq.s32.totalorder %s7398_s28, 0 }
   0x5   : > { %s10030_s9 = smov [#allocation4]   ;;  %s10031_s11 = smov [#allocation2]  }
   0x6   : > { %s10778_s29 = scalar_select %p10093_p2, 1, 0 }
   0x7   : > { %p10097_p3 = pnand %p7400_p0, %p230_p1  ;;  %s255_s10 = sshll.u32 %s10030_s9, 4  ;;  %s10101_s10 = int_to_ptr.vmem [resolvable:$true] %s255_s10 }
   0x8   : > { %s242_s12 = sshll.u32 %s10031_s11, 4  ;;  %s10032_s14 = smov [#allocation6]   ;;  %s10105_s12 = int_to_ptr.vmem [resolvable:$true] %s242_s12 }
   0x9   : > { %s10779_s30 = scalar_select %p10097_p3, 1, 0 }
   0xa   : > { %p8609_p4 = pneg %p10097_p3  ;;  %s274_s15 = sshll.u32 %s10032_s14, 4  ;;  %s10113_s15 = int_to_ptr.vmem [resolvable:$true] %s274_s15 }
   0xb   : > { %s9898_s18 = scalar_lea.hbm %s10769_s3, 49152 }
   0xc   : > { %p10109_p5 = pnand %p10093_p2, %p8609_p4  ;;  %p9899_p6 = scmp.ne.s32.totalorder %s10769_s3, %s9898_s18 }
   0xd   : > { %p9905_p10 = scmp.lt.u32.totalorder %s9898_s18, %s10769_s3 }
   0xe   : > { %p10123_p7 = pneg %p10109_p5 }
  0x10   : > { %p9901_p8 = pnand %p10123_p7, %p9899_p6 }
  0x12   : > { %p9902_p9 = pneg %p9901_p8 }
  0x14   : > { %p9907_p11 = pnand %p9905_p10, %p9902_p9 }
  0x16   : > { %9910 = shalt.err (!%p9907_p11)
}
  0x17   : > { %s9911_s24 = scalar_lea.vmem %s10101_s10, 49152  ;;  %p9919_p1 = scmp.lt.s32.totalorder %s10101_s10, %s10101_s10 }
  0x18   : > { %p9912_p12 = scmp.ne.s32.totalorder %s10101_s10, %s9911_s24  ;;  %p9920_p4 = scmp.lt.s32.totalorder %s9911_s24, %s9911_s24 }
  0x1a   : > { %p9914_p13 = pnand %p9912_p12, %p10123_p7  ;;  %p9921_p6 = por %p9920_p4, %p9919_p1 }
  0x1c   : > { %p9915_p0 = pneg %p9914_p13 }
  0x1e   : > { %p9922_p8 = pnand %p9921_p6, %p9915_p0 }
  0x20   : > { %9925 = shalt.err (!%p9922_p8)
}
  0x21   : > { %s10033_s25 = smov 384   ;;  %s10034_s26 = smov 24  }
  0x22   : > { %8615 = dma.hbm_to_vmem [thread:$0]  (!%p10109_p5), %s10769_s3, 49152, %s10101_s10, [#allocation5], %s10033_s25, %s10033_s25, %s10034_s26  }
  0x23   : > { %s9926_s17 = scalar_lea.hbm %s10768_s2, 49152 }
  0x24   : > { %p9927_p9 = scmp.ne.s32.totalorder %s10768_s2, %s9926_s17  ;;  %p9933_p12 = scmp.lt.u32.totalorder %s9926_s17, %s10768_s2 }
  0x26   : > { %p9929_p10 = pnand %p9927_p9, %p10123_p7 }
  0x28   : > { %p9930_p11 = pneg %p9929_p10 }
  0x2a   : > { %p9935_p13 = pnand %p9933_p12, %p9930_p11 }
  0x2c   : > { %9938 = shalt.err (!%p9935_p13)
}
  0x2d   : > { %s9939_s10 = scalar_lea.vmem %s10105_s12, 49152  ;;  %p9947_p6 = scmp.lt.s32.totalorder %s10105_s12, %s10105_s12 }
  0x2e   : > { %p9940_p0 = scmp.ne.s32.totalorder %s10105_s12, %s9939_s10  ;;  %p9948_p8 = scmp.lt.s32.totalorder %s9939_s10, %s9939_s10 }
  0x30   : > { %p9942_p1 = pnand %p9940_p0, %p10123_p7  ;;  %p9949_p9 = por %p9948_p8, %p9947_p6 }
  0x32   : > { %p9943_p4 = pneg %p9942_p1 }
  0x34   : > { %p9950_p10 = pnand %p9949_p9, %p9943_p4 }
  0x36   : > { %9953 = shalt.err (!%p9950_p10)
}
  0x37   : > { %8612 = dma.hbm_to_vmem [thread:$0]  (!%p10109_p5), %s10768_s2, 49152, %s10105_s12, [#allocation3], %s10033_s25, %s10033_s25, %s10034_s26  }
  0x38   : > { %s9954_s14 = scalar_lea.hbm %s10772_s6, 2048 }
  0x39   : > { %p9955_p11 = scmp.ne.s32.totalorder %s10772_s6, %s9954_s14  ;;  %p9961_p0 = scmp.lt.u32.totalorder %s9954_s14, %s10772_s6 }
  0x3b   : > { %p9957_p12 = pnand %p9955_p11, %p10123_p7 }
  0x3d   : > { %p9958_p13 = pneg %p9957_p12 }
  0x3f   : > { %p9963_p1 = pnand %p9961_p0, %p9958_p13 }
  0x41   : > { %9966 = shalt.err (!%p9963_p1)
}
  0x42   : > { %s9967_s12 = scalar_lea.vmem %s10113_s15, 2048  ;;  %p9975_p9 = scmp.lt.s32.totalorder %s10113_s15, %s10113_s15 }
  0x43   : > { %p9968_p4 = scmp.ne.s32.totalorder %s10113_s15, %s9967_s12  ;;  %p9976_p10 = scmp.lt.s32.totalorder %s9967_s12, %s9967_s12 }
  0x45   : > { %p9970_p6 = pnand %p9968_p4, %p10123_p7  ;;  %p9977_p11 = por %p9976_p10, %p9975_p9 }
  0x47   : > { %p9971_p8 = pneg %p9970_p6 }
  0x49   : > { %p9978_p12 = pnand %p9977_p11, %p9971_p8 }
  0x4b   : > { %9981 = shalt.err (!%p9978_p12)
}
  0x4c   : > { %s10035_s25 = smov 128   ;;  %s10036_s26 = smov 8  }
  0x4d   : > { %8618 = dma.hbm_to_vmem [thread:$0]  (!%p10109_p5), %s10772_s6, 2048, %s10113_s15, [#allocation5], %s10035_s25, %s10035_s25, %s10036_s26  }
  0x4e   : > { %s10037_s10 = smov [#allocation7]   ;;  %s9982_s11 = scalar_lea.hbm %s10773_s7, 16 }
  0x4f   : > { %s288_s23 = sshll.u32 %s10037_s10, 4  ;;  %p9983_p13 = scmp.ne.s32.totalorder %s10773_s7, %s9982_s11  ;;  %s289_s23 = int_to_ptr.vmem [resolvable:$true] %s288_s23 }
  0x50   : > { %p9989_p4 = scmp.lt.u32.totalorder %s9982_s11, %s10773_s7 }
  0x51   : > { %p9985_p0 = pnand %p9983_p13, %p10123_p7 }
  0x53   : > { %p9986_p1 = pneg %p9985_p0 }
  0x55   : > { %p9991_p6 = pnand %p9989_p4, %p9986_p1 }
  0x57   : > { %9994 = shalt.err (!%p9991_p6)
}
  0x58   : > { %s9995_s15 = scalar_lea.vmem %s289_s23, 16  ;;  %s10002_s19 = scalar_lea.vmem %s289_s23, 32 }
  0x59   : > { %p9996_p8 = scmp.ne.s32.totalorder %s289_s23, %s9995_s15  ;;  %p10003_p11 = scmp.lt.s32.totalorder %s289_s23, %s289_s23 }
  0x5a   : > { %p10004_p12 = scmp.lt.s32.totalorder %s10002_s19, %s9995_s15 }
  0x5b   : > { %p9998_p9 = pnand %p9996_p8, %p10123_p7 }
  0x5c   : > { %p10005_p2 = por %p10004_p12, %p10003_p11 }
  0x5d   : > { %p9999_p10 = pneg %p9998_p9 }
  0x5f   : > { %p10006_p3 = pnand %p10005_p2, %p9999_p10 }
  0x61   : > { %10009 = shalt.err (!%p10006_p3)
}
  0x62   : > { %8621 = dma.hbm_to_vmem [thread:$0]  (!%p10109_p5), %s10773_s7, 16, %s289_s23, [#allocation8]  }
  0x63   : > { %p10782_p13 = scmp.ne.s32.totalorder %s10779_s30, 0 }
  0x64   : > { %p10783_p0 = scmp.ne.s32.totalorder (!%p10782_p13), %s10778_s29, 0 }
  0x65   : > { %321 = sbr.rel (%p10782_p13) target bundleno = 1616 (0x650), region = 52 }
  0x6c   : > { %10015 = dma.done.wait (%p10783_p0), [#allocation3], 49152  }
  0x6d   : > { %10017 = vsyncadd (%p10783_p0), [#allocation3], 4294918144 }
  0x6e   : > { %10019 = dma.done.wait (%p10783_p0), [#allocation5], 51200  }
  0x6f   : > { %10021 = vsyncadd (%p10783_p0), [#allocation5], 4294916096 }
  0x70   : > { %10023 = dma.done.wait (%p10783_p0), [#allocation8], 16  }
  0x71   : > { %10025 = vsyncadd (%p10783_p0), [#allocation8], 4294967280  ;;  %v8646_v0 = vld [vmem:[#allocation2 + $0x4] ss:$24 sps:$4 sm:$0xff]   ;;  %v8650_v2 = vld [vmem:[#allocation2] ss:$24 sps:$4 sm:$0xff]  }
  0x72   : > { %v8648_v1 = vld [vmem:[#allocation2 + $0xc] ss:$24 sps:$4 sm:$0xff]   ;;  %2747 = vmatprep.subr.bf16.mxu0 %v8646_v0  ;;  %v8651_v3 = vld [vmem:[#allocation2 + $0x8] ss:$24 sps:$4 sm:$0xff]   ;;  %v8654_v5 = vld [vmem:[#allocation2 + $0x3c] ss:$24 sps:$4 sm:$0xff]  }
  0x73   : > { %2919 = vmatprep.subr.bf16.mxu1 %v8648_v1  ;;  %v8652_v4 = vld [vmem:[#allocation2 + $0x34] ss:$24 sps:$4 sm:$0xff]   ;;  %2748 = vmatpush1.bf16.msra.mxu0 %v8650_v2  ;;  %v8656_v6 = vld [vmem:[#allocation2 + $0x30] ss:$24 sps:$4 sm:$0xff]   ;;  %v8658_v8 = vld [vmem:[#allocation2 + $0x64] ss:$24 sps:$4 sm:$0xff]  }
  0x74   : > { %2920 = vmatpush1.bf16.msra.mxu1 %v8651_v3  ;;  %2749 = vmatprep.subr.bf16.mxu0 %v8652_v4  ;;  %v8657_v7 = vld [vmem:[#allocation2 + $0x38] ss:$24 sps:$4 sm:$0xff]   ;;  %v8660_v9 = vld [vmem:[#allocation2 + $0x6c] ss:$24 sps:$4 sm:$0xff]   ;;  %v8663_v11 = vld [vmem:[#allocation2 + $0x68] ss:$24 sps:$4 sm:$0xff]  }
  0x75   : > { %2921 = vmatprep.subr.bf16.mxu1 %v8654_v5  ;;  %v8662_v10 = vld [vmem:[#allocation2 + $0x60] ss:$24 sps:$4 sm:$0xff]   ;;  %v8664_v12 = vld [vmem:[#allocation2 + $0x94] ss:$24 sps:$4 sm:$0xff]   ;;  %v8668_v14 = vld [vmem:[#allocation2 + $0x90] ss:$24 sps:$4 sm:$0xff]  }
  0x76   : > { %v8666_v13 = vld [vmem:[#allocation2 + $0x9c] ss:$24 sps:$4 sm:$0xff]   ;;  %v8669_v15 = vld [vmem:[#allocation2 + $0x98] ss:$24 sps:$4 sm:$0xff]   ;;  %v8672_v17 = vld [vmem:[#allocation2 + $0xcc] ss:$24 sps:$4 sm:$0xff]  }
  0x77   : > { %2750 = vmatpush1.bf16.msra.mxu0 %v8656_v6  ;;  %v8670_v16 = vld [vmem:[#allocation2 + $0xc4] ss:$24 sps:$4 sm:$0xff]   ;;  %v8674_v18 = vld [vmem:[#allocation2 + $0xc0] ss:$24 sps:$4 sm:$0xff]   ;;  %v8676_v20 = vld [vmem:[#allocation2 + $0xf4] ss:$24 sps:$4 sm:$0xff]  }
  0x78   : > { %2922 = vmatpush1.bf16.msra.mxu1 %v8657_v7  ;;  %2751 = vmatprep.subr.bf16.mxu0 %v8658_v8  ;;  %v8675_v19 = vld [vmem:[#allocation2 + $0xc8] ss:$24 sps:$4 sm:$0xff]   ;;  %v8678_v21 = vld [vmem:[#allocation2 + $0xfc] ss:$24 sps:$4 sm:$0xff]   ;;  %v8681_v23 = vld [vmem:[#allocation2 + $0xf8] ss:$24 sps:$4 sm:$0xff]  }
  0x79   : > { %2923 = vmatprep.subr.bf16.mxu1 %v8660_v9  ;;  %v8680_v22 = vld [vmem:[#allocation2 + $0xf0] ss:$24 sps:$4 sm:$0xff]   ;;  %v8682_v24 = vld [vmem:[#allocation2 + $0x124] ss:$24 sps:$4 sm:$0xff]   ;;  %v8686_v26 = vld [vmem:[#allocation2 + $0x120] ss:$24 sps:$4 sm:$0xff]  }
  0x7a   : > { %v8684_v25 = vld [vmem:[#allocation2 + $0x12c] ss:$24 sps:$4 sm:$0xff]   ;;  %v8687_v27 = vld [vmem:[#allocation2 + $0x128] ss:$24 sps:$4 sm:$0xff]   ;;  %v8690_v29 = vld [vmem:[#allocation2 + $0x15c] ss:$24 sps:$4 sm:$0xff]  }
  0x7b   : > { %2752 = vmatpush1.bf16.msra.mxu0 %v8662_v10  ;;  %v8688_v28 = vld [vmem:[#allocation2 + $0x154] ss:$24 sps:$4 sm:$0xff]   ;;  %s7411_s29 = sshll.u32 %s7398_s28, 1  ;;  %v8692_v30 = vld [vmem:[#allocation2 + $0x150] ss:$24 sps:$4 sm:$0xff]  }
  0x7c   : > { %2924 = vmatpush1.bf16.msra.mxu1 %v8663_v11  ;;  %2753 = vmatprep.subr.bf16.mxu0 %v8664_v12  ;;  %v8693_v31 = vld [vmem:[#allocation2 + $0x158] ss:$24 sps:$4 sm:$0xff]   ;;  %v8694_v32 = vld [vmem:[#allocation2 + $0x184] ss:$24 sps:$4 sm:$0xff]   ;;  %p375_p2 = scmp.lt.s32.totalorder %s7411_s29, 3 }
  0x7d   : > { %2925 = vmatprep.subr.bf16.mxu1 %v8666_v13  ;;  %v8696_v33 = vld [vmem:[#allocation2 + $0x18c] ss:$24 sps:$4 sm:$0xff]   ;;  %v8698_v34 = vld [vmem:[#allocation2 + $0x180] ss:$24 sps:$4 sm:$0xff]   ;;  %v8702_v37 = vld [vmem:[#allocation2 + $0x1bc] ss:$24 sps:$4 sm:$0xff]  }
  0x7e   : > { %v8699_v35 = vld [vmem:[#allocation2 + $0x188] ss:$24 sps:$4 sm:$0xff]   ;;  %v8700_v36 = vld [vmem:[#allocation2 + $0x1b4] ss:$24 sps:$4 sm:$0xff]   ;;  %s10785_s29 = smov (!%p375_p2, %s7411_s29), 3 }
  0x7f   : > { %2754 = vmatpush1.bf16.msra.mxu0 %v8668_v14  ;;  %v8704_v38 = vld [vmem:[#allocation2 + $0x1b0] ss:$24 sps:$4 sm:$0xff]   ;;  %v8706_v40 = vld [vmem:[#allocation2 + $0x1e4] ss:$24 sps:$4 sm:$0xff]   ;;  %s8302_s28 = sshll.u32 %s10785_s29, 5  ;;  %s7418_s25 = sshll.u32 %s10785_s29, 3 }
  0x80   : > { %2926 = vmatpush1.bf16.msra.mxu1 %v8669_v15  ;;  %2755 = vmatprep.subr.bf16.mxu0 %v8670_v16  ;;  %v8705_v39 = vld [vmem:[#allocation2 + $0x1b8] ss:$24 sps:$4 sm:$0xff]   ;;  %v8708_v41 = vld [vmem:[#allocation2 + $0x1ec] ss:$24 sps:$4 sm:$0xff]   ;;  %v8711_v43 = vld [vmem:[#allocation2 + $0x1e8] ss:$24 sps:$4 sm:$0xff]   ;;  %s10232_s21 = scalar_lea.vmem %s10766_s0, %s8302_s28  ;;  %s10297_s22 = scalar_lea.vmem %s10767_s1, %s8302_s28 }
  0x81   : > { %2927 = vmatprep.subr.bf16.mxu1 %v8672_v17  ;;  %v8710_v42 = vld [vmem:[#allocation2 + $0x1e0] ss:$24 sps:$4 sm:$0xff]   ;;  %v8712_v44 = vld [vmem:[#allocation2 + $0x214] ss:$24 sps:$4 sm:$0xff]   ;;  %v8716_v48 = vld [vmem:[#allocation2 + $0x210] ss:$24 sps:$4 sm:$0xff]   ;;  %s392_s13 = scalar_lea.vmem %s10774_s8, %s7418_s25 }
  0x82   : > { %v8714_v45 = vld [vmem:[#allocation2 + $0x21c] ss:$24 sps:$4 sm:$0xff]   ;;  %v395_v46 = vld [vmem:[%s10232_s21] sm:$0xff]  ;;  %v8717_v49 = vld [vmem:[#allocation2 + $0x218] ss:$24 sps:$4 sm:$0xff]  }
  0x83   : > { %2756 = vmatpush1.bf16.msra.mxu0 %v8674_v18  ;;  %v399_v47 = vld [vmem:[%s10232_s21 + $0x20] sm:$0xff]  ;;  %v8724_v55 = vld [vmem:[#allocation2 + $0x274] ss:$24 sps:$4 sm:$0xff]   ;;  %v8728_v57 = vld [vmem:[#allocation2 + $0x270] ss:$24 sps:$4 sm:$0xff]  }
  0x84   : > { %2928 = vmatpush1.bf16.msra.mxu1 %v8675_v19  ;;  %2757 = vmatprep.subr.bf16.mxu0 %v8676_v20  ;;  %v10236_v50 = vcombine.high %v395_v46, %v399_v47  ;;  %v8718_v51 = vld [vmem:[#allocation2 + $0x244] ss:$24 sps:$4 sm:$0xff]   ;;  %v8722_v53 = vld [vmem:[#allocation2 + $0x240] ss:$24 sps:$4 sm:$0xff]   ;;  %v8736_v63 = vld [vmem:[#allocation2 + $0x2d4] ss:$24 sps:$4 sm:$0xff]   ;;  %v10240_v5 = vcombine.low %v395_v46, %v399_v47 }
  0x85   : > { %2929 = vmatprep.subr.bf16.mxu1 %v8678_v21  ;;  %v8720_v52 = vld [vmem:[#allocation2 + $0x24c] ss:$24 sps:$4 sm:$0xff]   ;;  %v8723_v54 = vld [vmem:[#allocation2 + $0x248] ss:$24 sps:$4 sm:$0xff]   ;;  %v8726_v56 = vld [vmem:[#allocation2 + $0x27c] ss:$24 sps:$4 sm:$0xff]  }
  0x86   : > { %2779 = vmatprep.mubr.bf16.mxu0 %v10236_v50  ;;  %2951 = vmatprep.mubr.bf16.mxu1 %v10236_v50  ;;  %v8729_v58 = vld [vmem:[#allocation2 + $0x278] ss:$24 sps:$4 sm:$0xff]   ;;  %v8730_v59 = vld [vmem:[#allocation2 + $0x2a4] ss:$24 sps:$4 sm:$0xff]   ;;  %v8735_v62 = vld [vmem:[#allocation2 + $0x2a8] ss:$24 sps:$4 sm:$0xff]  }
  0x87   : > { %2758 = vmatpush1.bf16.msra.mxu0 %v8680_v22  ;;  %v8732_v60 = vld [vmem:[#allocation2 + $0x2ac] ss:$24 sps:$4 sm:$0xff]   ;;  %v8734_v61 = vld [vmem:[#allocation2 + $0x2a0] ss:$24 sps:$4 sm:$0xff]   ;;  %v8738_v0 = vld [vmem:[#allocation2 + $0x2dc] ss:$24 sps:$4 sm:$0xff]  }
  0x88   : > { %2930 = vmatpush1.bf16.msra.mxu1 %v8681_v23  ;;  %2759 = vmatprep.subr.bf16.mxu0 %v8682_v24  ;;  %v8740_v1 = vld [vmem:[#allocation2 + $0x2d0] ss:$24 sps:$4 sm:$0xff]   ;;  %v8744_v3 = vld [vmem:[#allocation2 + $0x304] ss:$24 sps:$4 sm:$0xff]   ;;  %v8742_v6 = vld [vmem:[#allocation2 + $0x300] ss:$24 sps:$4 sm:$0xff]  }
  0x89   : > { %2931 = vmatprep.subr.bf16.mxu1 %v8684_v25  ;;  %v8741_v2 = vld [vmem:[#allocation2 + $0x2d8] ss:$24 sps:$4 sm:$0xff]   ;;  %v8747_v4 = vld [vmem:[#allocation2 + $0x30c] ss:$24 sps:$4 sm:$0xff]   ;;  %v8745_v7 = vld [vmem:[#allocation2 + $0x308] ss:$24 sps:$4 sm:$0xff]  }
  0x8a   : > { %v8750_v8 = vld [vmem:[#allocation2 + $0x334] ss:$24 sps:$4 sm:$0xff]   ;;  %v8748_v10 = vld [vmem:[#allocation2 + $0x330] ss:$24 sps:$4 sm:$0xff]   ;;  %v8756_v12 = vld [vmem:[#allocation2 + $0x364] ss:$24 sps:$4 sm:$0xff]  }
  0x8b   : > { %2760 = vmatpush1.bf16.msra.mxu0 %v8686_v26  ;;  %v8753_v9 = vld [vmem:[#allocation2 + $0x33c] ss:$24 sps:$4 sm:$0xff]   ;;  %v8751_v11 = vld [vmem:[#allocation2 + $0x338] ss:$24 sps:$4 sm:$0xff]   ;;  %v8759_v13 = vld [vmem:[#allocation2 + $0x36c] ss:$24 sps:$4 sm:$0xff]  }
  0x8c   : > { %2932 = vmatpush1.bf16.msra.mxu1 %v8687_v27  ;;  %2761 = vmatprep.subr.bf16.mxu0 %v8688_v28  ;;  %v8754_v14 = vld [vmem:[#allocation2 + $0x360] ss:$24 sps:$4 sm:$0xff]   ;;  %v8762_v16 = vld [vmem:[#allocation2 + $0x394] ss:$24 sps:$4 sm:$0xff]   ;;  %v8760_v18 = vld [vmem:[#allocation2 + $0x390] ss:$24 sps:$4 sm:$0xff]  }
  0x8d   : > { %2933 = vmatprep.subr.bf16.mxu1 %v8690_v29  ;;  %v8757_v15 = vld [vmem:[#allocation2 + $0x368] ss:$24 sps:$4 sm:$0xff]   ;;  %v8765_v17 = vld [vmem:[#allocation2 + $0x39c] ss:$24 sps:$4 sm:$0xff]   ;;  %v8763_v19 = vld [vmem:[#allocation2 + $0x398] ss:$24 sps:$4 sm:$0xff]  }
  0x8e   : > { %v8768_v20 = vld [vmem:[#allocation2 + $0x3c4] ss:$24 sps:$4 sm:$0xff]   ;;  %v8766_v22 = vld [vmem:[#allocation2 + $0x3c0] ss:$24 sps:$4 sm:$0xff]   ;;  %v8774_v24 = vld [vmem:[#allocation2 + $0x3f4] ss:$24 sps:$4 sm:$0xff]  }
  0x8f   : > { %2762 = vmatpush1.bf16.msra.mxu0 %v8692_v30  ;;  %v8771_v21 = vld [vmem:[#allocation2 + $0x3cc] ss:$24 sps:$4 sm:$0xff]   ;;  %v8769_v23 = vld [vmem:[#allocation2 + $0x3c8] ss:$24 sps:$4 sm:$0xff]   ;;  %v8777_v25 = vld [vmem:[#allocation2 + $0x3fc] ss:$24 sps:$4 sm:$0xff]  }
  0x90   : > { %2934 = vmatpush1.bf16.msra.mxu1 %v8693_v31  ;;  %2763 = vmatprep.subr.bf16.mxu0 %v8694_v32  ;;  %v8772_v26 = vld [vmem:[#allocation2 + $0x3f0] ss:$24 sps:$4 sm:$0xff]   ;;  %v8780_v28 = vld [vmem:[#allocation2 + $0x424] ss:$24 sps:$4 sm:$0xff]   ;;  %v8778_v32 = vld [vmem:[#allocation2 + $0x420] ss:$24 sps:$4 sm:$0xff]  }
  0x91   : > { %2935 = vmatprep.subr.bf16.mxu1 %v8696_v33  ;;  %v8775_v27 = vld [vmem:[#allocation2 + $0x3f8] ss:$24 sps:$4 sm:$0xff]   ;;  %v8783_v29 = vld [vmem:[#allocation2 + $0x42c] ss:$24 sps:$4 sm:$0xff]   ;;  %v8781_v33 = vld [vmem:[#allocation2 + $0x428] ss:$24 sps:$4 sm:$0xff]  }
  0x92   : > { %v10245_v30 = vld [vmem:[%s10232_s21 + $0x8] sm:$0xff]  ;;  %v8799_v46 = vld [vmem:[#allocation2 + $0x4b8] ss:$24 sps:$4 sm:$0xff]   ;;  %v8804_v47 = vld [vmem:[#allocation2 + $0x4e4] ss:$24 sps:$4 sm:$0xff]  }
  0x93   : > { %2764 = vmatpush1.bf16.msra.mxu0 %v8698_v34  ;;  %v10248_v31 = vld [vmem:[%s10232_s21 + $0x28] sm:$0xff] }
  0x94   : > { %2936 = vmatpush1.bf16.msra.mxu1 %v8699_v35  ;;  %2765 = vmatprep.subr.bf16.mxu0 %v8700_v36  ;;  %v10252_v34 = vcombine.high %v10245_v30, %v10248_v31  ;;  %v8786_v35 = vld [vmem:[#allocation2 + $0x454] ss:$24 sps:$4 sm:$0xff]  }
  0x95   : > { %2937 = vmatprep.subr.bf16.mxu1 %v8702_v37  ;;  %v8789_v36 = vld [vmem:[#allocation2 + $0x45c] ss:$24 sps:$4 sm:$0xff]   ;;  %v8784_v37 = vld [vmem:[#allocation2 + $0x450] ss:$24 sps:$4 sm:$0xff]  }
  0x97   : > { %2766 = vmatpush1.bf16.msra.mxu0 %v8704_v38  ;;  %v8787_v38 = vld [vmem:[#allocation2 + $0x458] ss:$24 sps:$4 sm:$0xff]  }
  0x98   : > { %2938 = vmatpush1.bf16.msra.mxu1 %v8705_v39  ;;  %2767 = vmatprep.subr.bf16.mxu0 %v8706_v40  ;;  %v8792_v39 = vld [vmem:[#allocation2 + $0x484] ss:$24 sps:$4 sm:$0xff]  }
  0x99   : > { %2939 = vmatprep.subr.bf16.mxu1 %v8708_v41  ;;  %v8795_v40 = vld [vmem:[#allocation2 + $0x48c] ss:$24 sps:$4 sm:$0xff]   ;;  %v8790_v41 = vld [vmem:[#allocation2 + $0x480] ss:$24 sps:$4 sm:$0xff]  }
  0x9b   : > { %2768 = vmatpush1.bf16.msra.mxu0 %v8710_v42  ;;  %v8793_v42 = vld [vmem:[#allocation2 + $0x488] ss:$24 sps:$4 sm:$0xff]  }
  0x9c   : > { %2940 = vmatpush1.bf16.msra.mxu1 %v8711_v43  ;;  %2769 = vmatprep.subr.bf16.mxu0 %v8712_v44  ;;  %v8798_v43 = vld [vmem:[#allocation2 + $0x4b4] ss:$24 sps:$4 sm:$0xff]  }
  0x9d   : > { %2941 = vmatprep.subr.bf16.mxu1 %v8714_v45  ;;  %v8801_v44 = vld [vmem:[#allocation2 + $0x4bc] ss:$24 sps:$4 sm:$0xff]   ;;  %v8796_v45 = vld [vmem:[#allocation2 + $0x4b0] ss:$24 sps:$4 sm:$0xff]  }
  0x9f   : > { %2770 = vmatpush1.bf16.msra.mxu0 %v8716_v48  ;;  %v8807_v48 = vld [vmem:[#allocation2 + $0x4ec] ss:$24 sps:$4 sm:$0xff]  }
  0xa0   : > { %2942 = vmatpush1.bf16.msra.mxu1 %v8717_v49  ;;  %2771 = vmatprep.subr.bf16.mxu0 %v8718_v51  ;;  %v8802_v49 = vld [vmem:[#allocation2 + $0x4e0] ss:$24 sps:$4 sm:$0xff]  }
  0xa1   : > { %2943 = vmatprep.subr.bf16.mxu1 %v8720_v52  ;;  %v8805_v51 = vld [vmem:[#allocation2 + $0x4e8] ss:$24 sps:$4 sm:$0xff]   ;;  %v8810_v52 = vld [vmem:[#allocation2 + $0x514] ss:$24 sps:$4 sm:$0xff]  }
  0xa3   : > { %2772 = vmatpush1.bf16.msra.mxu0 %v8722_v53  ;;  %v8813_v53 = vld [vmem:[#allocation2 + $0x51c] ss:$24 sps:$4 sm:$0xff]  }
  0xa4   : > { %2944 = vmatpush1.bf16.msra.mxu1 %v8723_v54  ;;  %2773 = vmatprep.subr.bf16.mxu0 %v8724_v55  ;;  %v8808_v54 = vld [vmem:[#allocation2 + $0x510] ss:$24 sps:$4 sm:$0xff]  }
  0xa5   : > { %2945 = vmatprep.subr.bf16.mxu1 %v8726_v56  ;;  %v8811_v55 = vld [vmem:[#allocation2 + $0x518] ss:$24 sps:$4 sm:$0xff]   ;;  %v8816_v56 = vld [vmem:[#allocation2 + $0x544] ss:$24 sps:$4 sm:$0xff]  }
  0xa7   : > { %2774 = vmatpush1.bf16.msra.mxu0 %v8728_v57  ;;  %v8819_v57 = vld [vmem:[#allocation2 + $0x54c] ss:$24 sps:$4 sm:$0xff]  }
  0xa8   : > { %2946 = vmatpush1.bf16.msra.mxu1 %v8729_v58  ;;  %2775 = vmatprep.subr.bf16.mxu0 %v8730_v59  ;;  %v8814_v58 = vld [vmem:[#allocation2 + $0x540] ss:$24 sps:$4 sm:$0xff]  }
  0xa9   : > { %2947 = vmatprep.subr.bf16.mxu1 %v8732_v60  ;;  %v8817_v59 = vld [vmem:[#allocation2 + $0x548] ss:$24 sps:$4 sm:$0xff]   ;;  %v8822_v60 = vld [vmem:[#allocation2 + $0x574] ss:$24 sps:$4 sm:$0xff]  }
  0xab   : > { %2776 = vmatpush1.bf16.msra.mxu0 %v8734_v61  ;;  %v8825_v61 = vld [vmem:[#allocation2 + $0x57c] ss:$24 sps:$4 sm:$0xff]  }
  0xac   : > { %2948 = vmatpush1.bf16.msra.mxu1 %v8735_v62  ;;  %2777 = vmatprep.subr.bf16.mxu0 %v8736_v63  ;;  %v8820_v62 = vld [vmem:[#allocation2 + $0x570] ss:$24 sps:$4 sm:$0xff]  }
  0xad   : > { %2949 = vmatprep.subr.bf16.mxu1 %v8738_v0  ;;  %v8823_v63 = vld [vmem:[#allocation2 + $0x578] ss:$24 sps:$4 sm:$0xff]   ;;  %v8828_v0 = vld [vmem:[#allocation2 + $0x5a4] ss:$24 sps:$4 sm:$0xff]  }
  0xaf   : > { %2778 = vmatpush1.bf16.msra.mxu0 %v8740_v1  ;;  %v8831_v1 = vld [vmem:[#allocation2 + $0x5ac] ss:$24 sps:$4 sm:$0xff]  }
  0xb0   : > { %2950 = vmatpush1.bf16.msra.mxu1 %v8741_v2  ;;  %2790 = vmatprep.subr.bf16.mxu0 %v8744_v3  ;;  %v8826_v2 = vld [vmem:[#allocation2 + $0x5a0] ss:$24 sps:$4 sm:$0xff]  }
  0xb1   : > { %2962 = vmatprep.subr.bf16.mxu1 %v8747_v4  ;;  %v8829_v3 = vld [vmem:[#allocation2 + $0x5a8] ss:$24 sps:$4 sm:$0xff]   ;;  %v8834_v4 = vld [vmem:[#allocation2 + $0x5d4] ss:$24 sps:$4 sm:$0xff]  }
  0xb2   : > { %2780 = vmatmul.mubr.bf16.vlgmr.msra.gmra.mrb[0].mxu0 %v10240_v5 }
  0xb3   : > { %2952 = vmatmul.mubr.bf16.vlgmr.msra.gmra.mrb[0].mxu1 %v10240_v5  ;;  %2791 = vmatpush1.bf16.msra.mxu0 %v8742_v6  ;;  %v8837_v6 = vld [vmem:[#allocation2 + $0x5dc] ss:$24 sps:$4 sm:$0xff]  }
  0xb4   : > { %2963 = vmatpush1.bf16.msra.mxu1 %v8745_v7  ;;  %2792 = vmatprep.subr.bf16.mxu0 %v8750_v8  ;;  %v8832_v7 = vld [vmem:[#allocation2 + $0x5d0] ss:$24 sps:$4 sm:$0xff]  }
  0xb5   : > { %2964 = vmatprep.subr.bf16.mxu1 %v8753_v9  ;;  %2822 = vmatprep.mubr.bf16.mxu0 %v10252_v34  ;;  %v8835_v8 = vld [vmem:[#allocation2 + $0x5d8] ss:$24 sps:$4 sm:$0xff]   ;;  %v8840_v9 = vld [vmem:[#allocation2 + $0x604] ss:$24 sps:$4 sm:$0xff]  }
  0xb6   : > { %2994 = vmatprep.mubr.bf16.mxu1 %v10252_v34 }
  0xb7   : > { %2793 = vmatpush1.bf16.msra.mxu0 %v8748_v10  ;;  %v8843_v10 = vld [vmem:[#allocation2 + $0x60c] ss:$24 sps:$4 sm:$0xff]  }
  0xb8   : > { %2965 = vmatpush1.bf16.msra.mxu1 %v8751_v11  ;;  %2794 = vmatprep.subr.bf16.mxu0 %v8756_v12  ;;  %v10258_v11 = vcombine.low %v10245_v30, %v10248_v31  ;;  %v8838_v12 = vld [vmem:[#allocation2 + $0x600] ss:$24 sps:$4 sm:$0xff]   ;;  %v8867_v30 = vld [vmem:[#allocation2 + $0x6cc] ss:$24 sps:$4 sm:$0xff]  }
  0xb9   : > { %2966 = vmatprep.subr.bf16.mxu1 %v8759_v13  ;;  %v8841_v13 = vld [vmem:[#allocation2 + $0x608] ss:$24 sps:$4 sm:$0xff]  }
  0xba   : > { %v8862_v31 = vld [vmem:[#allocation2 + $0x6c0] ss:$24 sps:$4 sm:$0xff]  }
  0xbb   : > { %2795 = vmatpush1.bf16.msra.mxu0 %v8754_v14  ;;  %v8846_v14 = vld [vmem:[#allocation2 + $0x634] ss:$24 sps:$4 sm:$0xff]  }
  0xbc   : > { %2967 = vmatpush1.bf16.msra.mxu1 %v8757_v15  ;;  %2796 = vmatprep.subr.bf16.mxu0 %v8762_v16  ;;  %v8849_v15 = vld [vmem:[#allocation2 + $0x63c] ss:$24 sps:$4 sm:$0xff]  }
  0xbd   : > { %2968 = vmatprep.subr.bf16.mxu1 %v8765_v17  ;;  %v10261_v16 = vld [vmem:[%s10232_s21 + $0x10] sm:$0xff] }
  0xbe   : > { %v10264_v17 = vld [vmem:[%s10232_s21 + $0x30] sm:$0xff] }
  0xbf   : > { %2797 = vmatpush1.bf16.msra.mxu0 %v8760_v18  ;;  %v10268_v18 = vcombine.high %v10261_v16, %v10264_v17 }
  0xc0   : > { %2969 = vmatpush1.bf16.msra.mxu1 %v8763_v19  ;;  %2798 = vmatprep.subr.bf16.mxu0 %v8768_v20  ;;  %v8844_v19 = vld [vmem:[#allocation2 + $0x630] ss:$24 sps:$4 sm:$0xff]  }
  0xc1   : > { %2970 = vmatprep.subr.bf16.mxu1 %v8771_v21  ;;  %v8847_v20 = vld [vmem:[#allocation2 + $0x638] ss:$24 sps:$4 sm:$0xff]   ;;  %v8852_v21 = vld [vmem:[#allocation2 + $0x664] ss:$24 sps:$4 sm:$0xff]  }
  0xc3   : > { %2799 = vmatpush1.bf16.msra.mxu0 %v8766_v22  ;;  %v8855_v22 = vld [vmem:[#allocation2 + $0x66c] ss:$24 sps:$4 sm:$0xff]  }
  0xc4   : > { %2971 = vmatpush1.bf16.msra.mxu1 %v8769_v23  ;;  %2800 = vmatprep.subr.bf16.mxu0 %v8774_v24  ;;  %v8850_v23 = vld [vmem:[#allocation2 + $0x660] ss:$24 sps:$4 sm:$0xff]  }
  0xc5   : > { %2972 = vmatprep.subr.bf16.mxu1 %v8777_v25  ;;  %v8853_v24 = vld [vmem:[#allocation2 + $0x668] ss:$24 sps:$4 sm:$0xff]   ;;  %v8858_v25 = vld [vmem:[#allocation2 + $0x694] ss:$24 sps:$4 sm:$0xff]  }
  0xc7   : > { %2801 = vmatpush1.bf16.msra.mxu0 %v8772_v26  ;;  %v8861_v26 = vld [vmem:[#allocation2 + $0x69c] ss:$24 sps:$4 sm:$0xff]  }
  0xc8   : > { %2973 = vmatpush1.bf16.msra.mxu1 %v8775_v27  ;;  %2802 = vmatprep.subr.bf16.mxu0 %v8780_v28  ;;  %v8856_v27 = vld [vmem:[#allocation2 + $0x690] ss:$24 sps:$4 sm:$0xff]  }
  0xc9   : > { %2974 = vmatprep.subr.bf16.mxu1 %v8783_v29  ;;  %v8859_v28 = vld [vmem:[#allocation2 + $0x698] ss:$24 sps:$4 sm:$0xff]   ;;  %v8864_v29 = vld [vmem:[#allocation2 + $0x6c4] ss:$24 sps:$4 sm:$0xff]  }
  0xcb   : > { %2803 = vmatpush1.bf16.msra.mxu0 %v8778_v32  ;;  %v8865_v32 = vld [vmem:[#allocation2 + $0x6c8] ss:$24 sps:$4 sm:$0xff]  }
  0xcc   : > { %2975 = vmatpush1.bf16.msra.mxu1 %v8781_v33  ;;  %2804 = vmatprep.subr.bf16.mxu0 %v8786_v35  ;;  %v8870_v33 = vld [vmem:[#allocation2 + $0x6f4] ss:$24 sps:$4 sm:$0xff]  }
  0xcd   : > { %2976 = vmatprep.subr.bf16.mxu1 %v8789_v36  ;;  %v8873_v35 = vld [vmem:[#allocation2 + $0x6fc] ss:$24 sps:$4 sm:$0xff]   ;;  %v8868_v36 = vld [vmem:[#allocation2 + $0x6f0] ss:$24 sps:$4 sm:$0xff]  }
  0xcf   : > { %2805 = vmatpush1.bf16.msra.mxu0 %v8784_v37  ;;  %v8871_v37 = vld [vmem:[#allocation2 + $0x6f8] ss:$24 sps:$4 sm:$0xff]  }
  0xd0   : > { %2977 = vmatpush1.bf16.msra.mxu1 %v8787_v38  ;;  %2806 = vmatprep.subr.bf16.mxu0 %v8792_v39  ;;  %v8876_v38 = vld [vmem:[#allocation2 + $0x724] ss:$24 sps:$4 sm:$0xff]  }
  0xd1   : > { %2978 = vmatprep.subr.bf16.mxu1 %v8795_v40  ;;  %v8879_v39 = vld [vmem:[#allocation2 + $0x72c] ss:$24 sps:$4 sm:$0xff]   ;;  %v8874_v40 = vld [vmem:[#allocation2 + $0x720] ss:$24 sps:$4 sm:$0xff]  }
  0xd3   : > { %2807 = vmatpush1.bf16.msra.mxu0 %v8790_v41  ;;  %v8877_v41 = vld [vmem:[#allocation2 + $0x728] ss:$24 sps:$4 sm:$0xff]  }
  0xd4   : > { %2979 = vmatpush1.bf16.msra.mxu1 %v8793_v42  ;;  %2808 = vmatprep.subr.bf16.mxu0 %v8798_v43  ;;  %v8882_v42 = vld [vmem:[#allocation2 + $0x754] ss:$24 sps:$4 sm:$0xff]  }
  0xd5   : > { %2980 = vmatprep.subr.bf16.mxu1 %v8801_v44  ;;  %v8885_v43 = vld [vmem:[#allocation2 + $0x75c] ss:$24 sps:$4 sm:$0xff]   ;;  %v8880_v44 = vld [vmem:[#allocation2 + $0x750] ss:$24 sps:$4 sm:$0xff]  }
  0xd7   : > { %2809 = vmatpush1.bf16.msra.mxu0 %v8796_v45  ;;  %v8883_v45 = vld [vmem:[#allocation2 + $0x758] ss:$24 sps:$4 sm:$0xff]  }
  0xd8   : > { %2981 = vmatpush1.bf16.msra.mxu1 %v8799_v46  ;;  %2810 = vmatprep.subr.bf16.mxu0 %v8804_v47  ;;  %v8888_v46 = vld [vmem:[#allocation2 + $0x784] ss:$24 sps:$4 sm:$0xff]  }
  0xd9   : > { %2982 = vmatprep.subr.bf16.mxu1 %v8807_v48  ;;  %v8891_v47 = vld [vmem:[#allocation2 + $0x78c] ss:$24 sps:$4 sm:$0xff]   ;;  %v8886_v48 = vld [vmem:[#allocation2 + $0x780] ss:$24 sps:$4 sm:$0xff]  }
  0xdb   : > { %2811 = vmatpush1.bf16.msra.mxu0 %v8802_v49  ;;  %v8889_v49 = vld [vmem:[#allocation2 + $0x788] ss:$24 sps:$4 sm:$0xff]  }
  0xdc   : > { %2983 = vmatpush1.bf16.msra.mxu1 %v8805_v51  ;;  %2812 = vmatprep.subr.bf16.mxu0 %v8810_v52  ;;  %v8894_v51 = vld [vmem:[#allocation2 + $0x7b4] ss:$24 sps:$4 sm:$0xff]  }
  0xdd   : > { %2984 = vmatprep.subr.bf16.mxu1 %v8813_v53  ;;  %v8897_v52 = vld [vmem:[#allocation2 + $0x7bc] ss:$24 sps:$4 sm:$0xff]   ;;  %v8892_v53 = vld [vmem:[#allocation2 + $0x7b0] ss:$24 sps:$4 sm:$0xff]  }
  0xdf   : > { %2813 = vmatpush1.bf16.msra.mxu0 %v8808_v54  ;;  %v8895_v54 = vld [vmem:[#allocation2 + $0x7b8] ss:$24 sps:$4 sm:$0xff]  }
  0xe0   : > { %2985 = vmatpush1.bf16.msra.mxu1 %v8811_v55  ;;  %2814 = vmatprep.subr.bf16.mxu0 %v8816_v56  ;;  %v8900_v55 = vld [vmem:[#allocation2 + $0x7e4] ss:$24 sps:$4 sm:$0xff]  }
  0xe1   : > { %2986 = vmatprep.subr.bf16.mxu1 %v8819_v57  ;;  %v8903_v56 = vld [vmem:[#allocation2 + $0x7ec] ss:$24 sps:$4 sm:$0xff]   ;;  %v8898_v57 = vld [vmem:[#allocation2 + $0x7e0] ss:$24 sps:$4 sm:$0xff]  }
  0xe3   : > { %2815 = vmatpush1.bf16.msra.mxu0 %v8814_v58  ;;  %v8901_v58 = vld [vmem:[#allocation2 + $0x7e8] ss:$24 sps:$4 sm:$0xff]  }
  0xe4   : > { %2987 = vmatpush1.bf16.msra.mxu1 %v8817_v59  ;;  %2816 = vmatprep.subr.bf16.mxu0 %v8822_v60  ;;  %v8906_v59 = vld [vmem:[#allocation2 + $0x814] ss:$24 sps:$4 sm:$0xff]  }
  0xe5   : > { %2988 = vmatprep.subr.bf16.mxu1 %v8825_v61  ;;  %v8909_v60 = vld [vmem:[#allocation2 + $0x81c] ss:$24 sps:$4 sm:$0xff]   ;;  %v8904_v61 = vld [vmem:[#allocation2 + $0x810] ss:$24 sps:$4 sm:$0xff]  }
  0xe7   : > { %2817 = vmatpush1.bf16.msra.mxu0 %v8820_v62  ;;  %v8907_v62 = vld [vmem:[#allocation2 + $0x818] ss:$24 sps:$4 sm:$0xff]  }
  0xe8   : > { %2989 = vmatpush1.bf16.msra.mxu1 %v8823_v63  ;;  %2818 = vmatprep.subr.bf16.mxu0 %v8828_v0  ;;  %v8912_v63 = vld [vmem:[#allocation2 + $0x844] ss:$24 sps:$4 sm:$0xff]  }
  0xe9   : > { %2990 = vmatprep.subr.bf16.mxu1 %v8831_v1  ;;  %v8915_v0 = vld [vmem:[#allocation2 + $0x84c] ss:$24 sps:$4 sm:$0xff]   ;;  %v8910_v1 = vld [vmem:[#allocation2 + $0x840] ss:$24 sps:$4 sm:$0xff]  }
  0xeb   : > { %2819 = vmatpush1.bf16.msra.mxu0 %v8826_v2  ;;  %v8913_v2 = vld [vmem:[#allocation2 + $0x848] ss:$24 sps:$4 sm:$0xff]  }
  0xec   : > { %2991 = vmatpush1.bf16.msra.mxu1 %v8829_v3  ;;  %2820 = vmatprep.subr.bf16.mxu0 %v8834_v4  ;;  %v8918_v3 = vld [vmem:[#allocation2 + $0x874] ss:$24 sps:$4 sm:$0xff]  }
  0xed   : > { %2992 = vmatprep.subr.bf16.mxu1 %v8837_v6  ;;  %v8921_v4 = vld [vmem:[#allocation2 + $0x87c] ss:$24 sps:$4 sm:$0xff]   ;;  %v8916_v6 = vld [vmem:[#allocation2 + $0x870] ss:$24 sps:$4 sm:$0xff]  }
  0xef   : > { %2821 = vmatpush1.bf16.msra.mxu0 %v8832_v7  ;;  %v8919_v7 = vld [vmem:[#allocation2 + $0x878] ss:$24 sps:$4 sm:$0xff]  }
  0xf0   : > { %2993 = vmatpush1.bf16.msra.mxu1 %v8835_v8  ;;  %2833 = vmatprep.subr.bf16.mxu0 %v8840_v9  ;;  %v8924_v8 = vld [vmem:[#allocation2 + $0x8a4] ss:$24 sps:$4 sm:$0xff]  }
  0xf1   : > { %3005 = vmatprep.subr.bf16.mxu1 %v8843_v10  ;;  %v8927_v9 = vld [vmem:[#allocation2 + $0x8ac] ss:$24 sps:$4 sm:$0xff]   ;;  %v8922_v10 = vld [vmem:[#allocation2 + $0x8a0] ss:$24 sps:$4 sm:$0xff]  }
  0xf2   : > { %2823 = vmatmul.mubr.bf16.vlgmr.msra.gmra.mrb[0].mxu0 %v10258_v11 }
  0xf3   : > { %2995 = vmatmul.mubr.bf16.vlgmr.msra.gmra.mrb[0].mxu1 %v10258_v11  ;;  %2834 = vmatpush1.bf16.msra.mxu0 %v8838_v12  ;;  %v8925_v12 = vld [vmem:[#allocation2 + $0x8a8] ss:$24 sps:$4 sm:$0xff]  }
  0xf4   : > { %3006 = vmatpush1.bf16.msra.mxu1 %v8841_v13  ;;  %2835 = vmatprep.subr.bf16.mxu0 %v8846_v14  ;;  %v8930_v13 = vld [vmem:[#allocation2 + $0x8d4] ss:$24 sps:$4 sm:$0xff]  }
  0xf5   : > { %3007 = vmatprep.subr.bf16.mxu1 %v8849_v15  ;;  %2865 = vmatprep.mubr.bf16.mxu0 %v10268_v18  ;;  %v8933_v14 = vld [vmem:[#allocation2 + $0x8dc] ss:$24 sps:$4 sm:$0xff]   ;;  %v8928_v15 = vld [vmem:[#allocation2 + $0x8d0] ss:$24 sps:$4 sm:$0xff]  }
  0xf6   : > { %3037 = vmatprep.mubr.bf16.mxu1 %v10268_v18 }
  0xf7   : > { %2836 = vmatpush1.bf16.msra.mxu0 %v8844_v19  ;;  %v8931_v19 = vld [vmem:[#allocation2 + $0x8d8] ss:$24 sps:$4 sm:$0xff]  }
  0xf8   : > { %3008 = vmatpush1.bf16.msra.mxu1 %v8847_v20  ;;  %2837 = vmatprep.subr.bf16.mxu0 %v8852_v21  ;;  %v8936_v20 = vld [vmem:[#allocation2 + $0x904] ss:$24 sps:$4 sm:$0xff]  }
  0xf9   : > { %3009 = vmatprep.subr.bf16.mxu1 %v8855_v22  ;;  %v8939_v21 = vld [vmem:[#allocation2 + $0x90c] ss:$24 sps:$4 sm:$0xff]   ;;  %v8934_v22 = vld [vmem:[#allocation2 + $0x900] ss:$24 sps:$4 sm:$0xff]  }
  0xfb   : > { %2838 = vmatpush1.bf16.msra.mxu0 %v8850_v23  ;;  %v8937_v23 = vld [vmem:[#allocation2 + $0x908] ss:$24 sps:$4 sm:$0xff]  }
  0xfc   : > { %3010 = vmatpush1.bf16.msra.mxu1 %v8853_v24  ;;  %2839 = vmatprep.subr.bf16.mxu0 %v8858_v25  ;;  %v10276_v24 = vcombine.low %v10261_v16, %v10264_v17  ;;  %v10279_v25 = vld [vmem:[%s10232_s21 + $0x18] sm:$0xff]  ;;  %v8940_v16 = vld [vmem:[#allocation2 + $0x930] ss:$24 sps:$4 sm:$0xff]  }
  0xfd   : > { %3011 = vmatprep.subr.bf16.mxu1 %v8861_v26  ;;  %v10282_v26 = vld [vmem:[%s10232_s21 + $0x38] sm:$0xff] }
  0xfe   : > { %v8943_v17 = vld [vmem:[#allocation2 + $0x938] ss:$24 sps:$4 sm:$0xff]  }
  0xff   : > { %2840 = vmatpush1.bf16.msra.mxu0 %v8856_v27  ;;  %v8942_v27 = vld [vmem:[#allocation2 + $0x934] ss:$24 sps:$4 sm:$0xff]  }
 0x100   : > { %3012 = vmatpush1.bf16.msra.mxu1 %v8859_v28  ;;  %2841 = vmatprep.subr.bf16.mxu0 %v8864_v29  ;;  %v8945_v28 = vld [vmem:[#allocation2 + $0x93c] ss:$24 sps:$4 sm:$0xff]   ;;  %v10286_v29 = vcombine.high %v10279_v25, %v10282_v26 }
 0x101   : > { %3013 = vmatprep.subr.bf16.mxu1 %v8867_v30  ;;  %v8948_v30 = vld [vmem:[#allocation2 + $0x964] ss:$24 sps:$4 sm:$0xff]  }
 0x103   : > { %2842 = vmatpush1.bf16.msra.mxu0 %v8862_v31  ;;  %v8951_v31 = vld [vmem:[#allocation2 + $0x96c] ss:$24 sps:$4 sm:$0xff]  }
 0x104   : > { %3014 = vmatpush1.bf16.msra.mxu1 %v8865_v32  ;;  %2843 = vmatprep.subr.bf16.mxu0 %v8870_v33  ;;  %v8946_v32 = vld [vmem:[#allocation2 + $0x960] ss:$24 sps:$4 sm:$0xff]  }
 0x105   : > { %3015 = vmatprep.subr.bf16.mxu1 %v8873_v35  ;;  %v8949_v33 = vld [vmem:[#allocation2 + $0x968] ss:$24 sps:$4 sm:$0xff]   ;;  %v8954_v35 = vld [vmem:[#allocation2 + $0x994] ss:$24 sps:$4 sm:$0xff]  }
 0x107   : > { %2844 = vmatpush1.bf16.msra.mxu0 %v8868_v36  ;;  %v8957_v36 = vld [vmem:[#allocation2 + $0x99c] ss:$24 sps:$4 sm:$0xff]  }
 0x108   : > { %3016 = vmatpush1.bf16.msra.mxu1 %v8871_v37  ;;  %2845 = vmatprep.subr.bf16.mxu0 %v8876_v38  ;;  %v8952_v37 = vld [vmem:[#allocation2 + $0x990] ss:$24 sps:$4 sm:$0xff]  }
 0x109   : > { %3017 = vmatprep.subr.bf16.mxu1 %v8879_v39  ;;  %v8955_v38 = vld [vmem:[#allocation2 + $0x998] ss:$24 sps:$4 sm:$0xff]   ;;  %v8960_v39 = vld [vmem:[#allocation2 + $0x9c4] ss:$24 sps:$4 sm:$0xff]  }
 0x10b   : > { %2846 = vmatpush1.bf16.msra.mxu0 %v8874_v40  ;;  %v8963_v40 = vld [vmem:[#allocation2 + $0x9cc] ss:$24 sps:$4 sm:$0xff]  }
 0x10c   : > { %3018 = vmatpush1.bf16.msra.mxu1 %v8877_v41  ;;  %2847 = vmatprep.subr.bf16.mxu0 %v8882_v42  ;;  %v8958_v41 = vld [vmem:[#allocation2 + $0x9c0] ss:$24 sps:$4 sm:$0xff]  }
 0x10d   : > { %3019 = vmatprep.subr.bf16.mxu1 %v8885_v43  ;;  %v8961_v42 = vld [vmem:[#allocation2 + $0x9c8] ss:$24 sps:$4 sm:$0xff]   ;;  %v8966_v43 = vld [vmem:[#allocation2 + $0x9f4] ss:$24 sps:$4 sm:$0xff]  }
 0x10f   : > { %2848 = vmatpush1.bf16.msra.mxu0 %v8880_v44  ;;  %v8969_v44 = vld [vmem:[#allocation2 + $0x9fc] ss:$24 sps:$4 sm:$0xff]  }
 0x110   : > { %3020 = vmatpush1.bf16.msra.mxu1 %v8883_v45  ;;  %2849 = vmatprep.subr.bf16.mxu0 %v8888_v46  ;;  %v8964_v45 = vld [vmem:[#allocation2 + $0x9f0] ss:$24 sps:$4 sm:$0xff]  }
 0x111   : > { %3021 = vmatprep.subr.bf16.mxu1 %v8891_v47  ;;  %v8967_v46 = vld [vmem:[#allocation2 + $0x9f8] ss:$24 sps:$4 sm:$0xff]   ;;  %v8972_v47 = vld [vmem:[#allocation2 + $0xa24] ss:$24 sps:$4 sm:$0xff]  }
 0x113   : > { %2850 = vmatpush1.bf16.msra.mxu0 %v8886_v48  ;;  %v8975_v48 = vld [vmem:[#allocation2 + $0xa2c] ss:$24 sps:$4 sm:$0xff]  }
 0x114   : > { %3022 = vmatpush1.bf16.msra.mxu1 %v8889_v49  ;;  %2851 = vmatprep.subr.bf16.mxu0 %v8894_v51  ;;  %v8970_v49 = vld [vmem:[#allocation2 + $0xa20] ss:$24 sps:$4 sm:$0xff]  }
 0x115   : > { %3023 = vmatprep.subr.bf16.mxu1 %v8897_v52  ;;  %v8973_v51 = vld [vmem:[#allocation2 + $0xa28] ss:$24 sps:$4 sm:$0xff]   ;;  %v8978_v52 = vld [vmem:[#allocation2 + $0xa54] ss:$24 sps:$4 sm:$0xff]  }
 0x117   : > { %2852 = vmatpush1.bf16.msra.mxu0 %v8892_v53  ;;  %v8981_v53 = vld [vmem:[#allocation2 + $0xa5c] ss:$24 sps:$4 sm:$0xff]  }
 0x118   : > { %3024 = vmatpush1.bf16.msra.mxu1 %v8895_v54  ;;  %2853 = vmatprep.subr.bf16.mxu0 %v8900_v55  ;;  %v8976_v54 = vld [vmem:[#allocation2 + $0xa50] ss:$24 sps:$4 sm:$0xff]  }
 0x119   : > { %3025 = vmatprep.subr.bf16.mxu1 %v8903_v56  ;;  %v8979_v55 = vld [vmem:[#allocation2 + $0xa58] ss:$24 sps:$4 sm:$0xff]   ;;  %v8984_v56 = vld [vmem:[#allocation2 + $0xa84] ss:$24 sps:$4 sm:$0xff]  }
 0x11b   : > { %2854 = vmatpush1.bf16.msra.mxu0 %v8898_v57  ;;  %v8987_v57 = vld [vmem:[#allocation2 + $0xa8c] ss:$24 sps:$4 sm:$0xff]  }
 0x11c   : > { %3026 = vmatpush1.bf16.msra.mxu1 %v8901_v58  ;;  %2855 = vmatprep.subr.bf16.mxu0 %v8906_v59  ;;  %v8982_v58 = vld [vmem:[#allocation2 + $0xa80] ss:$24 sps:$4 sm:$0xff]  }
 0x11d   : > { %3027 = vmatprep.subr.bf16.mxu1 %v8909_v60  ;;  %v8985_v59 = vld [vmem:[#allocation2 + $0xa88] ss:$24 sps:$4 sm:$0xff]   ;;  %v8990_v60 = vld [vmem:[#allocation2 + $0xab4] ss:$24 sps:$4 sm:$0xff]  }
 0x11f   : > { %2856 = vmatpush1.bf16.msra.mxu0 %v8904_v61  ;;  %v8993_v61 = vld [vmem:[#allocation2 + $0xabc] ss:$24 sps:$4 sm:$0xff]  }
 0x120   : > { %3028 = vmatpush1.bf16.msra.mxu1 %v8907_v62  ;;  %2857 = vmatprep.subr.bf16.mxu0 %v8912_v63  ;;  %v8988_v62 = vld [vmem:[#allocation2 + $0xab0] ss:$24 sps:$4 sm:$0xff]  }
 0x121   : > { %3029 = vmatprep.subr.bf16.mxu1 %v8915_v0  ;;  %v8991_v63 = vld [vmem:[#allocation2 + $0xab8] ss:$24 sps:$4 sm:$0xff]   ;;  %v8996_v0 = vld [vmem:[#allocation2 + $0xae4] ss:$24 sps:$4 sm:$0xff]  }
 0x123   : > { %2858 = vmatpush1.bf16.msra.mxu0 %v8910_v1  ;;  %v8999_v1 = vld [vmem:[#allocation2 + $0xaec] ss:$24 sps:$4 sm:$0xff]  }
 0x124   : > { %3030 = vmatpush1.bf16.msra.mxu1 %v8913_v2  ;;  %2859 = vmatprep.subr.bf16.mxu0 %v8918_v3  ;;  %v8994_v2 = vld [vmem:[#allocation2 + $0xae0] ss:$24 sps:$4 sm:$0xff]  }
 0x125   : > { %3031 = vmatprep.subr.bf16.mxu1 %v8921_v4  ;;  %v8997_v3 = vld [vmem:[#allocation2 + $0xae8] ss:$24 sps:$4 sm:$0xff]   ;;  %v9002_v4 = vld [vmem:[#allocation2 + $0xb14] ss:$24 sps:$4 sm:$0xff]  }
 0x127   : > { %2860 = vmatpush1.bf16.msra.mxu0 %v8916_v6  ;;  %v9005_v6 = vld [vmem:[#allocation2 + $0xb1c] ss:$24 sps:$4 sm:$0xff]  }
 0x128   : > { %3032 = vmatpush1.bf16.msra.mxu1 %v8919_v7  ;;  %2861 = vmatprep.subr.bf16.mxu0 %v8924_v8  ;;  %v9000_v7 = vld [vmem:[#allocation2 + $0xb10] ss:$24 sps:$4 sm:$0xff]  }
 0x129   : > { %3033 = vmatprep.subr.bf16.mxu1 %v8927_v9  ;;  %v9003_v8 = vld [vmem:[#allocation2 + $0xb18] ss:$24 sps:$4 sm:$0xff]   ;;  %v9008_v9 = vld [vmem:[#allocation2 + $0xb44] ss:$24 sps:$4 sm:$0xff]  }
 0x12b   : > { %2862 = vmatpush1.bf16.msra.mxu0 %v8922_v10  ;;  %v9011_v10 = vld [vmem:[#allocation2 + $0xb4c] ss:$24 sps:$4 sm:$0xff]  }
 0x12c   : > { %3034 = vmatpush1.bf16.msra.mxu1 %v8925_v12  ;;  %2863 = vmatprep.subr.bf16.mxu0 %v8930_v13  ;;  %v9006_v12 = vld [vmem:[#allocation2 + $0xb40] ss:$24 sps:$4 sm:$0xff]  }
 0x12d   : > { %3035 = vmatprep.subr.bf16.mxu1 %v8933_v14  ;;  %v9009_v13 = vld [vmem:[#allocation2 + $0xb48] ss:$24 sps:$4 sm:$0xff]   ;;  %v9014_v14 = vld [vmem:[#allocation2 + $0xb74] ss:$24 sps:$4 sm:$0xff]  }
 0x12f   : > { %2864 = vmatpush1.bf16.msra.mxu0 %v8928_v15  ;;  %v9017_v15 = vld [vmem:[#allocation2 + $0xb7c] ss:$24 sps:$4 sm:$0xff]  }
 0x130   : > { %3036 = vmatpush1.bf16.msra.mxu1 %v8931_v19  ;;  %2876 = vmatprep.subr.bf16.mxu0 %v8936_v20  ;;  %v9012_v19 = vld [vmem:[#allocation2 + $0xb70] ss:$24 sps:$4 sm:$0xff]  }
 0x131   : > { %3048 = vmatprep.subr.bf16.mxu1 %v8939_v21  ;;  %v9015_v20 = vld [vmem:[#allocation2 + $0xb78] ss:$24 sps:$4 sm:$0xff]   ;;  %v9020_v21 = vld [vmem:[#allocation2 + $0xba4] ss:$24 sps:$4 sm:$0xff]  }
 0x132   : > { %2866 = vmatmul.mubr.bf16.vlgmr.msra.gmra.mrb[0].mxu0 %v10276_v24 }
 0x133   : > { %3038 = vmatmul.mubr.bf16.vlgmr.msra.gmra.mrb[0].mxu1 %v10276_v24  ;;  %2877 = vmatpush1.bf16.msra.mxu0 %v8934_v22  ;;  %v9023_v22 = vld [vmem:[#allocation2 + $0xbac] ss:$24 sps:$4 sm:$0xff]  }
 0x134   : > { %3049 = vmatpush1.bf16.msra.mxu1 %v8937_v23  ;;  %2878 = vmatprep.subr.bf16.mxu0 %v8942_v27  ;;  %v9018_v23 = vld [vmem:[#allocation2 + $0xba0] ss:$24 sps:$4 sm:$0xff]  }
 0x135   : > { %3050 = vmatprep.subr.bf16.mxu1 %v8945_v28  ;;  %2908 = vmatprep.mubr.bf16.mxu0 %v10286_v29  ;;  %v9021_v27 = vld [vmem:[#allocation2 + $0xba8] ss:$24 sps:$4 sm:$0xff]   ;;  %v9026_v28 = vld [vmem:[#allocation2 + $0xbd4] ss:$24 sps:$4 sm:$0xff]  }
 0x136   : > { %3080 = vmatprep.mubr.bf16.mxu1 %v10286_v29 }
 0x137   : > { %2879 = vmatpush1.bf16.msra.mxu0 %v8940_v16  ;;  %v9029_v16 = vld [vmem:[#allocation2 + $0xbdc] ss:$24 sps:$4 sm:$0xff]  }
 0x138   : > { %3051 = vmatpush1.bf16.msra.mxu1 %v8943_v17  ;;  %2880 = vmatprep.subr.bf16.mxu0 %v8948_v30  ;;  %v9024_v17 = vld [vmem:[#allocation2 + $0xbd0] ss:$24 sps:$4 sm:$0xff]  }
 0x139   : > { %3052 = vmatprep.subr.bf16.mxu1 %v8951_v31  ;;  %v9027_v30 = vld [vmem:[#allocation2 + $0xbd8] ss:$24 sps:$4 sm:$0xff]   ;;  %v9032_v31 = vld [vmem:[#allocation2 + $0x14] ss:$24 sps:$4 sm:$0xff]  }
 0x13b   : > { %2881 = vmatpush1.bf16.msra.mxu0 %v8946_v32  ;;  %v9035_v32 = vld [vmem:[#allocation4 + $0x4] ss:$24 sps:$4 sm:$0xff]  }
 0x13c   : > { %3053 = vmatpush1.bf16.msra.mxu1 %v8949_v33  ;;  %2882 = vmatprep.subr.bf16.mxu0 %v8954_v35  ;;  %v10300_v33 = vld [vmem:[%s10297_s22] sm:$0xff]  ;;  %v10304_v35 = vcombine.low %v10279_v25, %v10282_v26  ;;  %v9039_v26 = vld [vmem:[#allocation4 + $0x30] ss:$24 sps:$4 sm:$0xff]  }
 0x13d   : > { %3054 = vmatprep.subr.bf16.mxu1 %v8957_v36  ;;  %v10307_v36 = vld [vmem:[%s10297_s22 + $0x20] sm:$0xff] }
 0x13e   : > { %v9036_v25 = vld [vmem:[#allocation2 + $0x40] ss:$24 sps:$4 sm:$0xff]  }
 0x13f   : > { %2883 = vmatpush1.bf16.msra.mxu0 %v8952_v37  ;;  %v9030_v37 = vld [vmem:[#allocation2 + $0x10] ss:$24 sps:$4 sm:$0xff]  }
 0x140   : > { %3055 = vmatpush1.bf16.msra.mxu1 %v8955_v38  ;;  %2884 = vmatprep.subr.bf16.mxu0 %v8960_v39  ;;  %v9033_v38 = vld [vmem:[#allocation4] ss:$24 sps:$4 sm:$0xff]   ;;  %v9038_v39 = vld [vmem:[#allocation2 + $0x44] ss:$24 sps:$4 sm:$0xff]  }
 0x141   : > { %3056 = vmatprep.subr.bf16.mxu1 %v8963_v40  ;;  %v9041_v40 = vld [vmem:[#allocation4 + $0x34] ss:$24 sps:$4 sm:$0xff]  }
 0x143   : > { %2885 = vmatpush1.bf16.msra.mxu0 %v8958_v41  ;;  %v10311_v41 = vcombine.high %v10300_v33, %v10307_v36 }
 0x144   : > { %3057 = vmatpush1.bf16.msra.mxu1 %v8961_v42  ;;  %2886 = vmatprep.subr.bf16.mxu0 %v8966_v43  ;;  %v9044_v42 = vld [vmem:[#allocation2 + $0x74] ss:$24 sps:$4 sm:$0xff]   ;;  %v9047_v43 = vld [vmem:[#allocation4 + $0x64] ss:$24 sps:$4 sm:$0xff]  }
 0x145   : > { %3058 = vmatprep.subr.bf16.mxu1 %v8969_v44  ;;  %v9042_v44 = vld [vmem:[#allocation2 + $0x70] ss:$24 sps:$4 sm:$0xff]  }
 0x147   : > { %2887 = vmatpush1.bf16.msra.mxu0 %v8964_v45  ;;  %v9045_v45 = vld [vmem:[#allocation4 + $0x60] ss:$24 sps:$4 sm:$0xff]  }
 0x148   : > { %3059 = vmatpush1.bf16.msra.mxu1 %v8967_v46  ;;  %2888 = vmatprep.subr.bf16.mxu0 %v8972_v47  ;;  %v9050_v46 = vld [vmem:[#allocation2 + $0xa4] ss:$24 sps:$4 sm:$0xff]   ;;  %v9053_v47 = vld [vmem:[#allocation4 + $0x94] ss:$24 sps:$4 sm:$0xff]  }
 0x149   : > { %3060 = vmatprep.subr.bf16.mxu1 %v8975_v48  ;;  %v9048_v48 = vld [vmem:[#allocation2 + $0xa0] ss:$24 sps:$4 sm:$0xff]  }
 0x14b   : > { %2889 = vmatpush1.bf16.msra.mxu0 %v8970_v49  ;;  %v9051_v49 = vld [vmem:[#allocation4 + $0x90] ss:$24 sps:$4 sm:$0xff]  }
 0x14c   : > { %3061 = vmatpush1.bf16.msra.mxu1 %v8973_v51  ;;  %2890 = vmatprep.subr.bf16.mxu0 %v8978_v52  ;;  %v9056_v51 = vld [vmem:[#allocation2 + $0xd4] ss:$24 sps:$4 sm:$0xff]   ;;  %v9059_v52 = vld [vmem:[#allocation4 + $0xc4] ss:$24 sps:$4 sm:$0xff]  }
 0x14d   : > { %3062 = vmatprep.subr.bf16.mxu1 %v8981_v53  ;;  %v9057_v53 = vld [vmem:[#allocation4 + $0xc0] ss:$24 sps:$4 sm:$0xff]  }
 0x14f   : > { %2891 = vmatpush1.bf16.msra.mxu0 %v8976_v54  ;;  %v9062_v54 = vld [vmem:[#allocation2 + $0x104] ss:$24 sps:$4 sm:$0xff]  }
 0x150   : > { %3063 = vmatpush1.bf16.msra.mxu1 %v8979_v55  ;;  %2892 = vmatprep.subr.bf16.mxu0 %v8984_v56  ;;  %v9065_v55 = vld [vmem:[#allocation4 + $0xf4] ss:$24 sps:$4 sm:$0xff]   ;;  %v9060_v56 = vld [vmem:[#allocation2 + $0x100] ss:$24 sps:$4 sm:$0xff]  }
 0x151   : > { %3064 = vmatprep.subr.bf16.mxu1 %v8987_v57  ;;  %v9063_v57 = vld [vmem:[#allocation4 + $0xf0] ss:$24 sps:$4 sm:$0xff]  }
 0x153   : > { %2893 = vmatpush1.bf16.msra.mxu0 %v8982_v58  ;;  %v9068_v58 = vld [vmem:[#allocation2 + $0x134] ss:$24 sps:$4 sm:$0xff]  }
 0x154   : > { %3065 = vmatpush1.bf16.msra.mxu1 %v8985_v59  ;;  %2894 = vmatprep.subr.bf16.mxu0 %v8990_v60  ;;  %v9071_v59 = vld [vmem:[#allocation4 + $0x124] ss:$24 sps:$4 sm:$0xff]   ;;  %v9066_v60 = vld [vmem:[#allocation2 + $0x130] ss:$24 sps:$4 sm:$0xff]  }
 0x155   : > { %3066 = vmatprep.subr.bf16.mxu1 %v8993_v61  ;;  %v9069_v61 = vld [vmem:[#allocation4 + $0x120] ss:$24 sps:$4 sm:$0xff]  }
 0x157   : > { %2895 = vmatpush1.bf16.msra.mxu0 %v8988_v62  ;;  %v9074_v62 = vld [vmem:[#allocation2 + $0x164] ss:$24 sps:$4 sm:$0xff]  }
 0x158   : > { %3067 = vmatpush1.bf16.msra.mxu1 %v8991_v63  ;;  %2896 = vmatprep.subr.bf16.mxu0 %v8996_v0  ;;  %v9077_v63 = vld [vmem:[#allocation4 + $0x154] ss:$24 sps:$4 sm:$0xff]   ;;  %v9072_v0 = vld [vmem:[#allocation2 + $0x160] ss:$24 sps:$4 sm:$0xff]  }
 0x159   : > { %3068 = vmatprep.subr.bf16.mxu1 %v8999_v1  ;;  %v9075_v1 = vld [vmem:[#allocation4 + $0x150] ss:$24 sps:$4 sm:$0xff]  }
 0x15b   : > { %2897 = vmatpush1.bf16.msra.mxu0 %v8994_v2  ;;  %v9080_v2 = vld [vmem:[#allocation2 + $0x194] ss:$24 sps:$4 sm:$0xff]  }
 0x15c   : > { %3069 = vmatpush1.bf16.msra.mxu1 %v8997_v3  ;;  %2898 = vmatprep.subr.bf16.mxu0 %v9002_v4  ;;  %v9083_v3 = vld [vmem:[#allocation4 + $0x184] ss:$24 sps:$4 sm:$0xff]   ;;  %v9078_v4 = vld [vmem:[#allocation2 + $0x190] ss:$24 sps:$4 sm:$0xff]  }
 0x15d   : > { %3070 = vmatprep.subr.bf16.mxu1 %v9005_v6  ;;  %v9081_v6 = vld [vmem:[#allocation4 + $0x180] ss:$24 sps:$4 sm:$0xff]  }
 0x15f   : > { %2899 = vmatpush1.bf16.msra.mxu0 %v9000_v7  ;;  %v9086_v7 = vld [vmem:[#allocation2 + $0x1c4] ss:$24 sps:$4 sm:$0xff]  }
 0x160   : > { %3071 = vmatpush1.bf16.msra.mxu1 %v9003_v8  ;;  %2900 = vmatprep.subr.bf16.mxu0 %v9008_v9  ;;  %v9089_v8 = vld [vmem:[#allocation4 + $0x1b4] ss:$24 sps:$4 sm:$0xff]   ;;  %v9084_v9 = vld [vmem:[#allocation2 + $0x1c0] ss:$24 sps:$4 sm:$0xff]  }
 0x161   : > { %3072 = vmatprep.subr.bf16.mxu1 %v9011_v10  ;;  %v9087_v10 = vld [vmem:[#allocation4 + $0x1b0] ss:$24 sps:$4 sm:$0xff]  }
 0x163   : > { %2901 = vmatpush1.bf16.msra.mxu0 %v9006_v12  ;;  %v9092_v12 = vld [vmem:[#allocation2 + $0x1f4] ss:$24 sps:$4 sm:$0xff]  }
 0x164   : > { %3073 = vmatpush1.bf16.msra.mxu1 %v9009_v13  ;;  %2902 = vmatprep.subr.bf16.mxu0 %v9014_v14  ;;  %v9095_v13 = vld [vmem:[#allocation4 + $0x1e4] ss:$24 sps:$4 sm:$0xff]   ;;  %v9090_v14 = vld [vmem:[#allocation2 + $0x1f0] ss:$24 sps:$4 sm:$0xff]  }
 0x165   : > { %3074 = vmatprep.subr.bf16.mxu1 %v9017_v15  ;;  %v9093_v15 = vld [vmem:[#allocation4 + $0x1e0] ss:$24 sps:$4 sm:$0xff]  }
 0x167   : > { %2903 = vmatpush1.bf16.msra.mxu0 %v9012_v19  ;;  %v9098_v19 = vld [vmem:[#allocation2 + $0x224] ss:$24 sps:$4 sm:$0xff]  }
 0x168   : > { %3075 = vmatpush1.bf16.msra.mxu1 %v9015_v20  ;;  %2904 = vmatprep.subr.bf16.mxu0 %v9020_v21  ;;  %v9101_v20 = vld [vmem:[#allocation4 + $0x214] ss:$24 sps:$4 sm:$0xff]   ;;  %v9096_v21 = vld [vmem:[#allocation2 + $0x220] ss:$24 sps:$4 sm:$0xff]  }
 0x169   : > { %3076 = vmatprep.subr.bf16.mxu1 %v9023_v22  ;;  %v9099_v22 = vld [vmem:[#allocation4 + $0x210] ss:$24 sps:$4 sm:$0xff]  }
 0x16b   : > { %2905 = vmatpush1.bf16.msra.mxu0 %v9018_v23  ;;  %v9104_v23 = vld [vmem:[#allocation2 + $0x254] ss:$24 sps:$4 sm:$0xff]  }
 0x16c   : > { %3077 = vmatpush1.bf16.msra.mxu1 %v9021_v27  ;;  %2906 = vmatprep.subr.bf16.mxu0 %v9026_v28  ;;  %v9107_v27 = vld [vmem:[#allocation4 + $0x244] ss:$24 sps:$4 sm:$0xff]   ;;  %v9102_v28 = vld [vmem:[#allocation2 + $0x250] ss:$24 sps:$4 sm:$0xff]  }
 0x16d   : > { %3078 = vmatprep.subr.bf16.mxu1 %v9029_v16  ;;  %v9105_v16 = vld [vmem:[#allocation4 + $0x240] ss:$24 sps:$4 sm:$0xff]  }
 0x16f   : > { %2907 = vmatpush1.bf16.msra.mxu0 %v9024_v17  ;;  %v9110_v17 = vld [vmem:[#allocation2 + $0x284] ss:$24 sps:$4 sm:$0xff]  }
 0x170   : > { %3079 = vmatpush1.bf16.msra.mxu1 %v9027_v30  ;;  %3091 = vmatprep.subr.bf16.mxu0 %v9032_v31  ;;  %v9113_v30 = vld [vmem:[#allocation4 + $0x274] ss:$24 sps:$4 sm:$0xff]   ;;  %v9108_v31 = vld [vmem:[#allocation2 + $0x280] ss:$24 sps:$4 sm:$0xff]  }
 0x171   : > { %5615 = vmatprep.subr.bf16.mxu1 %v9035_v32  ;;  %v9111_v32 = vld [vmem:[#allocation4 + $0x270] ss:$24 sps:$4 sm:$0xff]  }
 0x172   : > { %2909 = vmatmul.mubr.bf16.vlgmr.msra.gmra.mrb[0].mxu0 %v10304_v35 }
 0x173   : > { %3081 = vmatmul.mubr.bf16.vlgmr.msra.gmra.mrb[0].mxu1 %v10304_v35  ;;  %3092 = vmatpush1.bf16.msra.mxu0 %v9030_v37  ;;  %v9116_v37 = vld [vmem:[#allocation2 + $0x2b4] ss:$24 sps:$4 sm:$0xff]  }
 0x174   : > { %5616 = vmatpush1.bf16.msra.mxu1 %v9033_v38  ;;  %3093 = vmatprep.subr.bf16.mxu0 %v9038_v39  ;;  %v9119_v38 = vld [vmem:[#allocation4 + $0x2a4] ss:$24 sps:$4 sm:$0xff]   ;;  %v9114_v39 = vld [vmem:[#allocation2 + $0x2b0] ss:$24 sps:$4 sm:$0xff]  }
 0x175   : > { %5617 = vmatprep.subr.bf16.mxu1 %v9041_v40  ;;  %3123 = vmatprep.mubr.bf16.mxu0 %v10236_v50  ;;  %v9054_v50 = vld [vmem:[#allocation2 + $0xd0] ss:$24 sps:$4 sm:$0xff]   ;;  %v9117_v40 = vld [vmem:[#allocation4 + $0x2a0] ss:$24 sps:$4 sm:$0xff]  }
 0x176   : > { %5647 = vmatprep.mubr.bf16.mxu1 %v10311_v41 }
 0x177   : > { %3094 = vmatpush1.bf16.msra.mxu0 %v9036_v25  ;;  %v9122_v25 = vld [vmem:[#allocation2 + $0x2e4] ss:$24 sps:$4 sm:$0xff]  }
 0x178   : > { %5618 = vmatpush1.bf16.msra.mxu1 %v9039_v26  ;;  %3095 = vmatprep.subr.bf16.mxu0 %v9044_v42  ;;  %v9125_v26 = vld [vmem:[#allocation4 + $0x2d4] ss:$24 sps:$4 sm:$0xff]   ;;  %v9120_v42 = vld [vmem:[#allocation2 + $0x2e0] ss:$24 sps:$4 sm:$0xff]  }
 0x179   : > { %5619 = vmatprep.subr.bf16.mxu1 %v9047_v43  ;;  %v9123_v43 = vld [vmem:[#allocation4 + $0x2d0] ss:$24 sps:$4 sm:$0xff]  }
 0x17b   : > { %3096 = vmatpush1.bf16.msra.mxu0 %v9042_v44  ;;  %v9128_v44 = vld [vmem:[#allocation2 + $0x314] ss:$24 sps:$4 sm:$0xff]  }
 0x17c   : > { %5620 = vmatpush1.bf16.msra.mxu1 %v9045_v45  ;;  %3097 = vmatprep.subr.bf16.mxu0 %v9050_v46  ;;  %v9131_v45 = vld [vmem:[#allocation4 + $0x304] ss:$24 sps:$4 sm:$0xff]   ;;  %v10318_v46 = vld [vmem:[%s10297_s22 + $0x8] sm:$0xff] }
 0x17d   : > { %5621 = vmatprep.subr.bf16.mxu1 %v9053_v47  ;;  %v10321_v47 = vld [vmem:[%s10297_s22 + $0x28] sm:$0xff] }
 0x17f   : > { %3098 = vmatpush1.bf16.msra.mxu0 %v9048_v48  ;;  %v10325_v48 = vcombine.low %v10300_v33, %v10307_v36  ;;  %v9132_v33 = vld [vmem:[#allocation2 + $0x340] ss:$24 sps:$4 sm:$0xff]   ;;  %v9135_v36 = vld [vmem:[#allocation4 + $0x330] ss:$24 sps:$4 sm:$0xff]  }
 0x180   : > { %5622 = vmatpush1.bf16.msra.mxu1 %v9051_v49  ;;  %3099 = vmatprep.subr.bf16.mxu0 %v9056_v51  ;;  %v9126_v49 = vld [vmem:[#allocation2 + $0x310] ss:$24 sps:$4 sm:$0xff]   ;;  %v9129_v51 = vld [vmem:[#allocation4 + $0x300] ss:$24 sps:$4 sm:$0xff]  }
 0x181   : > { %5623 = vmatprep.subr.bf16.mxu1 %v9059_v52  ;;  %v9134_v52 = vld [vmem:[#allocation2 + $0x344] ss:$24 sps:$4 sm:$0xff]  }
 0x183   : > { %3100 = vmatpush1.bf16.msra.mxu0 %v9054_v50  ;;  %v9137_v50 = vld [vmem:[#allocation4 + $0x334] ss:$24 sps:$4 sm:$0xff]  }
 0x184   : > { %5624 = vmatpush1.bf16.msra.mxu1 %v9057_v53  ;;  %3101 = vmatprep.subr.bf16.mxu0 %v9062_v54  ;;  %v10329_v53 = vcombine.high %v10318_v46, %v10321_v47  ;;  %v9140_v54 = vld [vmem:[#allocation2 + $0x374] ss:$24 sps:$4 sm:$0xff]  }
 0x185   : > { %5625 = vmatprep.subr.bf16.mxu1 %v9065_v55  ;;  %v9143_v55 = vld [vmem:[#allocation4 + $0x364] ss:$24 sps:$4 sm:$0xff]  }
 0x187   : > { %3102 = vmatpush1.bf16.msra.mxu0 %v9060_v56  ;;  %v9138_v56 = vld [vmem:[#allocation2 + $0x370] ss:$24 sps:$4 sm:$0xff]  }
 0x188   : > { %5626 = vmatpush1.bf16.msra.mxu1 %v9063_v57  ;;  %3103 = vmatprep.subr.bf16.mxu0 %v9068_v58  ;;  %v9141_v57 = vld [vmem:[#allocation4 + $0x360] ss:$24 sps:$4 sm:$0xff]   ;;  %v9149_v58 = vld [vmem:[#allocation4 + $0x394] ss:$24 sps:$4 sm:$0xff]  }
 0x189   : > { %5627 = vmatprep.subr.bf16.mxu1 %v9071_v59  ;;  %v9144_v59 = vld [vmem:[#allocation2 + $0x3a0] ss:$24 sps:$4 sm:$0xff]  }
 0x18b   : > { %3104 = vmatpush1.bf16.msra.mxu0 %v9066_v60  ;;  %v9147_v60 = vld [vmem:[#allocation4 + $0x390] ss:$24 sps:$4 sm:$0xff]  }
 0x18c   : > { %5628 = vmatpush1.bf16.msra.mxu1 %v9069_v61  ;;  %3105 = vmatprep.subr.bf16.mxu0 %v9074_v62  ;;  %v9152_v61 = vld [vmem:[#allocation2 + $0x3d4] ss:$24 sps:$4 sm:$0xff]   ;;  %v9155_v62 = vld [vmem:[#allocation4 + $0x3c4] ss:$24 sps:$4 sm:$0xff]  }
 0x18d   : > { %5629 = vmatprep.subr.bf16.mxu1 %v9077_v63  ;;  %v9153_v63 = vld [vmem:[#allocation4 + $0x3c0] ss:$24 sps:$4 sm:$0xff]  }
 0x18f   : > { %3106 = vmatpush1.bf16.msra.mxu0 %v9072_v0  ;;  %v9158_v0 = vld [vmem:[#allocation2 + $0x404] ss:$24 sps:$4 sm:$0xff]  }
 0x190   : > { %5630 = vmatpush1.bf16.msra.mxu1 %v9075_v1  ;;  %3107 = vmatprep.subr.bf16.mxu0 %v9080_v2  ;;  %v9161_v1 = vld [vmem:[#allocation4 + $0x3f4] ss:$24 sps:$4 sm:$0xff]   ;;  %v9156_v2 = vld [vmem:[#allocation2 + $0x400] ss:$24 sps:$4 sm:$0xff]  }
 0x191   : > { %5631 = vmatprep.subr.bf16.mxu1 %v9083_v3  ;;  %v9159_v3 = vld [vmem:[#allocation4 + $0x3f0] ss:$24 sps:$4 sm:$0xff]  }
 0x193   : > { %3108 = vmatpush1.bf16.msra.mxu0 %v9078_v4  ;;  %v9164_v4 = vld [vmem:[#allocation2 + $0x434] ss:$24 sps:$4 sm:$0xff]  }
 0x194   : > { %5632 = vmatpush1.bf16.msra.mxu1 %v9081_v6  ;;  %3109 = vmatprep.subr.bf16.mxu0 %v9086_v7  ;;  %v9167_v6 = vld [vmem:[#allocation4 + $0x424] ss:$24 sps:$4 sm:$0xff]   ;;  %v9162_v7 = vld [vmem:[#allocation2 + $0x430] ss:$24 sps:$4 sm:$0xff]  }
 0x195   : > { %5633 = vmatprep.subr.bf16.mxu1 %v9089_v8  ;;  %v9165_v8 = vld [vmem:[#allocation4 + $0x420] ss:$24 sps:$4 sm:$0xff]  }
 0x197   : > { %3110 = vmatpush1.bf16.msra.mxu0 %v9084_v9  ;;  %v9170_v9 = vld [vmem:[#allocation2 + $0x464] ss:$24 sps:$4 sm:$0xff]  }
 0x198   : > { %5634 = vmatpush1.bf16.msra.mxu1 %v9087_v10  ;;  %3111 = vmatprep.subr.bf16.mxu0 %v9092_v12  ;;  %v9173_v10 = vld [vmem:[#allocation4 + $0x454] ss:$24 sps:$4 sm:$0xff]   ;;  %v9168_v12 = vld [vmem:[#allocation2 + $0x460] ss:$24 sps:$4 sm:$0xff]  }
 0x199   : > { %5635 = vmatprep.subr.bf16.mxu1 %v9095_v13  ;;  %v9171_v13 = vld [vmem:[#allocation4 + $0x450] ss:$24 sps:$4 sm:$0xff]  }
 0x19b   : > { %3112 = vmatpush1.bf16.msra.mxu0 %v9090_v14  ;;  %v9176_v14 = vld [vmem:[#allocation2 + $0x494] ss:$24 sps:$4 sm:$0xff]  }
 0x19c   : > { %5636 = vmatpush1.bf16.msra.mxu1 %v9093_v15  ;;  %3113 = vmatprep.subr.bf16.mxu0 %v9098_v19  ;;  %v9179_v15 = vld [vmem:[#allocation4 + $0x484] ss:$24 sps:$4 sm:$0xff]   ;;  %v9174_v19 = vld [vmem:[#allocation2 + $0x490] ss:$24 sps:$4 sm:$0xff]  }
 0x19d   : > { %5637 = vmatprep.subr.bf16.mxu1 %v9101_v20  ;;  %v9177_v20 = vld [vmem:[#allocation4 + $0x480] ss:$24 sps:$4 sm:$0xff]  }
 0x19f   : > { %3114 = vmatpush1.bf16.msra.mxu0 %v9096_v21  ;;  %v9182_v21 = vld [vmem:[#allocation2 + $0x4c4] ss:$24 sps:$4 sm:$0xff]  }
 0x1a0   : > { %5638 = vmatpush1.bf16.msra.mxu1 %v9099_v22  ;;  %3115 = vmatprep.subr.bf16.mxu0 %v9104_v23  ;;  %v9185_v22 = vld [vmem:[#allocation4 + $0x4b4] ss:$24 sps:$4 sm:$0xff]   ;;  %v9180_v23 = vld [vmem:[#allocation2 + $0x4c0] ss:$24 sps:$4 sm:$0xff]  }
 0x1a1   : > { %5639 = vmatprep.subr.bf16.mxu1 %v9107_v27  ;;  %v9183_v27 = vld [vmem:[#allocation4 + $0x4b0] ss:$24 sps:$4 sm:$0xff]  }
 0x1a3   : > { %3116 = vmatpush1.bf16.msra.mxu0 %v9102_v28  ;;  %v9188_v28 = vld [vmem:[#allocation2 + $0x4f4] ss:$24 sps:$4 sm:$0xff]  }
 0x1a4   : > { %5640 = vmatpush1.bf16.msra.mxu1 %v9105_v16  ;;  %3117 = vmatprep.subr.bf16.mxu0 %v9110_v17  ;;  %v9191_v16 = vld [vmem:[#allocation4 + $0x4e4] ss:$24 sps:$4 sm:$0xff]   ;;  %v9186_v17 = vld [vmem:[#allocation2 + $0x4f0] ss:$24 sps:$4 sm:$0xff]  }
 0x1a5   : > { %5641 = vmatprep.subr.bf16.mxu1 %v9113_v30  ;;  %v9189_v30 = vld [vmem:[#allocation4 + $0x4e0] ss:$24 sps:$4 sm:$0xff]  }
 0x1a7   : > { %3118 = vmatpush1.bf16.msra.mxu0 %v9108_v31  ;;  %v9194_v31 = vld [vmem:[#allocation2 + $0x524] ss:$24 sps:$4 sm:$0xff]  }
 0x1a8   : > { %5642 = vmatpush1.bf16.msra.mxu1 %v9111_v32  ;;  %3119 = vmatprep.subr.bf16.mxu0 %v9116_v37  ;;  %v9197_v32 = vld [vmem:[#allocation4 + $0x514] ss:$24 sps:$4 sm:$0xff]   ;;  %v9192_v37 = vld [vmem:[#allocation2 + $0x520] ss:$24 sps:$4 sm:$0xff]  }
 0x1a9   : > { %5643 = vmatprep.subr.bf16.mxu1 %v9119_v38  ;;  %v9195_v38 = vld [vmem:[#allocation4 + $0x510] ss:$24 sps:$4 sm:$0xff]  }
 0x1ab   : > { %3120 = vmatpush1.bf16.msra.mxu0 %v9114_v39  ;;  %v9200_v39 = vld [vmem:[#allocation2 + $0x554] ss:$24 sps:$4 sm:$0xff]  }
 0x1ac   : > { %5644 = vmatpush1.bf16.msra.mxu1 %v9117_v40  ;;  %3121 = vmatprep.subr.bf16.mxu0 %v9122_v25  ;;  %v9203_v40 = vld [vmem:[#allocation4 + $0x544] ss:$24 sps:$4 sm:$0xff]   ;;  %v9198_v25 = vld [vmem:[#allocation2 + $0x550] ss:$24 sps:$4 sm:$0xff]  }
 0x1ad   : > { %5645 = vmatprep.subr.bf16.mxu1 %v9125_v26  ;;  %v9201_v26 = vld [vmem:[#allocation4 + $0x540] ss:$24 sps:$4 sm:$0xff]  }
 0x1af   : > { %3122 = vmatpush1.bf16.msra.mxu0 %v9120_v42  ;;  %v9206_v42 = vld [vmem:[#allocation2 + $0x584] ss:$24 sps:$4 sm:$0xff]  }
 0x1b0   : > { %5646 = vmatpush1.bf16.msra.mxu1 %v9123_v43  ;;  %3134 = vmatprep.subr.bf16.mxu0 %v9128_v44  ;;  %v9209_v43 = vld [vmem:[#allocation4 + $0x574] ss:$24 sps:$4 sm:$0xff]   ;;  %v9204_v44 = vld [vmem:[#allocation2 + $0x580] ss:$24 sps:$4 sm:$0xff]  }
 0x1b1   : > { %5658 = vmatprep.subr.bf16.mxu1 %v9131_v45  ;;  %v9207_v45 = vld [vmem:[#allocation4 + $0x570] ss:$24 sps:$4 sm:$0xff]  }
 0x1b2   : > { %3124 = vmatmul.mubr.bf16.vlgmr.msra.gmra.mrb[4].mxu0 %v10240_v5  ;;  %v9146_v5 = vld [vmem:[#allocation2 + $0x3a4] ss:$24 sps:$4 sm:$0xff]  }
 0x1b3   : > { %5648 = vmatmul.mubr.bf16.vlgmr.msra.gmra.mrb[4].mxu1 %v10325_v48  ;;  %3135 = vmatpush1.bf16.msra.mxu0 %v9126_v49  ;;  %v9212_v49 = vld [vmem:[#allocation2 + $0x5b4] ss:$24 sps:$4 sm:$0xff]  }
 0x1b4   : > { %5659 = vmatpush1.bf16.msra.mxu1 %v9129_v51  ;;  %3136 = vmatprep.subr.bf16.mxu0 %v9134_v52  ;;  %v9215_v51 = vld [vmem:[#allocation4 + $0x5a4] ss:$24 sps:$4 sm:$0xff]   ;;  %v9210_v52 = vld [vmem:[#allocation2 + $0x5b0] ss:$24 sps:$4 sm:$0xff]  }
 0x1b5   : > { %5660 = vmatprep.subr.bf16.mxu1 %v9137_v50  ;;  %3166 = vmatprep.mubr.bf16.mxu0 %v10252_v34  ;;  %v9150_v34 = vld [vmem:[#allocation2 + $0x3d0] ss:$24 sps:$4 sm:$0xff]   ;;  %v9213_v50 = vld [vmem:[#allocation4 + $0x5a0] ss:$24 sps:$4 sm:$0xff]  }
 0x1b6   : > { %5690 = vmatprep.mubr.bf16.mxu1 %v10329_v53 }
 0x1b7   : > { %3137 = vmatpush1.bf16.msra.mxu0 %v9132_v33  ;;  %v9218_v33 = vld [vmem:[#allocation2 + $0x5e4] ss:$24 sps:$4 sm:$0xff]  }
 0x1b8   : > { %5661 = vmatpush1.bf16.msra.mxu1 %v9135_v36  ;;  %3138 = vmatprep.subr.bf16.mxu0 %v9140_v54  ;;  %v9221_v36 = vld [vmem:[#allocation4 + $0x5d4] ss:$24 sps:$4 sm:$0xff]   ;;  %v9216_v54 = vld [vmem:[#allocation2 + $0x5e0] ss:$24 sps:$4 sm:$0xff]  }
 0x1b9   : > { %5662 = vmatprep.subr.bf16.mxu1 %v9143_v55  ;;  %v9219_v55 = vld [vmem:[#allocation4 + $0x5d0] ss:$24 sps:$4 sm:$0xff]  }
 0x1bb   : > { %3139 = vmatpush1.bf16.msra.mxu0 %v9138_v56  ;;  %v9224_v56 = vld [vmem:[#allocation2 + $0x614] ss:$24 sps:$4 sm:$0xff]  }
 0x1bc   : > { %5663 = vmatpush1.bf16.msra.mxu1 %v9141_v57  ;;  %3140 = vmatprep.subr.bf16.mxu0 %v9146_v5  ;;  %v9227_v57 = vld [vmem:[#allocation4 + $0x604] ss:$24 sps:$4 sm:$0xff]   ;;  %v9222_v5 = vld [vmem:[#allocation2 + $0x610] ss:$24 sps:$4 sm:$0xff]  }
 0x1bd   : > { %5664 = vmatprep.subr.bf16.mxu1 %v9149_v58  ;;  %v9225_v58 = vld [vmem:[#allocation4 + $0x600] ss:$24 sps:$4 sm:$0xff]  }
 0x1bf   : > { %3141 = vmatpush1.bf16.msra.mxu0 %v9144_v59  ;;  %v10337_v59 = vcombine.low %v10318_v46, %v10321_v47  ;;  %v9228_v46 = vld [vmem:[#allocation2 + $0x640] ss:$24 sps:$4 sm:$0xff]   ;;  %v9231_v47 = vld [vmem:[#allocation4 + $0x630] ss:$24 sps:$4 sm:$0xff]  }
 0x1c0   : > { %5665 = vmatpush1.bf16.msra.mxu1 %v9147_v60  ;;  %3142 = vmatprep.subr.bf16.mxu0 %v9152_v61  ;;  %v10340_v60 = vld [vmem:[%s10297_s22 + $0x10] sm:$0xff] }
 0x1c1   : > { %5666 = vmatprep.subr.bf16.mxu1 %v9155_v62  ;;  %v10343_v61 = vld [vmem:[%s10297_s22 + $0x30] sm:$0xff]  ;;  %v9230_v62 = vld [vmem:[#allocation2 + $0x644] ss:$24 sps:$4 sm:$0xff]  }
 0x1c3   : > { %3143 = vmatpush1.bf16.msra.mxu0 %v9150_v34  ;;  %v9233_v34 = vld [vmem:[#allocation4 + $0x634] ss:$24 sps:$4 sm:$0xff]  }
 0x1c4   : > { %5667 = vmatpush1.bf16.msra.mxu1 %v9153_v63  ;;  %3144 = vmatprep.subr.bf16.mxu0 %v9158_v0  ;;  %v10347_v63 = vcombine.high %v10340_v60, %v10343_v61  ;;  %v9236_v0 = vld [vmem:[#allocation2 + $0x674] ss:$24 sps:$4 sm:$0xff]  }
 0x1c5   : > { %5668 = vmatprep.subr.bf16.mxu1 %v9161_v1  ;;  %v9239_v1 = vld [vmem:[#allocation4 + $0x664] ss:$24 sps:$4 sm:$0xff]  }
 0x1c7   : > { %3145 = vmatpush1.bf16.msra.mxu0 %v9156_v2  ;;  %v9234_v2 = vld [vmem:[#allocation2 + $0x670] ss:$24 sps:$4 sm:$0xff]  }
 0x1c8   : > { %5669 = vmatpush1.bf16.msra.mxu1 %v9159_v3  ;;  %3146 = vmatprep.subr.bf16.mxu0 %v9164_v4  ;;  %v9237_v3 = vld [vmem:[#allocation4 + $0x660] ss:$24 sps:$4 sm:$0xff]   ;;  %v9245_v4 = vld [vmem:[#allocation4 + $0x694] ss:$24 sps:$4 sm:$0xff]  }
 0x1c9   : > { %5670 = vmatprep.subr.bf16.mxu1 %v9167_v6  ;;  %v9240_v6 = vld [vmem:[#allocation2 + $0x6a0] ss:$24 sps:$4 sm:$0xff]  }
 0x1cb   : > { %3147 = vmatpush1.bf16.msra.mxu0 %v9162_v7  ;;  %v9243_v7 = vld [vmem:[#allocation4 + $0x690] ss:$24 sps:$4 sm:$0xff]  }
 0x1cc   : > { %5671 = vmatpush1.bf16.msra.mxu1 %v9165_v8  ;;  %3148 = vmatprep.subr.bf16.mxu0 %v9170_v9  ;;  %v9248_v8 = vld [vmem:[#allocation2 + $0x6d4] ss:$24 sps:$4 sm:$0xff]   ;;  %v9251_v9 = vld [vmem:[#allocation4 + $0x6c4] ss:$24 sps:$4 sm:$0xff]  }
 0x1cd   : > { %5672 = vmatprep.subr.bf16.mxu1 %v9173_v10  ;;  %v9249_v10 = vld [vmem:[#allocation4 + $0x6c0] ss:$24 sps:$4 sm:$0xff]  }
 0x1cf   : > { %3149 = vmatpush1.bf16.msra.mxu0 %v9168_v12  ;;  %v9254_v12 = vld [vmem:[#allocation2 + $0x704] ss:$24 sps:$4 sm:$0xff]  }
 0x1d0   : > { %5673 = vmatpush1.bf16.msra.mxu1 %v9171_v13  ;;  %3150 = vmatprep.subr.bf16.mxu0 %v9176_v14  ;;  %v9257_v13 = vld [vmem:[#allocation4 + $0x6f4] ss:$24 sps:$4 sm:$0xff]   ;;  %v9252_v14 = vld [vmem:[#allocation2 + $0x700] ss:$24 sps:$4 sm:$0xff]  }
 0x1d1   : > { %5674 = vmatprep.subr.bf16.mxu1 %v9179_v15  ;;  %v9255_v15 = vld [vmem:[#allocation4 + $0x6f0] ss:$24 sps:$4 sm:$0xff]  }
 0x1d3   : > { %3151 = vmatpush1.bf16.msra.mxu0 %v9174_v19  ;;  %v9260_v19 = vld [vmem:[#allocation2 + $0x734] ss:$24 sps:$4 sm:$0xff]  }
 0x1d4   : > { %5675 = vmatpush1.bf16.msra.mxu1 %v9177_v20  ;;  %3152 = vmatprep.subr.bf16.mxu0 %v9182_v21  ;;  %v9263_v20 = vld [vmem:[#allocation4 + $0x724] ss:$24 sps:$4 sm:$0xff]   ;;  %v9258_v21 = vld [vmem:[#allocation2 + $0x730] ss:$24 sps:$4 sm:$0xff]  }
 0x1d5   : > { %5676 = vmatprep.subr.bf16.mxu1 %v9185_v22  ;;  %v9261_v22 = vld [vmem:[#allocation4 + $0x720] ss:$24 sps:$4 sm:$0xff]  }
 0x1d7   : > { %3153 = vmatpush1.bf16.msra.mxu0 %v9180_v23  ;;  %v9266_v23 = vld [vmem:[#allocation2 + $0x764] ss:$24 sps:$4 sm:$0xff]  }
 0x1d8   : > { %5677 = vmatpush1.bf16.msra.mxu1 %v9183_v27  ;;  %3154 = vmatprep.subr.bf16.mxu0 %v9188_v28  ;;  %v9269_v27 = vld [vmem:[#allocation4 + $0x754] ss:$24 sps:$4 sm:$0xff]   ;;  %v9264_v28 = vld [vmem:[#allocation2 + $0x760] ss:$24 sps:$4 sm:$0xff]  }
 0x1d9   : > { %5678 = vmatprep.subr.bf16.mxu1 %v9191_v16  ;;  %v9267_v16 = vld [vmem:[#allocation4 + $0x750] ss:$24 sps:$4 sm:$0xff]  }
 0x1db   : > { %3155 = vmatpush1.bf16.msra.mxu0 %v9186_v17  ;;  %v9272_v17 = vld [vmem:[#allocation2 + $0x794] ss:$24 sps:$4 sm:$0xff]  }
 0x1dc   : > { %5679 = vmatpush1.bf16.msra.mxu1 %v9189_v30  ;;  %3156 = vmatprep.subr.bf16.mxu0 %v9194_v31  ;;  %v9275_v30 = vld [vmem:[#allocation4 + $0x784] ss:$24 sps:$4 sm:$0xff]   ;;  %v9270_v31 = vld [vmem:[#allocation2 + $0x790] ss:$24 sps:$4 sm:$0xff]  }
 0x1dd   : > { %5680 = vmatprep.subr.bf16.mxu1 %v9197_v32  ;;  %v9273_v32 = vld [vmem:[#allocation4 + $0x780] ss:$24 sps:$4 sm:$0xff]  }
 0x1df   : > { %3157 = vmatpush1.bf16.msra.mxu0 %v9192_v37  ;;  %v9278_v37 = vld [vmem:[#allocation2 + $0x7c4] ss:$24 sps:$4 sm:$0xff]  }
 0x1e0   : > { %5681 = vmatpush1.bf16.msra.mxu1 %v9195_v38  ;;  %3158 = vmatprep.subr.bf16.mxu0 %v9200_v39  ;;  %v9281_v38 = vld [vmem:[#allocation4 + $0x7b4] ss:$24 sps:$4 sm:$0xff]   ;;  %v9276_v39 = vld [vmem:[#allocation2 + $0x7c0] ss:$24 sps:$4 sm:$0xff]  }
 0x1e1   : > { %5682 = vmatprep.subr.bf16.mxu1 %v9203_v40  ;;  %v9279_v40 = vld [vmem:[#allocation4 + $0x7b0] ss:$24 sps:$4 sm:$0xff]  }
 0x1e3   : > { %3159 = vmatpush1.bf16.msra.mxu0 %v9198_v25  ;;  %v9284_v25 = vld [vmem:[#allocation2 + $0x7f4] ss:$24 sps:$4 sm:$0xff]  }
 0x1e4   : > { %5683 = vmatpush1.bf16.msra.mxu1 %v9201_v26  ;;  %3160 = vmatprep.subr.bf16.mxu0 %v9206_v42  ;;  %v9287_v26 = vld [vmem:[#allocation4 + $0x7e4] ss:$24 sps:$4 sm:$0xff]   ;;  %v9282_v42 = vld [vmem:[#allocation2 + $0x7f0] ss:$24 sps:$4 sm:$0xff]  }
 0x1e5   : > { %5684 = vmatprep.subr.bf16.mxu1 %v9209_v43  ;;  %v9285_v43 = vld [vmem:[#allocation4 + $0x7e0] ss:$24 sps:$4 sm:$0xff]  }
 0x1e7   : > { %3161 = vmatpush1.bf16.msra.mxu0 %v9204_v44  ;;  %v9290_v44 = vld [vmem:[#allocation2 + $0x824] ss:$24 sps:$4 sm:$0xff]  }
 0x1e8   : > { %5685 = vmatpush1.bf16.msra.mxu1 %v9207_v45  ;;  %3162 = vmatprep.subr.bf16.mxu0 %v9212_v49  ;;  %v9293_v45 = vld [vmem:[#allocation4 + $0x814] ss:$24 sps:$4 sm:$0xff]   ;;  %v9288_v49 = vld [vmem:[#allocation2 + $0x820] ss:$24 sps:$4 sm:$0xff]  }
 0x1e9   : > { %5686 = vmatprep.subr.bf16.mxu1 %v9215_v51  ;;  %v9291_v51 = vld [vmem:[#allocation4 + $0x810] ss:$24 sps:$4 sm:$0xff]  }
 0x1eb   : > { %3163 = vmatpush1.bf16.msra.mxu0 %v9210_v52  ;;  %v9296_v52 = vld [vmem:[#allocation2 + $0x854] ss:$24 sps:$4 sm:$0xff]  }
 0x1ec   : > { %5687 = vmatpush1.bf16.msra.mxu1 %v9213_v50  ;;  %3164 = vmatprep.subr.bf16.mxu0 %v9218_v33  ;;  %v9299_v50 = vld [vmem:[#allocation4 + $0x844] ss:$24 sps:$4 sm:$0xff]   ;;  %v9294_v33 = vld [vmem:[#allocation2 + $0x850] ss:$24 sps:$4 sm:$0xff]  }
 0x1ed   : > { %5688 = vmatprep.subr.bf16.mxu1 %v9221_v36  ;;  %v9297_v36 = vld [vmem:[#allocation4 + $0x840] ss:$24 sps:$4 sm:$0xff]  }
 0x1ef   : > { %3165 = vmatpush1.bf16.msra.mxu0 %v9216_v54  ;;  %v9302_v54 = vld [vmem:[#allocation2 + $0x884] ss:$24 sps:$4 sm:$0xff]  }
 0x1f0   : > { %5689 = vmatpush1.bf16.msra.mxu1 %v9219_v55  ;;  %3177 = vmatprep.subr.bf16.mxu0 %v9224_v56  ;;  %v9305_v55 = vld [vmem:[#allocation4 + $0x874] ss:$24 sps:$4 sm:$0xff]   ;;  %v9300_v56 = vld [vmem:[#allocation2 + $0x880] ss:$24 sps:$4 sm:$0xff]  }
 0x1f1   : > { %5701 = vmatprep.subr.bf16.mxu1 %v9227_v57  ;;  %v9303_v57 = vld [vmem:[#allocation4 + $0x870] ss:$24 sps:$4 sm:$0xff]  }
 0x1f2   : > { %3167 = vmatmul.mubr.bf16.vlgmr.msra.gmra.mrb[4].mxu0 %v10258_v11  ;;  %v9242_v11 = vld [vmem:[#allocation2 + $0x6a4] ss:$24 sps:$4 sm:$0xff]  }
 0x1f3   : > { %5691 = vmatmul.mubr.bf16.vlgmr.msra.gmra.mrb[4].mxu1 %v10337_v59  ;;  %3178 = vmatpush1.bf16.msra.mxu0 %v9222_v5  ;;  %v9308_v5 = vld [vmem:[#allocation2 + $0x8b4] ss:$24 sps:$4 sm:$0xff]  }
 0x1f4   : > { %5702 = vmatpush1.bf16.msra.mxu1 %v9225_v58  ;;  %3179 = vmatprep.subr.bf16.mxu0 %v9230_v62  ;;  %v9311_v58 = vld [vmem:[#allocation4 + $0x8a4] ss:$24 sps:$4 sm:$0xff]   ;;  %v9306_v62 = vld [vmem:[#allocation2 + $0x8b0] ss:$24 sps:$4 sm:$0xff]  }
 0x1f5   : > { %5703 = vmatprep.subr.bf16.mxu1 %v9233_v34  ;;  %3209 = vmatprep.mubr.bf16.mxu0 %v10268_v18  ;;  %v9246_v18 = vld [vmem:[#allocation2 + $0x6d0] ss:$24 sps:$4 sm:$0xff]   ;;  %v9309_v34 = vld [vmem:[#allocation4 + $0x8a0] ss:$24 sps:$4 sm:$0xff]  }
 0x1f6   : > { %5733 = vmatprep.mubr.bf16.mxu1 %v10347_v63 }
 0x1f7   : > { %3180 = vmatpush1.bf16.msra.mxu0 %v9228_v46  ;;  %v9314_v46 = vld [vmem:[#allocation2 + $0x8e4] ss:$24 sps:$4 sm:$0xff]  }
 0x1f8   : > { %5704 = vmatpush1.bf16.msra.mxu1 %v9231_v47  ;;  %3181 = vmatprep.subr.bf16.mxu0 %v9236_v0  ;;  %v9317_v47 = vld [vmem:[#allocation4 + $0x8d4] ss:$24 sps:$4 sm:$0xff]   ;;  %v9312_v0 = vld [vmem:[#allocation2 + $0x8e0] ss:$24 sps:$4 sm:$0xff]  }
 0x1f9   : > { %5705 = vmatprep.subr.bf16.mxu1 %v9239_v1  ;;  %v9315_v1 = vld [vmem:[#allocation4 + $0x8d0] ss:$24 sps:$4 sm:$0xff]  }
 0x1fb   : > { %3182 = vmatpush1.bf16.msra.mxu0 %v9234_v2  ;;  %v9320_v2 = vld [vmem:[#allocation2 + $0x914] ss:$24 sps:$4 sm:$0xff]  }
 0x1fc   : > { %5706 = vmatpush1.bf16.msra.mxu1 %v9237_v3  ;;  %3183 = vmatprep.subr.bf16.mxu0 %v9242_v11  ;;  %v9323_v3 = vld [vmem:[#allocation4 + $0x904] ss:$24 sps:$4 sm:$0xff]  }
 0x1fd   : > { %5707 = vmatprep.subr.bf16.mxu1 %v9245_v4  ;;  %v10354_v11 = vld [vmem:[%s10297_s22 + $0x18] sm:$0xff] }
 0x1fe   : > { %v10357_v4 = vld [vmem:[%s10297_s22 + $0x38] sm:$0xff] }
 0x1ff   : > { %3184 = vmatpush1.bf16.msra.mxu0 %v9240_v6  ;;  %v10361_v6 = vcombine.low %v10340_v60, %v10343_v61  ;;  %v9324_v60 = vld [vmem:[#allocation2 + $0x940] ss:$24 sps:$4 sm:$0xff]   ;;  %v9327_v61 = vld [vmem:[#allocation4 + $0x930] ss:$24 sps:$4 sm:$0xff]  }
 0x200   : > { %5708 = vmatpush1.bf16.msra.mxu1 %v9243_v7  ;;  %3185 = vmatprep.subr.bf16.mxu0 %v9248_v8  ;;  %v9318_v7 = vld [vmem:[#allocation2 + $0x910] ss:$24 sps:$4 sm:$0xff]   ;;  %v9321_v8 = vld [vmem:[#allocation4 + $0x900] ss:$24 sps:$4 sm:$0xff]  }
 0x201   : > { %5709 = vmatprep.subr.bf16.mxu1 %v9251_v9  ;;  %v9326_v9 = vld [vmem:[#allocation2 + $0x944] ss:$24 sps:$4 sm:$0xff]  }
 0x203   : > { %3186 = vmatpush1.bf16.msra.mxu0 %v9246_v18  ;;  %v9329_v18 = vld [vmem:[#allocation4 + $0x934] ss:$24 sps:$4 sm:$0xff]  }
 0x204   : > { %5710 = vmatpush1.bf16.msra.mxu1 %v9249_v10  ;;  %3187 = vmatprep.subr.bf16.mxu0 %v9254_v12  ;;  %v10365_v10 = vcombine.high %v10354_v11, %v10357_v4  ;;  %v9332_v12 = vld [vmem:[#allocation2 + $0x974] ss:$24 sps:$4 sm:$0xff]  }
 0x205   : > { %5711 = vmatprep.subr.bf16.mxu1 %v9257_v13  ;;  %v9335_v13 = vld [vmem:[#allocation4 + $0x964] ss:$24 sps:$4 sm:$0xff]  }
 0x207   : > { %3188 = vmatpush1.bf16.msra.mxu0 %v9252_v14  ;;  %v9330_v14 = vld [vmem:[#allocation2 + $0x970] ss:$24 sps:$4 sm:$0xff]  }
 0x208   : > { %5712 = vmatpush1.bf16.msra.mxu1 %v9255_v15  ;;  %3189 = vmatprep.subr.bf16.mxu0 %v9260_v19  ;;  %v9333_v15 = vld [vmem:[#allocation4 + $0x960] ss:$24 sps:$4 sm:$0xff]   ;;  %v9341_v19 = vld [vmem:[#allocation4 + $0x994] ss:$24 sps:$4 sm:$0xff]  }
 0x209   : > { %5713 = vmatprep.subr.bf16.mxu1 %v9263_v20  ;;  %v9336_v20 = vld [vmem:[#allocation2 + $0x9a0] ss:$24 sps:$4 sm:$0xff]  }
 0x20b   : > { %3190 = vmatpush1.bf16.msra.mxu0 %v9258_v21  ;;  %v9339_v21 = vld [vmem:[#allocation4 + $0x990] ss:$24 sps:$4 sm:$0xff]  }
 0x20c   : > { %5714 = vmatpush1.bf16.msra.mxu1 %v9261_v22  ;;  %3191 = vmatprep.subr.bf16.mxu0 %v9266_v23  ;;  %v9344_v22 = vld [vmem:[#allocation2 + $0x9d4] ss:$24 sps:$4 sm:$0xff]   ;;  %v9347_v23 = vld [vmem:[#allocation4 + $0x9c4] ss:$24 sps:$4 sm:$0xff]  }
 0x20d   : > { %5715 = vmatprep.subr.bf16.mxu1 %v9269_v27  ;;  %v9345_v27 = vld [vmem:[#allocation4 + $0x9c0] ss:$24 sps:$4 sm:$0xff]  }
 0x20f   : > { %3192 = vmatpush1.bf16.msra.mxu0 %v9264_v28  ;;  %v9350_v28 = vld [vmem:[#allocation2 + $0xa04] ss:$24 sps:$4 sm:$0xff]  }
 0x210   : > { %5716 = vmatpush1.bf16.msra.mxu1 %v9267_v16  ;;  %3193 = vmatprep.subr.bf16.mxu0 %v9272_v17  ;;  %v9353_v16 = vld [vmem:[#allocation4 + $0x9f4] ss:$24 sps:$4 sm:$0xff]   ;;  %v9348_v17 = vld [vmem:[#allocation2 + $0xa00] ss:$24 sps:$4 sm:$0xff]  }
 0x211   : > { %5717 = vmatprep.subr.bf16.mxu1 %v9275_v30  ;;  %v9351_v30 = vld [vmem:[#allocation4 + $0x9f0] ss:$24 sps:$4 sm:$0xff]  }
 0x213   : > { %3194 = vmatpush1.bf16.msra.mxu0 %v9270_v31  ;;  %v9356_v31 = vld [vmem:[#allocation2 + $0xa34] ss:$24 sps:$4 sm:$0xff]  }
 0x214   : > { %5718 = vmatpush1.bf16.msra.mxu1 %v9273_v32  ;;  %3195 = vmatprep.subr.bf16.mxu0 %v9278_v37  ;;  %v9359_v32 = vld [vmem:[#allocation4 + $0xa24] ss:$24 sps:$4 sm:$0xff]  }
 0x215   : > { %5719 = vmatprep.subr.bf16.mxu1 %v9281_v38 }
 0x217   : > { %3196 = vmatpush1.bf16.msra.mxu0 %v9276_v39 }
 0x218   : > { %5720 = vmatpush1.bf16.msra.mxu1 %v9279_v40  ;;  %3197 = vmatprep.subr.bf16.mxu0 %v9284_v25 }
 0x219   : > { %5721 = vmatprep.subr.bf16.mxu1 %v9287_v26 }
 0x21b   : > { %3198 = vmatpush1.bf16.msra.mxu0 %v9282_v42 }
 0x21c   : > { %5722 = vmatpush1.bf16.msra.mxu1 %v9285_v43  ;;  %3199 = vmatprep.subr.bf16.mxu0 %v9290_v44  ;;  %v9354_v43 = vld [vmem:[#allocation2 + $0xa30] ss:$24 sps:$4 sm:$0xff]   ;;  %v9357_v44 = vld [vmem:[#allocation4 + $0xa20] ss:$24 sps:$4 sm:$0xff]  }
 0x21d   : > { %5723 = vmatprep.subr.bf16.mxu1 %v9293_v45 }
 0x21f   : > { %3200 = vmatpush1.bf16.msra.mxu0 %v9288_v49 }
 0x220   : > { %5724 = vmatpush1.bf16.msra.mxu1 %v9291_v51  ;;  %3201 = vmatprep.subr.bf16.mxu0 %v9296_v52 }
 0x221   : > { %5725 = vmatprep.subr.bf16.mxu1 %v9299_v50 }
 0x223   : > { %3202 = vmatpush1.bf16.msra.mxu0 %v9294_v33  ;;  %v9362_v33 = vld [vmem:[#allocation2 + $0xa64] ss:$24 sps:$4 sm:$0xff]  }
 0x224   : > { %5726 = vmatpush1.bf16.msra.mxu1 %v9297_v36  ;;  %3203 = vmatprep.subr.bf16.mxu0 %v9302_v54  ;;  %v9365_v36 = vld [vmem:[#allocation4 + $0xa54] ss:$24 sps:$4 sm:$0xff]  }
 0x225   : > { %5727 = vmatprep.subr.bf16.mxu1 %v9305_v55 }
 0x227   : > { %3204 = vmatpush1.bf16.msra.mxu0 %v9300_v56 }
 0x228   : > { %5728 = vmatpush1.bf16.msra.mxu1 %v9303_v57  ;;  %3205 = vmatprep.subr.bf16.mxu0 %v9308_v5 }
 0x229   : > { %5729 = vmatprep.subr.bf16.mxu1 %v9311_v58 }
 0x22b   : > { %3206 = vmatpush1.bf16.msra.mxu0 %v9306_v62 }
 0x22c   : > { %5730 = vmatpush1.bf16.msra.mxu1 %v9309_v34  ;;  %3207 = vmatprep.subr.bf16.mxu0 %v9314_v46  ;;  %v9360_v46 = vld [vmem:[#allocation2 + $0xa60] ss:$24 sps:$4 sm:$0xff]  }
 0x22d   : > { %5731 = vmatprep.subr.bf16.mxu1 %v9317_v47  ;;  %v9363_v47 = vld [vmem:[#allocation4 + $0xa50] ss:$24 sps:$4 sm:$0xff]  }
 0x22f   : > { %3208 = vmatpush1.bf16.msra.mxu0 %v9312_v0  ;;  %v9368_v0 = vld [vmem:[#allocation2 + $0xa94] ss:$24 sps:$4 sm:$0xff]  }
 0x230   : > { %5732 = vmatpush1.bf16.msra.mxu1 %v9315_v1  ;;  %3220 = vmatprep.subr.bf16.mxu0 %v9320_v2  ;;  %v9371_v1 = vld [vmem:[#allocation4 + $0xa84] ss:$24 sps:$4 sm:$0xff]   ;;  %v9366_v2 = vld [vmem:[#allocation2 + $0xa90] ss:$24 sps:$4 sm:$0xff]  }
 0x231   : > { %5744 = vmatprep.subr.bf16.mxu1 %v9323_v3  ;;  %v9369_v3 = vld [vmem:[#allocation4 + $0xa80] ss:$24 sps:$4 sm:$0xff]  }
 0x232   : > { %3210 = vmatmul.mubr.bf16.vlgmr.msra.gmra.mrb[4].mxu0 %v10276_v24  ;;  %v9338_v24 = vld [vmem:[#allocation2 + $0x9a4] ss:$24 sps:$4 sm:$0xff]  }
 0x233   : > { %5734 = vmatmul.mubr.bf16.vlgmr.msra.gmra.mrb[4].mxu1 %v10361_v6  ;;  %3221 = vmatpush1.bf16.msra.mxu0 %v9318_v7  ;;  %v9374_v7 = vld [vmem:[#allocation2 + $0xac4] ss:$24 sps:$4 sm:$0xff]  }
 0x234   : > { %5745 = vmatpush1.bf16.msra.mxu1 %v9321_v8  ;;  %3222 = vmatprep.subr.bf16.mxu0 %v9326_v9  ;;  %v9377_v8 = vld [vmem:[#allocation4 + $0xab4] ss:$24 sps:$4 sm:$0xff]   ;;  %v9372_v9 = vld [vmem:[#allocation2 + $0xac0] ss:$24 sps:$4 sm:$0xff]  }
 0x235   : > { %5746 = vmatprep.subr.bf16.mxu1 %v9329_v18  ;;  %3252 = vmatprep.mubr.bf16.mxu0 %v10286_v29  ;;  %v9342_v29 = vld [vmem:[#allocation2 + $0x9d0] ss:$24 sps:$4 sm:$0xff]  }
 0x236   : > { %5776 = vmatprep.mubr.bf16.mxu1 %v10365_v10  ;;  %v9375_v18 = vld [vmem:[#allocation4 + $0xab0] ss:$24 sps:$4 sm:$0xff]  }
 0x237   : > { %3223 = vmatpush1.bf16.msra.mxu0 %v9324_v60  ;;  %v9380_v60 = vld [vmem:[#allocation2 + $0xaf4] ss:$24 sps:$4 sm:$0xff]  }
 0x238   : > { %5747 = vmatpush1.bf16.msra.mxu1 %v9327_v61  ;;  %3224 = vmatprep.subr.bf16.mxu0 %v9332_v12  ;;  %v9383_v61 = vld [vmem:[#allocation4 + $0xae4] ss:$24 sps:$4 sm:$0xff]   ;;  %v9378_v12 = vld [vmem:[#allocation2 + $0xaf0] ss:$24 sps:$4 sm:$0xff]  }
 0x239   : > { %5748 = vmatprep.subr.bf16.mxu1 %v9335_v13  ;;  %v9381_v13 = vld [vmem:[#allocation4 + $0xae0] ss:$24 sps:$4 sm:$0xff]  }
 0x23b   : > { %3225 = vmatpush1.bf16.msra.mxu0 %v9330_v14  ;;  %v9386_v14 = vld [vmem:[#allocation2 + $0xb24] ss:$24 sps:$4 sm:$0xff]  }
 0x23c   : > { %5749 = vmatpush1.bf16.msra.mxu1 %v9333_v15  ;;  %3226 = vmatprep.subr.bf16.mxu0 %v9338_v24  ;;  %v9389_v15 = vld [vmem:[#allocation4 + $0xb14] ss:$24 sps:$4 sm:$0xff]   ;;  %v9384_v24 = vld [vmem:[#allocation2 + $0xb20] ss:$24 sps:$4 sm:$0xff]  }
 0x23d   : > { %5750 = vmatprep.subr.bf16.mxu1 %v9341_v19  ;;  %v9387_v19 = vld [vmem:[#allocation4 + $0xb10] ss:$24 sps:$4 sm:$0xff]  }
 0x23f   : > { %3227 = vmatpush1.bf16.msra.mxu0 %v9336_v20  ;;  %v9392_v20 = vld [vmem:[#allocation2 + $0xb54] ss:$24 sps:$4 sm:$0xff]  }
 0x240   : > { %5751 = vmatpush1.bf16.msra.mxu1 %v9339_v21  ;;  %3228 = vmatprep.subr.bf16.mxu0 %v9344_v22  ;;  %v9395_v21 = vld [vmem:[#allocation4 + $0xb44] ss:$24 sps:$4 sm:$0xff]   ;;  %v9390_v22 = vld [vmem:[#allocation2 + $0xb50] ss:$24 sps:$4 sm:$0xff]  }
 0x241   : > { %5752 = vmatprep.subr.bf16.mxu1 %v9347_v23  ;;  %v9393_v23 = vld [vmem:[#allocation4 + $0xb40] ss:$24 sps:$4 sm:$0xff]  }
 0x243   : > { %3229 = vmatpush1.bf16.msra.mxu0 %v9342_v29  ;;  %v9398_v29 = vld [vmem:[#allocation2 + $0xb84] ss:$24 sps:$4 sm:$0xff]  }
 0x244   : > { %5753 = vmatpush1.bf16.msra.mxu1 %v9345_v27  ;;  %3230 = vmatprep.subr.bf16.mxu0 %v9350_v28  ;;  %v9401_v27 = vld [vmem:[#allocation4 + $0xb74] ss:$24 sps:$4 sm:$0xff]   ;;  %v9396_v28 = vld [vmem:[#allocation2 + $0xb80] ss:$24 sps:$4 sm:$0xff]  }
 0x245   : > { %5754 = vmatprep.subr.bf16.mxu1 %v9353_v16  ;;  %v2910_v37 = vpop.f32.mrb[0].mxu0  ;;  %v9399_v16 = vld [vmem:[#allocation4 + $0xb70] ss:$24 sps:$4 sm:$0xff]  }
 0x246   : > { %v3082_v38 = vpop.f32.mrb[0].mxu1  ;;  %v2912_v39 = vpop.f32.mrb[1].mxu0  ;;  %v10371_v25 = vmul.f32 %v2910_v37, %v2910_v37  ;;  %v9410_v37 = vld [vmem:[#allocation2 + $0xbe4] ss:$24 sps:$4 sm:$0xff]  }
 0x247   : > { %v3084_v40 = vpop.f32.mrb[1].mxu1  ;;  %v2914_v26 = vpop.f32.mrb[2].mxu0  ;;  %3231 = vmatpush1.bf16.msra.mxu0 %v9348_v17  ;;  %v10373_v45 = vmul.f32 %v3082_v38, %v3082_v38  ;;  %v10379_v54 = vmul.f32 %v2912_v39, %v2912_v39  ;;  %v9404_v17 = vld [vmem:[#allocation2 + $0xbb4] ss:$24 sps:$4 sm:$0xff]   ;;  %v9408_v39 = vld [vmem:[#allocation2 + $0xbe0] ss:$24 sps:$4 sm:$0xff]  }
 0x248   : > { %v3086_v42 = vpop.f32.mrb[2].mxu1  ;;  %5755 = vmatpush1.bf16.msra.mxu1 %v9351_v30  ;;  %v10375_v49 = vmul.f32 %v2914_v26, %v2914_v26  ;;  %v2916_v52 = vpop.f32.mrb[3].mxu0  ;;  %3232 = vmatprep.subr.bf16.mxu0 %v9356_v31  ;;  %v10381_v55 = vmul.f32 %v3084_v40, %v3084_v40  ;;  %v9407_v30 = vld [vmem:[#allocation4 + $0xba4] ss:$24 sps:$4 sm:$0xff]   ;;  %v9402_v31 = vld [vmem:[#allocation2 + $0xbb0] ss:$24 sps:$4 sm:$0xff]  }
 0x249   : > { %v10377_v51 = vmul.f32 %v3086_v42, %v3086_v42  ;;  %v3088_v50 = vpop.f32.mrb[3].mxu1  ;;  %5756 = vmatprep.subr.bf16.mxu1 %v9359_v32  ;;  %v10383_v56 = vmul.f32 %v2916_v52, %v2916_v52  ;;  %v9405_v32 = vld [vmem:[#allocation4 + $0xba0] ss:$24 sps:$4 sm:$0xff]   ;;  %v9413_v38 = vld [vmem:[#allocation4 + $0xbd4] ss:$24 sps:$4 sm:$0xff]  }
 0x24a   : > { %v10385_v57 = vmul.f32 %v3088_v50, %v3088_v50  ;;  %v6143_v5 = vpack.c.bf16 %v10375_v49, %v10371_v25  ;;  %v9411_v40 = vld [vmem:[#allocation4 + $0xbd0] ss:$24 sps:$4 sm:$0xff]   ;;  %v9416_v26 = vld [vmem:[#allocation4 + $0xc] ss:$24 sps:$4 sm:$0xff]   ;;  %v9422_v50 = vld [vmem:[#allocation4 + $0x3c] ss:$24 sps:$4 sm:$0xff]  }
 0x24b   : > { %v6145_v58 = vpack.c.bf16 %v10377_v51, %v10373_v45  ;;  %v6144_v62 = vpack.c.bf16 %v10383_v56, %v10379_v54  ;;  %3233 = vmatpush1.bf16.msra.mxu0 %v9354_v43  ;;  %v9419_v42 = vld [vmem:[#allocation4 + $0x14] ss:$24 sps:$4 sm:$0xff]   ;;  %v10397_v43 = vcombine.low %v10354_v11, %v10357_v4  ;;  %v9417_v52 = vld [vmem:[#allocation4 + $0x10] ss:$24 sps:$4 sm:$0xff]   ;;  %v9858_v56 = vld [vmem:[%s10770_s4 + $0x58] sm:$0xff]  }
 0x24c   : > { %v6146_v34 = vpack.c.bf16 %v10385_v57, %v10381_v55  ;;  %5757 = vmatpush1.bf16.msra.mxu1 %v9357_v44  ;;  %3234 = vmatprep.subr.bf16.mxu0 %v9362_v33  ;;  %v9414_v44 = vld [vmem:[#allocation4 + $0x8] ss:$24 sps:$4 sm:$0xff]   ;;  %v9425_v33 = vld [vmem:[#allocation4 + $0x44] ss:$24 sps:$4 sm:$0xff]   ;;  %v9431_v4 = vld [vmem:[#allocation4 + $0x74] ss:$24 sps:$4 sm:$0xff]  }
 0x24d   : > { %5758 = vmatprep.subr.bf16.mxu1 %v9365_v36  ;;  %v9420_v36 = vld [vmem:[#allocation4 + $0x38] ss:$24 sps:$4 sm:$0xff]   ;;  %v9428_v11 = vld [vmem:[#allocation4 + $0x6c] ss:$24 sps:$4 sm:$0xff]  }
 0x24e   : > { %v9856_v54 = vld [vmem:[%s10770_s4 + $0x10] sm:$0xff]   ;;  %v9859_v57 = vld [vmem:[%s10770_s4 + $0xd8] sm:$0xff]   ;;  %v9886_v51 = vld [vmem:[%s10770_s4 + $0x160] sm:$0xff]  }
 0x24f   : > { %3235 = vmatpush1.bf16.msra.mxu0 %v9360_v46  ;;  %v9423_v46 = vld [vmem:[#allocation4 + $0x40] ss:$24 sps:$4 sm:$0xff]   ;;  %v9857_v55 = vld [vmem:[%s10770_s4 + $0x90] sm:$0xff]  }
 0x250   : > { %5759 = vmatpush1.bf16.msra.mxu1 %v9363_v47  ;;  %3236 = vmatprep.subr.bf16.mxu0 %v9368_v0  ;;  %v9426_v47 = vld [vmem:[#allocation4 + $0x68] ss:$24 sps:$4 sm:$0xff]   ;;  %v9883_v25 = vld [vmem:[%s10770_s4 + $0x110] sm:$0xff]   ;;  %v9884_v45 = vld [vmem:[%s10770_s4 + $0x158] sm:$0xff]  }
 0x251   : > { %5760 = vmatprep.subr.bf16.mxu1 %v9371_v1  ;;  %v9429_v0 = vld [vmem:[#allocation4 + $0x70] ss:$24 sps:$4 sm:$0xff]   ;;  %v9437_v1 = vld [vmem:[#allocation4 + $0xa4] ss:$24 sps:$4 sm:$0xff]  }
 0x252   : > { %v9885_v49 = vld [vmem:[%s10770_s4 + $0x118] sm:$0xff]  }
 0x253   : > { %3237 = vmatpush1.bf16.msra.mxu0 %v9366_v2  ;;  %v9432_v2 = vld [vmem:[#allocation4 + $0x98] ss:$24 sps:$4 sm:$0xff]  }
 0x254   : > { %5761 = vmatpush1.bf16.msra.mxu1 %v9369_v3  ;;  %3238 = vmatprep.subr.bf16.mxu0 %v9374_v7  ;;  %v9435_v3 = vld [vmem:[#allocation4 + $0xa0] ss:$24 sps:$4 sm:$0xff]   ;;  %v9440_v7 = vld [vmem:[#allocation4 + $0xcc] ss:$24 sps:$4 sm:$0xff]  }
 0x255   : > { %5762 = vmatprep.subr.bf16.mxu1 %v9377_v8  ;;  %v9443_v8 = vld [vmem:[#allocation4 + $0xd4] ss:$24 sps:$4 sm:$0xff]  }
 0x257   : > { %3239 = vmatpush1.bf16.msra.mxu0 %v9372_v9  ;;  %v9438_v9 = vld [vmem:[#allocation4 + $0xc8] ss:$24 sps:$4 sm:$0xff]  }
 0x258   : > { %5763 = vmatpush1.bf16.msra.mxu1 %v9375_v18  ;;  %3240 = vmatprep.subr.bf16.mxu0 %v9380_v60  ;;  %v9446_v18 = vld [vmem:[#allocation4 + $0xfc] ss:$24 sps:$4 sm:$0xff]  }
 0x259   : > { %5764 = vmatprep.subr.bf16.mxu1 %v9383_v61  ;;  %v9449_v60 = vld [vmem:[#allocation4 + $0x104] ss:$24 sps:$4 sm:$0xff]   ;;  %v9444_v61 = vld [vmem:[#allocation4 + $0xf8] ss:$24 sps:$4 sm:$0xff]  }
 0x25b   : > { %3241 = vmatpush1.bf16.msra.mxu0 %v9378_v12  ;;  %v9447_v12 = vld [vmem:[#allocation4 + $0x100] ss:$24 sps:$4 sm:$0xff]  }
 0x25c   : > { %5765 = vmatpush1.bf16.msra.mxu1 %v9381_v13  ;;  %3242 = vmatprep.subr.bf16.mxu0 %v9386_v14  ;;  %v9452_v13 = vld [vmem:[#allocation4 + $0x12c] ss:$24 sps:$4 sm:$0xff]  }
 0x25d   : > { %5766 = vmatprep.subr.bf16.mxu1 %v9389_v15  ;;  %v9455_v14 = vld [vmem:[#allocation4 + $0x134] ss:$24 sps:$4 sm:$0xff]   ;;  %v9450_v15 = vld [vmem:[#allocation4 + $0x128] ss:$24 sps:$4 sm:$0xff]  }
 0x25f   : > { %3243 = vmatpush1.bf16.msra.mxu0 %v9384_v24  ;;  %v9453_v24 = vld [vmem:[#allocation4 + $0x130] ss:$24 sps:$4 sm:$0xff]  }
 0x260   : > { %5767 = vmatpush1.bf16.msra.mxu1 %v9387_v19  ;;  %3244 = vmatprep.subr.bf16.mxu0 %v9392_v20  ;;  %v9458_v19 = vld [vmem:[#allocation4 + $0x15c] ss:$24 sps:$4 sm:$0xff]  }
 0x261   : > { %5768 = vmatprep.subr.bf16.mxu1 %v9395_v21  ;;  %v9461_v20 = vld [vmem:[#allocation4 + $0x164] ss:$24 sps:$4 sm:$0xff]   ;;  %v9456_v21 = vld [vmem:[#allocation4 + $0x158] ss:$24 sps:$4 sm:$0xff]  }
 0x263   : > { %3245 = vmatpush1.bf16.msra.mxu0 %v9390_v22  ;;  %v9459_v22 = vld [vmem:[#allocation4 + $0x160] ss:$24 sps:$4 sm:$0xff]  }
 0x264   : > { %5769 = vmatpush1.bf16.msra.mxu1 %v9393_v23  ;;  %3246 = vmatprep.subr.bf16.mxu0 %v9398_v29  ;;  %v9464_v23 = vld [vmem:[#allocation4 + $0x18c] ss:$24 sps:$4 sm:$0xff]  }
 0x265   : > { %5770 = vmatprep.subr.bf16.mxu1 %v9401_v27  ;;  %v9467_v29 = vld [vmem:[#allocation4 + $0x194] ss:$24 sps:$4 sm:$0xff]   ;;  %v9462_v27 = vld [vmem:[#allocation4 + $0x188] ss:$24 sps:$4 sm:$0xff]  }
 0x267   : > { %3247 = vmatpush1.bf16.msra.mxu0 %v9396_v28  ;;  %v9465_v28 = vld [vmem:[#allocation4 + $0x190] ss:$24 sps:$4 sm:$0xff]  }
 0x268   : > { %5771 = vmatpush1.bf16.msra.mxu1 %v9399_v16  ;;  %3248 = vmatprep.subr.bf16.mxu0 %v9404_v17  ;;  %v9470_v16 = vld [vmem:[#allocation4 + $0x1bc] ss:$24 sps:$4 sm:$0xff]  }
 0x269   : > { %5772 = vmatprep.subr.bf16.mxu1 %v9407_v30  ;;  %v9473_v17 = vld [vmem:[#allocation4 + $0x1c4] ss:$24 sps:$4 sm:$0xff]   ;;  %v9468_v30 = vld [vmem:[#allocation4 + $0x1b8] ss:$24 sps:$4 sm:$0xff]  }
 0x26b   : > { %3249 = vmatpush1.bf16.msra.mxu0 %v9402_v31  ;;  %v9471_v31 = vld [vmem:[#allocation4 + $0x1c0] ss:$24 sps:$4 sm:$0xff]  }
 0x26c   : > { %5773 = vmatpush1.bf16.msra.mxu1 %v9405_v32  ;;  %3250 = vmatprep.subr.bf16.mxu0 %v9410_v37  ;;  %v9476_v32 = vld [vmem:[#allocation4 + $0x1ec] ss:$24 sps:$4 sm:$0xff]  }
 0x26d   : > { %5774 = vmatprep.subr.bf16.mxu1 %v9413_v38  ;;  %v9479_v37 = vld [vmem:[#allocation4 + $0x1f4] ss:$24 sps:$4 sm:$0xff]   ;;  %v9474_v38 = vld [vmem:[#allocation4 + $0x1e8] ss:$24 sps:$4 sm:$0xff]  }
 0x26f   : > { %3251 = vmatpush1.bf16.msra.mxu0 %v9408_v39  ;;  %v9477_v39 = vld [vmem:[#allocation4 + $0x1f0] ss:$24 sps:$4 sm:$0xff]  }
 0x270   : > { %5775 = vmatpush1.bf16.msra.mxu1 %v9411_v40  ;;  %5787 = vmatprep.subr.bf16.mxu0 %v9416_v26  ;;  %v9482_v40 = vld [vmem:[#allocation4 + $0x21c] ss:$24 sps:$4 sm:$0xff]  }
 0x271   : > { %5959 = vmatprep.subr.bf16.mxu1 %v9419_v42  ;;  %v9485_v26 = vld [vmem:[#allocation4 + $0x224] ss:$24 sps:$4 sm:$0xff]   ;;  %v9480_v42 = vld [vmem:[#allocation4 + $0x218] ss:$24 sps:$4 sm:$0xff]  }
 0x272   : > { %3253 = vmatmul.mubr.bf16.vlgmr.msra.gmra.mrb[4].mxu0 %v10304_v35  ;;  %v9434_v35 = vld [vmem:[#allocation4 + $0x9c] ss:$24 sps:$4 sm:$0xff]  }
 0x273   : > { %5777 = vmatmul.mubr.bf16.vlgmr.msra.gmra.mrb[4].mxu1 %v10397_v43  ;;  %5788 = vmatpush1.bf16.msra.mxu0 %v9414_v44  ;;  %v9483_v44 = vld [vmem:[#allocation4 + $0x220] ss:$24 sps:$4 sm:$0xff]  }
 0x274   : > { %5960 = vmatpush1.bf16.msra.mxu1 %v9417_v52  ;;  %5789 = vmatprep.subr.bf16.mxu0 %v9422_v50  ;;  %v9488_v52 = vld [vmem:[#allocation4 + $0x24c] ss:$24 sps:$4 sm:$0xff]  }
 0x275   : > { %5961 = vmatprep.subr.bf16.mxu1 %v9425_v33  ;;  %5819 = vmatprep.mubr.bf16.mxu0 %v10311_v41  ;;  %v9491_v50 = vld [vmem:[#allocation4 + $0x254] ss:$24 sps:$4 sm:$0xff]   ;;  %v9486_v33 = vld [vmem:[#allocation4 + $0x248] ss:$24 sps:$4 sm:$0xff]  }
 0x276   : > { %5991 = vmatprep.mubr.bf16.mxu1 %v10311_v41  ;;  %v9441_v41 = vld [vmem:[#allocation4 + $0xd0] ss:$24 sps:$4 sm:$0xff]  }
 0x277   : > { %5790 = vmatpush1.bf16.msra.mxu0 %v9420_v36  ;;  %v9489_v36 = vld [vmem:[#allocation4 + $0x250] ss:$24 sps:$4 sm:$0xff]  }
 0x278   : > { %5962 = vmatpush1.bf16.msra.mxu1 %v9423_v46  ;;  %5791 = vmatprep.subr.bf16.mxu0 %v9428_v11  ;;  %v9494_v46 = vld [vmem:[#allocation4 + $0x27c] ss:$24 sps:$4 sm:$0xff]  }
 0x279   : > { %5963 = vmatprep.subr.bf16.mxu1 %v9431_v4  ;;  %v9497_v11 = vld [vmem:[#allocation4 + $0x284] ss:$24 sps:$4 sm:$0xff]   ;;  %v9492_v4 = vld [vmem:[#allocation4 + $0x278] ss:$24 sps:$4 sm:$0xff]  }
 0x27b   : > { %5792 = vmatpush1.bf16.msra.mxu0 %v9426_v47  ;;  %v9495_v47 = vld [vmem:[#allocation4 + $0x280] ss:$24 sps:$4 sm:$0xff]  }
 0x27c   : > { %5964 = vmatpush1.bf16.msra.mxu1 %v9429_v0  ;;  %5793 = vmatprep.subr.bf16.mxu0 %v9434_v35  ;;  %v9500_v0 = vld [vmem:[#allocation4 + $0x2ac] ss:$24 sps:$4 sm:$0xff]  }
 0x27d   : > { %5965 = vmatprep.subr.bf16.mxu1 %v9437_v1  ;;  %v9503_v35 = vld [vmem:[#allocation4 + $0x2b4] ss:$24 sps:$4 sm:$0xff]   ;;  %v9498_v1 = vld [vmem:[#allocation4 + $0x2a8] ss:$24 sps:$4 sm:$0xff]  }
 0x27f   : > { %5794 = vmatpush1.bf16.msra.mxu0 %v9432_v2  ;;  %v9501_v2 = vld [vmem:[#allocation4 + $0x2b0] ss:$24 sps:$4 sm:$0xff]  }
 0x280   : > { %5966 = vmatpush1.bf16.msra.mxu1 %v9435_v3  ;;  %5795 = vmatprep.subr.bf16.mxu0 %v9440_v7  ;;  %v9506_v3 = vld [vmem:[#allocation4 + $0x2dc] ss:$24 sps:$4 sm:$0xff]  }
 0x281   : > { %5967 = vmatprep.subr.bf16.mxu1 %v9443_v8  ;;  %v9509_v7 = vld [vmem:[#allocation4 + $0x2e4] ss:$24 sps:$4 sm:$0xff]   ;;  %v9504_v8 = vld [vmem:[#allocation4 + $0x2d8] ss:$24 sps:$4 sm:$0xff]  }
 0x283   : > { %5796 = vmatpush1.bf16.msra.mxu0 %v9438_v9  ;;  %v9507_v9 = vld [vmem:[#allocation4 + $0x2e0] ss:$24 sps:$4 sm:$0xff]  }
 0x284   : > { %5968 = vmatpush1.bf16.msra.mxu1 %v9441_v41  ;;  %5797 = vmatprep.subr.bf16.mxu0 %v9446_v18  ;;  %v9512_v41 = vld [vmem:[#allocation4 + $0x30c] ss:$24 sps:$4 sm:$0xff]  }
 0x285   : > { %5969 = vmatprep.subr.bf16.mxu1 %v9449_v60  ;;  %v9515_v18 = vld [vmem:[#allocation4 + $0x314] ss:$24 sps:$4 sm:$0xff]   ;;  %v9510_v60 = vld [vmem:[#allocation4 + $0x308] ss:$24 sps:$4 sm:$0xff]  }
 0x287   : > { %5798 = vmatpush1.bf16.msra.mxu0 %v9444_v61  ;;  %v9513_v61 = vld [vmem:[#allocation4 + $0x310] ss:$24 sps:$4 sm:$0xff]  }
 0x288   : > { %5970 = vmatpush1.bf16.msra.mxu1 %v9447_v12  ;;  %5799 = vmatprep.subr.bf16.mxu0 %v9452_v13  ;;  %v9518_v12 = vld [vmem:[#allocation4 + $0x33c] ss:$24 sps:$4 sm:$0xff]  }
 0x289   : > { %5971 = vmatprep.subr.bf16.mxu1 %v9455_v14  ;;  %v9521_v13 = vld [vmem:[#allocation4 + $0x344] ss:$24 sps:$4 sm:$0xff]   ;;  %v9516_v14 = vld [vmem:[#allocation4 + $0x338] ss:$24 sps:$4 sm:$0xff]  }
 0x28b   : > { %5800 = vmatpush1.bf16.msra.mxu0 %v9450_v15  ;;  %v9519_v15 = vld [vmem:[#allocation4 + $0x340] ss:$24 sps:$4 sm:$0xff]  }
 0x28c   : > { %5972 = vmatpush1.bf16.msra.mxu1 %v9453_v24  ;;  %5801 = vmatprep.subr.bf16.mxu0 %v9458_v19  ;;  %v9524_v24 = vld [vmem:[#allocation4 + $0x36c] ss:$24 sps:$4 sm:$0xff]  }
 0x28d   : > { %5973 = vmatprep.subr.bf16.mxu1 %v9461_v20  ;;  %v9527_v19 = vld [vmem:[#allocation4 + $0x374] ss:$24 sps:$4 sm:$0xff]   ;;  %v9522_v20 = vld [vmem:[#allocation4 + $0x368] ss:$24 sps:$4 sm:$0xff]  }
 0x28f   : > { %5802 = vmatpush1.bf16.msra.mxu0 %v9456_v21  ;;  %v9525_v21 = vld [vmem:[#allocation4 + $0x370] ss:$24 sps:$4 sm:$0xff]  }
 0x290   : > { %5974 = vmatpush1.bf16.msra.mxu1 %v9459_v22  ;;  %5803 = vmatprep.subr.bf16.mxu0 %v9464_v23  ;;  %v9530_v22 = vld [vmem:[#allocation4 + $0x39c] ss:$24 sps:$4 sm:$0xff]   ;;  %v9528_v23 = vld [vmem:[#allocation4 + $0x398] ss:$24 sps:$4 sm:$0xff]  }
 0x291   : > { %5975 = vmatprep.subr.bf16.mxu1 %v9467_v29  ;;  %v9531_v29 = vld [vmem:[#allocation4 + $0x3a0] ss:$24 sps:$4 sm:$0xff]  }
 0x293   : > { %5804 = vmatpush1.bf16.msra.mxu0 %v9462_v27  ;;  %v9536_v27 = vld [vmem:[#allocation4 + $0x3cc] ss:$24 sps:$4 sm:$0xff]  }
 0x294   : > { %5976 = vmatpush1.bf16.msra.mxu1 %v9465_v28  ;;  %5805 = vmatprep.subr.bf16.mxu0 %v9470_v16  ;;  %v9539_v28 = vld [vmem:[#allocation4 + $0x3d4] ss:$24 sps:$4 sm:$0xff]   ;;  %v9534_v16 = vld [vmem:[#allocation4 + $0x3c8] ss:$24 sps:$4 sm:$0xff]  }
 0x295   : > { %5977 = vmatprep.subr.bf16.mxu1 %v9473_v17  ;;  %v9542_v17 = vld [vmem:[#allocation4 + $0x3fc] ss:$24 sps:$4 sm:$0xff]  }
 0x297   : > { %5806 = vmatpush1.bf16.msra.mxu0 %v9468_v30  ;;  %v9545_v30 = vld [vmem:[#allocation4 + $0x404] ss:$24 sps:$4 sm:$0xff]  }
 0x298   : > { %5978 = vmatpush1.bf16.msra.mxu1 %v9471_v31  ;;  %5807 = vmatprep.subr.bf16.mxu0 %v9476_v32  ;;  %v9540_v31 = vld [vmem:[#allocation4 + $0x3f8] ss:$24 sps:$4 sm:$0xff]  }
 0x299   : > { %5979 = vmatprep.subr.bf16.mxu1 %v9479_v37  ;;  %v9543_v32 = vld [vmem:[#allocation4 + $0x400] ss:$24 sps:$4 sm:$0xff]   ;;  %v9548_v37 = vld [vmem:[#allocation4 + $0x42c] ss:$24 sps:$4 sm:$0xff]  }
 0x29b   : > { %5808 = vmatpush1.bf16.msra.mxu0 %v9474_v38  ;;  %v9551_v38 = vld [vmem:[#allocation4 + $0x434] ss:$24 sps:$4 sm:$0xff]  }
 0x29c   : > { %5980 = vmatpush1.bf16.msra.mxu1 %v9477_v39  ;;  %5809 = vmatprep.subr.bf16.mxu0 %v9482_v40  ;;  %v9546_v39 = vld [vmem:[#allocation4 + $0x428] ss:$24 sps:$4 sm:$0xff]  }
 0x29d   : > { %5981 = vmatprep.subr.bf16.mxu1 %v9485_v26  ;;  %v9549_v40 = vld [vmem:[#allocation4 + $0x430] ss:$24 sps:$4 sm:$0xff]   ;;  %v9554_v26 = vld [vmem:[#allocation4 + $0x45c] ss:$24 sps:$4 sm:$0xff]  }
 0x29f   : > { %5810 = vmatpush1.bf16.msra.mxu0 %v9480_v42  ;;  %v9557_v42 = vld [vmem:[#allocation4 + $0x464] ss:$24 sps:$4 sm:$0xff]  }
 0x2a0   : > { %5982 = vmatpush1.bf16.msra.mxu1 %v9483_v44  ;;  %5811 = vmatprep.subr.bf16.mxu0 %v9488_v52  ;;  %v9552_v44 = vld [vmem:[#allocation4 + $0x458] ss:$24 sps:$4 sm:$0xff]  }
 0x2a1   : > { %5983 = vmatprep.subr.bf16.mxu1 %v9491_v50  ;;  %v9555_v52 = vld [vmem:[#allocation4 + $0x460] ss:$24 sps:$4 sm:$0xff]   ;;  %v9560_v50 = vld [vmem:[#allocation4 + $0x48c] ss:$24 sps:$4 sm:$0xff]  }
 0x2a3   : > { %5812 = vmatpush1.bf16.msra.mxu0 %v9486_v33  ;;  %v9563_v33 = vld [vmem:[#allocation4 + $0x494] ss:$24 sps:$4 sm:$0xff]  }
 0x2a4   : > { %5984 = vmatpush1.bf16.msra.mxu1 %v9489_v36  ;;  %5813 = vmatprep.subr.bf16.mxu0 %v9494_v46  ;;  %v9558_v36 = vld [vmem:[#allocation4 + $0x488] ss:$24 sps:$4 sm:$0xff]  }
 0x2a5   : > { %5985 = vmatprep.subr.bf16.mxu1 %v9497_v11  ;;  %v9561_v46 = vld [vmem:[#allocation4 + $0x490] ss:$24 sps:$4 sm:$0xff]   ;;  %v9566_v11 = vld [vmem:[#allocation4 + $0x4bc] ss:$24 sps:$4 sm:$0xff]  }
 0x2a7   : > { %5814 = vmatpush1.bf16.msra.mxu0 %v9492_v4  ;;  %v9569_v4 = vld [vmem:[#allocation4 + $0x4c4] ss:$24 sps:$4 sm:$0xff]  }
 0x2a8   : > { %5986 = vmatpush1.bf16.msra.mxu1 %v9495_v47  ;;  %5815 = vmatprep.subr.bf16.mxu0 %v9500_v0  ;;  %v9564_v47 = vld [vmem:[#allocation4 + $0x4b8] ss:$24 sps:$4 sm:$0xff]  }
 0x2a9   : > { %5987 = vmatprep.subr.bf16.mxu1 %v9503_v35  ;;  %v9567_v0 = vld [vmem:[#allocation4 + $0x4c0] ss:$24 sps:$4 sm:$0xff]   ;;  %v9572_v35 = vld [vmem:[#allocation4 + $0x4ec] ss:$24 sps:$4 sm:$0xff]  }
 0x2ab   : > { %5816 = vmatpush1.bf16.msra.mxu0 %v9498_v1  ;;  %v9575_v1 = vld [vmem:[#allocation4 + $0x4f4] ss:$24 sps:$4 sm:$0xff]  }
 0x2ac   : > { %5988 = vmatpush1.bf16.msra.mxu1 %v9501_v2  ;;  %5817 = vmatprep.subr.bf16.mxu0 %v9506_v3  ;;  %v9570_v2 = vld [vmem:[#allocation4 + $0x4e8] ss:$24 sps:$4 sm:$0xff]  }
 0x2ad   : > { %5989 = vmatprep.subr.bf16.mxu1 %v9509_v7  ;;  %v9573_v3 = vld [vmem:[#allocation4 + $0x4f0] ss:$24 sps:$4 sm:$0xff]   ;;  %v9578_v7 = vld [vmem:[#allocation4 + $0x51c] ss:$24 sps:$4 sm:$0xff]  }
 0x2af   : > { %5818 = vmatpush1.bf16.msra.mxu0 %v9504_v8  ;;  %v9581_v8 = vld [vmem:[#allocation4 + $0x524] ss:$24 sps:$4 sm:$0xff]  }
 0x2b0   : > { %5990 = vmatpush1.bf16.msra.mxu1 %v9507_v9  ;;  %5830 = vmatprep.subr.bf16.mxu0 %v9512_v41  ;;  %v9576_v9 = vld [vmem:[#allocation4 + $0x518] ss:$24 sps:$4 sm:$0xff]  }
 0x2b1   : > { %6002 = vmatprep.subr.bf16.mxu1 %v9515_v18  ;;  %v9579_v41 = vld [vmem:[#allocation4 + $0x520] ss:$24 sps:$4 sm:$0xff]   ;;  %v9584_v18 = vld [vmem:[#allocation4 + $0x54c] ss:$24 sps:$4 sm:$0xff]  }
 0x2b2   : > { %5820 = vmatmul.mubr.bf16.vlgmr.msra.gmra.mrb[8].mxu0 %v10325_v48 }
 0x2b3   : > { %5992 = vmatmul.mubr.bf16.vlgmr.msra.gmra.mrb[8].mxu1 %v10325_v48  ;;  %5831 = vmatpush1.bf16.msra.mxu0 %v9510_v60  ;;  %v9533_v48 = vld [vmem:[#allocation4 + $0x3a4] ss:$24 sps:$4 sm:$0xff]   ;;  %v9587_v60 = vld [vmem:[#allocation4 + $0x554] ss:$24 sps:$4 sm:$0xff]  }
 0x2b4   : > { %6003 = vmatpush1.bf16.msra.mxu1 %v9513_v61  ;;  %5832 = vmatprep.subr.bf16.mxu0 %v9518_v12  ;;  %v9582_v61 = vld [vmem:[#allocation4 + $0x548] ss:$24 sps:$4 sm:$0xff]  }
 0x2b5   : > { %6004 = vmatprep.subr.bf16.mxu1 %v9521_v13  ;;  %5862 = vmatprep.mubr.bf16.mxu0 %v10329_v53  ;;  %v9585_v12 = vld [vmem:[#allocation4 + $0x550] ss:$24 sps:$4 sm:$0xff]   ;;  %v9590_v13 = vld [vmem:[#allocation4 + $0x57c] ss:$24 sps:$4 sm:$0xff]  }
 0x2b6   : > { %6034 = vmatprep.mubr.bf16.mxu1 %v10329_v53  ;;  %v9537_v53 = vld [vmem:[#allocation4 + $0x3d0] ss:$24 sps:$4 sm:$0xff]  }
 0x2b7   : > { %5833 = vmatpush1.bf16.msra.mxu0 %v9516_v14  ;;  %v9593_v14 = vld [vmem:[#allocation4 + $0x584] ss:$24 sps:$4 sm:$0xff]  }
 0x2b8   : > { %6005 = vmatpush1.bf16.msra.mxu1 %v9519_v15  ;;  %5834 = vmatprep.subr.bf16.mxu0 %v9524_v24  ;;  %v9588_v15 = vld [vmem:[#allocation4 + $0x578] ss:$24 sps:$4 sm:$0xff]  }
 0x2b9   : > { %6006 = vmatprep.subr.bf16.mxu1 %v9527_v19  ;;  %v9591_v24 = vld [vmem:[#allocation4 + $0x580] ss:$24 sps:$4 sm:$0xff]   ;;  %v9596_v19 = vld [vmem:[#allocation4 + $0x5ac] ss:$24 sps:$4 sm:$0xff]  }
 0x2bb   : > { %5835 = vmatpush1.bf16.msra.mxu0 %v9522_v20  ;;  %v9599_v20 = vld [vmem:[#allocation4 + $0x5b4] ss:$24 sps:$4 sm:$0xff]  }
 0x2bc   : > { %6007 = vmatpush1.bf16.msra.mxu1 %v9525_v21  ;;  %5836 = vmatprep.subr.bf16.mxu0 %v9530_v22  ;;  %v9594_v21 = vld [vmem:[#allocation4 + $0x5a8] ss:$24 sps:$4 sm:$0xff]  }
 0x2bd   : > { %6008 = vmatprep.subr.bf16.mxu1 %v9533_v48  ;;  %v9597_v22 = vld [vmem:[#allocation4 + $0x5b0] ss:$24 sps:$4 sm:$0xff]   ;;  %v9602_v48 = vld [vmem:[#allocation4 + $0x5dc] ss:$24 sps:$4 sm:$0xff]  }
 0x2bf   : > { %5837 = vmatpush1.bf16.msra.mxu0 %v9528_v23  ;;  %v9605_v23 = vld [vmem:[#allocation4 + $0x5e4] ss:$24 sps:$4 sm:$0xff]  }
 0x2c0   : > { %6009 = vmatpush1.bf16.msra.mxu1 %v9531_v29  ;;  %5838 = vmatprep.subr.bf16.mxu0 %v9536_v27  ;;  %v9600_v29 = vld [vmem:[#allocation4 + $0x5d8] ss:$24 sps:$4 sm:$0xff]  }
 0x2c1   : > { %6010 = vmatprep.subr.bf16.mxu1 %v9539_v28  ;;  %v9603_v27 = vld [vmem:[#allocation4 + $0x5e0] ss:$24 sps:$4 sm:$0xff]   ;;  %v9608_v28 = vld [vmem:[#allocation4 + $0x60c] ss:$24 sps:$4 sm:$0xff]  }
 0x2c3   : > { %5839 = vmatpush1.bf16.msra.mxu0 %v9534_v16  ;;  %v9611_v16 = vld [vmem:[#allocation4 + $0x614] ss:$24 sps:$4 sm:$0xff]  }
 0x2c4   : > { %6011 = vmatpush1.bf16.msra.mxu1 %v9537_v53  ;;  %5840 = vmatprep.subr.bf16.mxu0 %v9542_v17  ;;  %v9606_v53 = vld [vmem:[#allocation4 + $0x608] ss:$24 sps:$4 sm:$0xff]  }
 0x2c5   : > { %6012 = vmatprep.subr.bf16.mxu1 %v9545_v30  ;;  %v9609_v17 = vld [vmem:[#allocation4 + $0x610] ss:$24 sps:$4 sm:$0xff]   ;;  %v9614_v30 = vld [vmem:[#allocation4 + $0x63c] ss:$24 sps:$4 sm:$0xff]  }
 0x2c7   : > { %5841 = vmatpush1.bf16.msra.mxu0 %v9540_v31  ;;  %v9617_v31 = vld [vmem:[#allocation4 + $0x644] ss:$24 sps:$4 sm:$0xff]  }
 0x2c8   : > { %6013 = vmatpush1.bf16.msra.mxu1 %v9543_v32  ;;  %5842 = vmatprep.subr.bf16.mxu0 %v9548_v37  ;;  %v9612_v32 = vld [vmem:[#allocation4 + $0x638] ss:$24 sps:$4 sm:$0xff]  }
 0x2c9   : > { %6014 = vmatprep.subr.bf16.mxu1 %v9551_v38  ;;  %v9615_v37 = vld [vmem:[#allocation4 + $0x640] ss:$24 sps:$4 sm:$0xff]   ;;  %v9620_v38 = vld [vmem:[#allocation4 + $0x66c] ss:$24 sps:$4 sm:$0xff]  }
 0x2cb   : > { %5843 = vmatpush1.bf16.msra.mxu0 %v9546_v39  ;;  %v9623_v39 = vld [vmem:[#allocation4 + $0x674] ss:$24 sps:$4 sm:$0xff]  }
 0x2cc   : > { %6015 = vmatpush1.bf16.msra.mxu1 %v9549_v40  ;;  %5844 = vmatprep.subr.bf16.mxu0 %v9554_v26  ;;  %v9618_v40 = vld [vmem:[#allocation4 + $0x668] ss:$24 sps:$4 sm:$0xff]  }
 0x2cd   : > { %6016 = vmatprep.subr.bf16.mxu1 %v9557_v42  ;;  %v9621_v26 = vld [vmem:[#allocation4 + $0x670] ss:$24 sps:$4 sm:$0xff]   ;;  %v9626_v42 = vld [vmem:[#allocation4 + $0x69c] ss:$24 sps:$4 sm:$0xff]  }
 0x2cf   : > { %5845 = vmatpush1.bf16.msra.mxu0 %v9552_v44  ;;  %v9624_v44 = vld [vmem:[#allocation4 + $0x698] ss:$24 sps:$4 sm:$0xff]  }
 0x2d0   : > { %6017 = vmatpush1.bf16.msra.mxu1 %v9555_v52  ;;  %5846 = vmatprep.subr.bf16.mxu0 %v9560_v50  ;;  %v9627_v52 = vld [vmem:[#allocation4 + $0x6a0] ss:$24 sps:$4 sm:$0xff]   ;;  %v9632_v50 = vld [vmem:[#allocation4 + $0x6cc] ss:$24 sps:$4 sm:$0xff]  }
 0x2d1   : > { %6018 = vmatprep.subr.bf16.mxu1 %v9563_v33  ;;  %v9635_v33 = vld [vmem:[#allocation4 + $0x6d4] ss:$24 sps:$4 sm:$0xff]  }
 0x2d3   : > { %5847 = vmatpush1.bf16.msra.mxu0 %v9558_v36  ;;  %v9630_v36 = vld [vmem:[#allocation4 + $0x6c8] ss:$24 sps:$4 sm:$0xff]  }
 0x2d4   : > { %6019 = vmatpush1.bf16.msra.mxu1 %v9561_v46  ;;  %5848 = vmatprep.subr.bf16.mxu0 %v9566_v11  ;;  %v9638_v46 = vld [vmem:[#allocation4 + $0x6fc] ss:$24 sps:$4 sm:$0xff]  }
 0x2d5   : > { %6020 = vmatprep.subr.bf16.mxu1 %v9569_v4  ;;  %v9641_v11 = vld [vmem:[#allocation4 + $0x704] ss:$24 sps:$4 sm:$0xff]   ;;  %v9636_v4 = vld [vmem:[#allocation4 + $0x6f8] ss:$24 sps:$4 sm:$0xff]  }
 0x2d7   : > { %5849 = vmatpush1.bf16.msra.mxu0 %v9564_v47  ;;  %v9639_v47 = vld [vmem:[#allocation4 + $0x700] ss:$24 sps:$4 sm:$0xff]  }
 0x2d8   : > { %6021 = vmatpush1.bf16.msra.mxu1 %v9567_v0  ;;  %5850 = vmatprep.subr.bf16.mxu0 %v9572_v35  ;;  %v9644_v0 = vld [vmem:[#allocation4 + $0x72c] ss:$24 sps:$4 sm:$0xff]  }
 0x2d9   : > { %6022 = vmatprep.subr.bf16.mxu1 %v9575_v1  ;;  %v9647_v35 = vld [vmem:[#allocation4 + $0x734] ss:$24 sps:$4 sm:$0xff]   ;;  %v9642_v1 = vld [vmem:[#allocation4 + $0x728] ss:$24 sps:$4 sm:$0xff]  }
 0x2db   : > { %5851 = vmatpush1.bf16.msra.mxu0 %v9570_v2  ;;  %v9645_v2 = vld [vmem:[#allocation4 + $0x730] ss:$24 sps:$4 sm:$0xff]  }
 0x2dc   : > { %6023 = vmatpush1.bf16.msra.mxu1 %v9573_v3  ;;  %5852 = vmatprep.subr.bf16.mxu0 %v9578_v7  ;;  %v9650_v3 = vld [vmem:[#allocation4 + $0x75c] ss:$24 sps:$4 sm:$0xff]  }
 0x2dd   : > { %6024 = vmatprep.subr.bf16.mxu1 %v9581_v8  ;;  %v9653_v7 = vld [vmem:[#allocation4 + $0x764] ss:$24 sps:$4 sm:$0xff]   ;;  %v9648_v8 = vld [vmem:[#allocation4 + $0x758] ss:$24 sps:$4 sm:$0xff]  }
 0x2df   : > { %5853 = vmatpush1.bf16.msra.mxu0 %v9576_v9  ;;  %v9651_v9 = vld [vmem:[#allocation4 + $0x760] ss:$24 sps:$4 sm:$0xff]  }
 0x2e0   : > { %6025 = vmatpush1.bf16.msra.mxu1 %v9579_v41  ;;  %5854 = vmatprep.subr.bf16.mxu0 %v9584_v18  ;;  %v9656_v41 = vld [vmem:[#allocation4 + $0x78c] ss:$24 sps:$4 sm:$0xff]  }
 0x2e1   : > { %6026 = vmatprep.subr.bf16.mxu1 %v9587_v60  ;;  %v9659_v18 = vld [vmem:[#allocation4 + $0x794] ss:$24 sps:$4 sm:$0xff]   ;;  %v9654_v60 = vld [vmem:[#allocation4 + $0x788] ss:$24 sps:$4 sm:$0xff]  }
 0x2e3   : > { %5855 = vmatpush1.bf16.msra.mxu0 %v9582_v61  ;;  %v9657_v61 = vld [vmem:[#allocation4 + $0x790] ss:$24 sps:$4 sm:$0xff]  }
 0x2e4   : > { %6027 = vmatpush1.bf16.msra.mxu1 %v9585_v12  ;;  %5856 = vmatprep.subr.bf16.mxu0 %v9590_v13  ;;  %v9662_v12 = vld [vmem:[#allocation4 + $0x7bc] ss:$24 sps:$4 sm:$0xff]  }
 0x2e5   : > { %6028 = vmatprep.subr.bf16.mxu1 %v9593_v14  ;;  %v9665_v13 = vld [vmem:[#allocation4 + $0x7c4] ss:$24 sps:$4 sm:$0xff]   ;;  %v9660_v14 = vld [vmem:[#allocation4 + $0x7b8] ss:$24 sps:$4 sm:$0xff]  }
 0x2e7   : > { %5857 = vmatpush1.bf16.msra.mxu0 %v9588_v15  ;;  %v9663_v15 = vld [vmem:[#allocation4 + $0x7c0] ss:$24 sps:$4 sm:$0xff]  }
 0x2e8   : > { %6029 = vmatpush1.bf16.msra.mxu1 %v9591_v24  ;;  %5858 = vmatprep.subr.bf16.mxu0 %v9596_v19  ;;  %v9668_v24 = vld [vmem:[#allocation4 + $0x7ec] ss:$24 sps:$4 sm:$0xff]  }
 0x2e9   : > { %6030 = vmatprep.subr.bf16.mxu1 %v9599_v20  ;;  %v9671_v19 = vld [vmem:[#allocation4 + $0x7f4] ss:$24 sps:$4 sm:$0xff]   ;;  %v9666_v20 = vld [vmem:[#allocation4 + $0x7e8] ss:$24 sps:$4 sm:$0xff]  }
 0x2eb   : > { %5859 = vmatpush1.bf16.msra.mxu0 %v9594_v21  ;;  %v9669_v21 = vld [vmem:[#allocation4 + $0x7f0] ss:$24 sps:$4 sm:$0xff]  }
 0x2ec   : > { %6031 = vmatpush1.bf16.msra.mxu1 %v9597_v22  ;;  %5860 = vmatprep.subr.bf16.mxu0 %v9602_v48  ;;  %v9674_v22 = vld [vmem:[#allocation4 + $0x81c] ss:$24 sps:$4 sm:$0xff]  }
 0x2ed   : > { %6032 = vmatprep.subr.bf16.mxu1 %v9605_v23  ;;  %v9677_v48 = vld [vmem:[#allocation4 + $0x824] ss:$24 sps:$4 sm:$0xff]   ;;  %v9672_v23 = vld [vmem:[#allocation4 + $0x818] ss:$24 sps:$4 sm:$0xff]  }
 0x2ef   : > { %5861 = vmatpush1.bf16.msra.mxu0 %v9600_v29  ;;  %v9675_v29 = vld [vmem:[#allocation4 + $0x820] ss:$24 sps:$4 sm:$0xff]  }
 0x2f0   : > { %6033 = vmatpush1.bf16.msra.mxu1 %v9603_v27  ;;  %5873 = vmatprep.subr.bf16.mxu0 %v9608_v28  ;;  %v9680_v27 = vld [vmem:[#allocation4 + $0x84c] ss:$24 sps:$4 sm:$0xff]  }
 0x2f1   : > { %6045 = vmatprep.subr.bf16.mxu1 %v9611_v16  ;;  %v9683_v28 = vld [vmem:[#allocation4 + $0x854] ss:$24 sps:$4 sm:$0xff]   ;;  %v9678_v16 = vld [vmem:[#allocation4 + $0x848] ss:$24 sps:$4 sm:$0xff]  }
 0x2f2   : > { %5863 = vmatmul.mubr.bf16.vlgmr.msra.gmra.mrb[8].mxu0 %v10337_v59 }
 0x2f3   : > { %6035 = vmatmul.mubr.bf16.vlgmr.msra.gmra.mrb[8].mxu1 %v10337_v59  ;;  %5874 = vmatpush1.bf16.msra.mxu0 %v9606_v53  ;;  %v9629_v59 = vld [vmem:[#allocation4 + $0x6a4] ss:$24 sps:$4 sm:$0xff]   ;;  %v9681_v53 = vld [vmem:[#allocation4 + $0x850] ss:$24 sps:$4 sm:$0xff]  }
 0x2f4   : > { %6046 = vmatpush1.bf16.msra.mxu1 %v9609_v17  ;;  %5875 = vmatprep.subr.bf16.mxu0 %v9614_v30  ;;  %v9686_v17 = vld [vmem:[#allocation4 + $0x87c] ss:$24 sps:$4 sm:$0xff]  }
 0x2f5   : > { %6047 = vmatprep.subr.bf16.mxu1 %v9617_v31  ;;  %5905 = vmatprep.mubr.bf16.mxu0 %v10347_v63  ;;  %v9689_v30 = vld [vmem:[#allocation4 + $0x884] ss:$24 sps:$4 sm:$0xff]   ;;  %v9684_v31 = vld [vmem:[#allocation4 + $0x878] ss:$24 sps:$4 sm:$0xff]  }
 0x2f6   : > { %6077 = vmatprep.mubr.bf16.mxu1 %v10347_v63  ;;  %v9633_v63 = vld [vmem:[#allocation4 + $0x6d0] ss:$24 sps:$4 sm:$0xff]  }
 0x2f7   : > { %5876 = vmatpush1.bf16.msra.mxu0 %v9612_v32  ;;  %v9687_v32 = vld [vmem:[#allocation4 + $0x880] ss:$24 sps:$4 sm:$0xff]  }
 0x2f8   : > { %6048 = vmatpush1.bf16.msra.mxu1 %v9615_v37  ;;  %5877 = vmatprep.subr.bf16.mxu0 %v9620_v38  ;;  %v9692_v37 = vld [vmem:[#allocation4 + $0x8ac] ss:$24 sps:$4 sm:$0xff]  }
 0x2f9   : > { %6049 = vmatprep.subr.bf16.mxu1 %v9623_v39  ;;  %v9695_v38 = vld [vmem:[#allocation4 + $0x8b4] ss:$24 sps:$4 sm:$0xff]   ;;  %v9690_v39 = vld [vmem:[#allocation4 + $0x8a8] ss:$24 sps:$4 sm:$0xff]  }
 0x2fb   : > { %5878 = vmatpush1.bf16.msra.mxu0 %v9618_v40  ;;  %v9693_v40 = vld [vmem:[#allocation4 + $0x8b0] ss:$24 sps:$4 sm:$0xff]  }
 0x2fc   : > { %6050 = vmatpush1.bf16.msra.mxu1 %v9621_v26  ;;  %5879 = vmatprep.subr.bf16.mxu0 %v9626_v42  ;;  %v9698_v26 = vld [vmem:[#allocation4 + $0x8dc] ss:$24 sps:$4 sm:$0xff]  }
 0x2fd   : > { %6051 = vmatprep.subr.bf16.mxu1 %v9629_v59  ;;  %v9701_v42 = vld [vmem:[#allocation4 + $0x8e4] ss:$24 sps:$4 sm:$0xff]   ;;  %v9696_v59 = vld [vmem:[#allocation4 + $0x8d8] ss:$24 sps:$4 sm:$0xff]  }
 0x2ff   : > { %5880 = vmatpush1.bf16.msra.mxu0 %v9624_v44  ;;  %v9699_v44 = vld [vmem:[#allocation4 + $0x8e0] ss:$24 sps:$4 sm:$0xff]  }
 0x300   : > { %6052 = vmatpush1.bf16.msra.mxu1 %v9627_v52  ;;  %5881 = vmatprep.subr.bf16.mxu0 %v9632_v50  ;;  %v9704_v52 = vld [vmem:[#allocation4 + $0x90c] ss:$24 sps:$4 sm:$0xff]  }
 0x301   : > { %6053 = vmatprep.subr.bf16.mxu1 %v9635_v33  ;;  %v9707_v50 = vld [vmem:[#allocation4 + $0x914] ss:$24 sps:$4 sm:$0xff]   ;;  %v9702_v33 = vld [vmem:[#allocation4 + $0x908] ss:$24 sps:$4 sm:$0xff]  }
 0x303   : > { %5882 = vmatpush1.bf16.msra.mxu0 %v9630_v36  ;;  %v9705_v36 = vld [vmem:[#allocation4 + $0x910] ss:$24 sps:$4 sm:$0xff]  }
 0x304   : > { %6054 = vmatpush1.bf16.msra.mxu1 %v9633_v63  ;;  %5883 = vmatprep.subr.bf16.mxu0 %v9638_v46  ;;  %v9710_v63 = vld [vmem:[#allocation4 + $0x93c] ss:$24 sps:$4 sm:$0xff]  }
 0x305   : > { %6055 = vmatprep.subr.bf16.mxu1 %v9641_v11  ;;  %v9713_v46 = vld [vmem:[#allocation4 + $0x944] ss:$24 sps:$4 sm:$0xff]   ;;  %v9708_v11 = vld [vmem:[#allocation4 + $0x938] ss:$24 sps:$4 sm:$0xff]  }
 0x307   : > { %5884 = vmatpush1.bf16.msra.mxu0 %v9636_v4  ;;  %v9711_v4 = vld [vmem:[#allocation4 + $0x940] ss:$24 sps:$4 sm:$0xff]  }
 0x308   : > { %6056 = vmatpush1.bf16.msra.mxu1 %v9639_v47  ;;  %5885 = vmatprep.subr.bf16.mxu0 %v9644_v0  ;;  %v9716_v47 = vld [vmem:[#allocation4 + $0x96c] ss:$24 sps:$4 sm:$0xff]  }
 0x309   : > { %6057 = vmatprep.subr.bf16.mxu1 %v9647_v35  ;;  %v9719_v0 = vld [vmem:[#allocation4 + $0x974] ss:$24 sps:$4 sm:$0xff]   ;;  %v9714_v35 = vld [vmem:[#allocation4 + $0x968] ss:$24 sps:$4 sm:$0xff]  }
 0x30b   : > { %5886 = vmatpush1.bf16.msra.mxu0 %v9642_v1  ;;  %v9717_v1 = vld [vmem:[#allocation4 + $0x970] ss:$24 sps:$4 sm:$0xff]  }
 0x30c   : > { %6058 = vmatpush1.bf16.msra.mxu1 %v9645_v2  ;;  %5887 = vmatprep.subr.bf16.mxu0 %v9650_v3  ;;  %v9722_v2 = vld [vmem:[#allocation4 + $0x99c] ss:$24 sps:$4 sm:$0xff]   ;;  %v9720_v3 = vld [vmem:[#allocation4 + $0x998] ss:$24 sps:$4 sm:$0xff]  }
 0x30d   : > { %6059 = vmatprep.subr.bf16.mxu1 %v9653_v7  ;;  %v9723_v7 = vld [vmem:[#allocation4 + $0x9a0] ss:$24 sps:$4 sm:$0xff]  }
 0x30f   : > { %5888 = vmatpush1.bf16.msra.mxu0 %v9648_v8  ;;  %v9728_v8 = vld [vmem:[#allocation4 + $0x9cc] ss:$24 sps:$4 sm:$0xff]  }
 0x310   : > { %6060 = vmatpush1.bf16.msra.mxu1 %v9651_v9  ;;  %5889 = vmatprep.subr.bf16.mxu0 %v9656_v41  ;;  %v9731_v9 = vld [vmem:[#allocation4 + $0x9d4] ss:$24 sps:$4 sm:$0xff]   ;;  %v9726_v41 = vld [vmem:[#allocation4 + $0x9c8] ss:$24 sps:$4 sm:$0xff]  }
 0x311   : > { %6061 = vmatprep.subr.bf16.mxu1 %v9659_v18  ;;  %v9734_v18 = vld [vmem:[#allocation4 + $0x9fc] ss:$24 sps:$4 sm:$0xff]  }
 0x313   : > { %5890 = vmatpush1.bf16.msra.mxu0 %v9654_v60  ;;  %v9737_v60 = vld [vmem:[#allocation4 + $0xa04] ss:$24 sps:$4 sm:$0xff]  }
 0x314   : > { %6062 = vmatpush1.bf16.msra.mxu1 %v9657_v61  ;;  %5891 = vmatprep.subr.bf16.mxu0 %v9662_v12  ;;  %v9732_v61 = vld [vmem:[#allocation4 + $0x9f8] ss:$24 sps:$4 sm:$0xff]  }
 0x315   : > { %6063 = vmatprep.subr.bf16.mxu1 %v9665_v13  ;;  %v9735_v12 = vld [vmem:[#allocation4 + $0xa00] ss:$24 sps:$4 sm:$0xff]   ;;  %v9740_v13 = vld [vmem:[#allocation4 + $0xa2c] ss:$24 sps:$4 sm:$0xff]  }
 0x317   : > { %5892 = vmatpush1.bf16.msra.mxu0 %v9660_v14  ;;  %v9743_v14 = vld [vmem:[#allocation4 + $0xa34] ss:$24 sps:$4 sm:$0xff]  }
 0x318   : > { %6064 = vmatpush1.bf16.msra.mxu1 %v9663_v15  ;;  %5893 = vmatprep.subr.bf16.mxu0 %v9668_v24 }
 0x319   : > { %6065 = vmatprep.subr.bf16.mxu1 %v9671_v19 }
 0x31b   : > { %5894 = vmatpush1.bf16.msra.mxu0 %v9666_v20 }
 0x31c   : > { %6066 = vmatpush1.bf16.msra.mxu1 %v9669_v21  ;;  %5895 = vmatprep.subr.bf16.mxu0 %v9674_v22 }
 0x31d   : > { %6067 = vmatprep.subr.bf16.mxu1 %v9677_v48 }
 0x31f   : > { %5896 = vmatpush1.bf16.msra.mxu0 %v9672_v23  ;;  %v9738_v23 = vld [vmem:[#allocation4 + $0xa28] ss:$24 sps:$4 sm:$0xff]  }
 0x320   : > { %6068 = vmatpush1.bf16.msra.mxu1 %v9675_v29  ;;  %5897 = vmatprep.subr.bf16.mxu0 %v9680_v27  ;;  %v9741_v29 = vld [vmem:[#allocation4 + $0xa30] ss:$24 sps:$4 sm:$0xff]  }
 0x321   : > { %6069 = vmatprep.subr.bf16.mxu1 %v9683_v28 }
 0x323   : > { %5898 = vmatpush1.bf16.msra.mxu0 %v9678_v16 }
 0x324   : > { %6070 = vmatpush1.bf16.msra.mxu1 %v9681_v53  ;;  %5899 = vmatprep.subr.bf16.mxu0 %v9686_v17 }
 0x325   : > { %6071 = vmatprep.subr.bf16.mxu1 %v9689_v30  ;;  %v9746_v30 = vld [vmem:[#allocation4 + $0xa5c] ss:$24 sps:$4 sm:$0xff]  }
 0x327   : > { %5900 = vmatpush1.bf16.msra.mxu0 %v9684_v31  ;;  %v9749_v31 = vld [vmem:[#allocation4 + $0xa64] ss:$24 sps:$4 sm:$0xff]  }
 0x328   : > { %6072 = vmatpush1.bf16.msra.mxu1 %v9687_v32  ;;  %5901 = vmatprep.subr.bf16.mxu0 %v9692_v37 }
 0x329   : > { %6073 = vmatprep.subr.bf16.mxu1 %v9695_v38 }
 0x32b   : > { %5902 = vmatpush1.bf16.msra.mxu0 %v9690_v39 }
 0x32c   : > { %6074 = vmatpush1.bf16.msra.mxu1 %v9693_v40  ;;  %5903 = vmatprep.subr.bf16.mxu0 %v9698_v26 }
 0x32d   : > { %6075 = vmatprep.subr.bf16.mxu1 %v9701_v42 }
 0x32f   : > { %5904 = vmatpush1.bf16.msra.mxu0 %v9696_v59 }
 0x330   : > { %6076 = vmatpush1.bf16.msra.mxu1 %v9699_v44  ;;  %5916 = vmatprep.subr.bf16.mxu0 %v9704_v52  ;;  %v9744_v44 = vld [vmem:[#allocation4 + $0xa58] ss:$24 sps:$4 sm:$0xff]  }
 0x331   : > { %6088 = vmatprep.subr.bf16.mxu1 %v9707_v50  ;;  %v9747_v52 = vld [vmem:[#allocation4 + $0xa60] ss:$24 sps:$4 sm:$0xff]   ;;  %v9752_v50 = vld [vmem:[#allocation4 + $0xa8c] ss:$24 sps:$4 sm:$0xff]  }
 0x332   : > { %5906 = vmatmul.mubr.bf16.vlgmr.msra.gmra.mrb[8].mxu0 %v10361_v6 }
 0x333   : > { %6078 = vmatmul.mubr.bf16.vlgmr.msra.gmra.mrb[8].mxu1 %v10361_v6  ;;  %5917 = vmatpush1.bf16.msra.mxu0 %v9702_v33  ;;  %v9725_v6 = vld [vmem:[#allocation4 + $0x9a4] ss:$24 sps:$4 sm:$0xff]   ;;  %v9755_v33 = vld [vmem:[#allocation4 + $0xa94] ss:$24 sps:$4 sm:$0xff]  }
 0x334   : > { %6089 = vmatpush1.bf16.msra.mxu1 %v9705_v36  ;;  %5918 = vmatprep.subr.bf16.mxu0 %v9710_v63  ;;  %v9750_v36 = vld [vmem:[#allocation4 + $0xa88] ss:$24 sps:$4 sm:$0xff]  }
 0x335   : > { %6090 = vmatprep.subr.bf16.mxu1 %v9713_v46  ;;  %5948 = vmatprep.mubr.bf16.mxu0 %v10365_v10  ;;  %v9753_v63 = vld [vmem:[#allocation4 + $0xa90] ss:$24 sps:$4 sm:$0xff]   ;;  %v9758_v46 = vld [vmem:[#allocation4 + $0xabc] ss:$24 sps:$4 sm:$0xff]  }
 0x336   : > { %6120 = vmatprep.mubr.bf16.mxu1 %v10365_v10  ;;  %v9729_v10 = vld [vmem:[#allocation4 + $0x9d0] ss:$24 sps:$4 sm:$0xff]  }
 0x337   : > { %5919 = vmatpush1.bf16.msra.mxu0 %v9708_v11  ;;  %v9761_v11 = vld [vmem:[#allocation4 + $0xac4] ss:$24 sps:$4 sm:$0xff]  }
 0x338   : > { %6091 = vmatpush1.bf16.msra.mxu1 %v9711_v4  ;;  %5920 = vmatprep.subr.bf16.mxu0 %v9716_v47  ;;  %v9756_v4 = vld [vmem:[#allocation4 + $0xab8] ss:$24 sps:$4 sm:$0xff]  }
 0x339   : > { %6092 = vmatprep.subr.bf16.mxu1 %v9719_v0  ;;  %v9759_v47 = vld [vmem:[#allocation4 + $0xac0] ss:$24 sps:$4 sm:$0xff]   ;;  %v9764_v0 = vld [vmem:[#allocation4 + $0xaec] ss:$24 sps:$4 sm:$0xff]  }
 0x33b   : > { %5921 = vmatpush1.bf16.msra.mxu0 %v9714_v35  ;;  %v9767_v35 = vld [vmem:[#allocation4 + $0xaf4] ss:$24 sps:$4 sm:$0xff]  }
 0x33c   : > { %6093 = vmatpush1.bf16.msra.mxu1 %v9717_v1  ;;  %5922 = vmatprep.subr.bf16.mxu0 %v9722_v2  ;;  %v9762_v1 = vld [vmem:[#allocation4 + $0xae8] ss:$24 sps:$4 sm:$0xff]  }
 0x33d   : > { %6094 = vmatprep.subr.bf16.mxu1 %v9725_v6  ;;  %v9765_v2 = vld [vmem:[#allocation4 + $0xaf0] ss:$24 sps:$4 sm:$0xff]   ;;  %v9770_v6 = vld [vmem:[#allocation4 + $0xb1c] ss:$24 sps:$4 sm:$0xff]  }
 0x33f   : > { %5923 = vmatpush1.bf16.msra.mxu0 %v9720_v3  ;;  %v9773_v3 = vld [vmem:[#allocation4 + $0xb24] ss:$24 sps:$4 sm:$0xff]  }
 0x340   : > { %6095 = vmatpush1.bf16.msra.mxu1 %v9723_v7  ;;  %5924 = vmatprep.subr.bf16.mxu0 %v9728_v8  ;;  %v9768_v7 = vld [vmem:[#allocation4 + $0xb18] ss:$24 sps:$4 sm:$0xff]  }
 0x341   : > { %6096 = vmatprep.subr.bf16.mxu1 %v9731_v9  ;;  %v9771_v8 = vld [vmem:[#allocation4 + $0xb20] ss:$24 sps:$4 sm:$0xff]   ;;  %v9776_v9 = vld [vmem:[#allocation4 + $0xb4c] ss:$24 sps:$4 sm:$0xff]  }
 0x343   : > { %5925 = vmatpush1.bf16.msra.mxu0 %v9726_v41  ;;  %v9779_v41 = vld [vmem:[#allocation4 + $0xb54] ss:$24 sps:$4 sm:$0xff]  }
 0x344   : > { %6097 = vmatpush1.bf16.msra.mxu1 %v9729_v10  ;;  %5926 = vmatprep.subr.bf16.mxu0 %v9734_v18  ;;  %v9774_v10 = vld [vmem:[#allocation4 + $0xb48] ss:$24 sps:$4 sm:$0xff]  }
 0x345   : > { %6098 = vmatprep.subr.bf16.mxu1 %v9737_v60  ;;  %v3254_v15 = vpop.f32.mrb[4].mxu0  ;;  %v9777_v18 = vld [vmem:[#allocation4 + $0xb50] ss:$24 sps:$4 sm:$0xff]   ;;  %v9782_v60 = vld [vmem:[#allocation4 + $0xb7c] ss:$24 sps:$4 sm:$0xff]  }
 0x346   : > { %v5778_v24 = vpop.f32.mrb[4].mxu1  ;;  %v3256_v19 = vpop.f32.mrb[5].mxu0  ;;  %v10415_v21 = vmul.f32 %v3254_v15, %v3254_v15  ;;  %v9791_v15 = vld [vmem:[#allocation4 + $0xbb4] ss:$24 sps:$4 sm:$0xff]  }
 0x347   : > { %v5780_v20 = vpop.f32.mrb[5].mxu1  ;;  %v3258_v22 = vpop.f32.mrb[6].mxu0  ;;  %5927 = vmatpush1.bf16.msra.mxu0 %v9732_v61  ;;  %v10417_v27 = vmul.f32 %v5778_v24, %v5778_v24  ;;  %v10423_v32 = vmul.f32 %v3256_v19, %v3256_v19  ;;  %v9785_v61 = vld [vmem:[#allocation4 + $0xb84] ss:$24 sps:$4 sm:$0xff]   ;;  %v9786_v24 = vld [vmem:[#allocation4 + $0xba8] ss:$24 sps:$4 sm:$0xff]  }
 0x348   : > { %v5782_v48 = vpop.f32.mrb[6].mxu1  ;;  %6099 = vmatpush1.bf16.msra.mxu1 %v9735_v12  ;;  %v10419_v28 = vmul.f32 %v3258_v22, %v3258_v22  ;;  %v3260_v53 = vpop.f32.mrb[7].mxu0  ;;  %5928 = vmatprep.subr.bf16.mxu0 %v9740_v13  ;;  %v10425_v37 = vmul.f32 %v5780_v20, %v5780_v20  ;;  %v9780_v12 = vld [vmem:[#allocation4 + $0xb78] ss:$24 sps:$4 sm:$0xff]   ;;  %v9794_v20 = vld [vmem:[#allocation4 + $0xbdc] ss:$24 sps:$4 sm:$0xff]  }
 0x349   : > { %v10421_v16 = vmul.f32 %v5782_v48, %v5782_v48  ;;  %v5784_v17 = vpop.f32.mrb[7].mxu1  ;;  %6100 = vmatprep.subr.bf16.mxu1 %v9743_v14  ;;  %v10427_v38 = vmul.f32 %v3260_v53, %v3260_v53  ;;  %v9783_v13 = vld [vmem:[#allocation4 + $0xb80] ss:$24 sps:$4 sm:$0xff]   ;;  %v9788_v14 = vld [vmem:[#allocation4 + $0xbac] ss:$24 sps:$4 sm:$0xff]  }
 0x34a   : > { %v10429_v39 = vmul.f32 %v5784_v17, %v5784_v17  ;;  %v6147_v40 = vpack.c.bf16 %v10419_v28, %v10415_v21  ;;  %v9789_v19 = vld [vmem:[#allocation4 + $0xbb0] ss:$24 sps:$4 sm:$0xff]   ;;  %v9797_v22 = vld [vmem:[#allocation4 + $0xbe4] ss:$24 sps:$4 sm:$0xff]  }
 0x34b   : > { %v6161_v26 = vpack.c.bf16 %v10421_v16, %v10417_v27  ;;  %v6148_v42 = vpack.c.bf16 %v10427_v38, %v10423_v32  ;;  %5929 = vmatpush1.bf16.msra.mxu0 %v9738_v23  ;;  %v9792_v48 = vld [vmem:[#allocation4 + $0xbd8] ss:$24 sps:$4 sm:$0xff]   ;;  %v9814_v53 = vld [vmem:[%s10771_s5 + $0xc0] sm:$0xff]   ;;  %v9889_v32 = vld [vmem:[%s10770_s4 + $0x128] sm:$0xff]  }
 0x34c   : > { %v6162_v59 = vpack.c.bf16 %v10429_v39, %v10425_v37  ;;  %6101 = vmatpush1.bf16.msra.mxu1 %v9741_v29  ;;  %5930 = vmatprep.subr.bf16.mxu0 %v9746_v30  ;;  %v9795_v23 = vld [vmem:[#allocation4 + $0xbe0] ss:$24 sps:$4 sm:$0xff]   ;;  %v9800_v30 = vld [vmem:[%s10771_s5 + $0x48] sm:$0xff]   ;;  %v9803_v37 = vld [vmem:[%s10771_s5 + $0x10] sm:$0xff]  }
 0x34d   : > { %6102 = vmatprep.subr.bf16.mxu1 %v9749_v31  ;;  %v9798_v29 = vld [vmem:[%s10771_s5 + $0x40] sm:$0xff]   ;;  %v9804_v39 = vld [vmem:[%s10771_s5 + $0x58] sm:$0xff]   ;;  %v9890_v38 = vld [vmem:[%s10770_s4 + $0x170] sm:$0xff]  }
 0x34e   : > { %v9799_v17 = vld [vmem:[%s10771_s5] sm:$0xff]   ;;  %v9827_v27 = vld [vmem:[%s10771_s5 + $0x158] sm:$0xff]   ;;  %v7196_v28 = vld [vmem:[#allocation6 + $0x48] sm:$0xff] }
 0x34f   : > { %5931 = vmatpush1.bf16.msra.mxu0 %v9744_v44  ;;  %v9816_v31 = vld [vmem:[%s10771_s5 + $0x80] sm:$0xff]   ;;  %v9818_v44 = vld [vmem:[%s10771_s5 + $0xc8] sm:$0xff]   ;;  %v9829_v16 = vld [vmem:[%s10771_s5 + $0x118] sm:$0xff]  }
 0x350   : > { %6103 = vmatpush1.bf16.msra.mxu1 %v9747_v52  ;;  %5932 = vmatprep.subr.bf16.mxu0 %v9752_v50  ;;  %v9801_v52 = vld [vmem:[%s10771_s5 + $0x8] sm:$0xff]   ;;  %v9802_v50 = vld [vmem:[%s10771_s5 + $0x50] sm:$0xff]   ;;  %v7195_v21 = vld [vmem:[#allocation6 + $0x40] sm:$0xff] }
 0x351   : > { %6104 = vmatprep.subr.bf16.mxu1 %v9755_v33  ;;  %v9820_v33 = vld [vmem:[%s10771_s5 + $0x88] sm:$0xff]  }
 0x353   : > { %5933 = vmatpush1.bf16.msra.mxu0 %v9750_v36  ;;  %v9826_v36 = vld [vmem:[%s10771_s5 + $0xd8] sm:$0xff]  }
 0x354   : > { %6105 = vmatpush1.bf16.msra.mxu1 %v9753_v63  ;;  %5934 = vmatprep.subr.bf16.mxu0 %v9758_v46  ;;  %v9805_v63 = vld [vmem:[%s10771_s5 + $0x18] sm:$0xff]   ;;  %v9806_v46 = vld [vmem:[%s10771_s5 + $0x60] sm:$0xff]  }
 0x355   : > { %6106 = vmatprep.subr.bf16.mxu1 %v9761_v11  ;;  %v9828_v11 = vld [vmem:[%s10771_s5 + $0x98] sm:$0xff]  }
 0x357   : > { %5935 = vmatpush1.bf16.msra.mxu0 %v9756_v4  ;;  %v9830_v4 = vld [vmem:[%s10771_s5 + $0xe0] sm:$0xff]  }
 0x358   : > { %6107 = vmatpush1.bf16.msra.mxu1 %v9759_v47  ;;  %5936 = vmatprep.subr.bf16.mxu0 %v9764_v0  ;;  %v9807_v47 = vld [vmem:[%s10771_s5 + $0x20] sm:$0xff]   ;;  %v9808_v0 = vld [vmem:[%s10771_s5 + $0x68] sm:$0xff]  }
 0x359   : > { %6108 = vmatprep.subr.bf16.mxu1 %v9767_v35  ;;  %v9832_v35 = vld [vmem:[%s10771_s5 + $0xa0] sm:$0xff]  }
 0x35b   : > { %5937 = vmatpush1.bf16.msra.mxu0 %v9762_v1  ;;  %v9834_v1 = vld [vmem:[%s10771_s5 + $0xe8] sm:$0xff]  }
 0x35c   : > { %6109 = vmatpush1.bf16.msra.mxu1 %v9765_v2  ;;  %5938 = vmatprep.subr.bf16.mxu0 %v9770_v6  ;;  %v9809_v2 = vld [vmem:[%s10771_s5 + $0x28] sm:$0xff]   ;;  %v9810_v6 = vld [vmem:[%s10771_s5 + $0x70] sm:$0xff]  }
 0x35d   : > { %6110 = vmatprep.subr.bf16.mxu1 %v9773_v3  ;;  %v9836_v3 = vld [vmem:[%s10771_s5 + $0xa8] sm:$0xff]  }
 0x35f   : > { %5939 = vmatpush1.bf16.msra.mxu0 %v9768_v7  ;;  %v9811_v7 = vld [vmem:[%s10771_s5 + $0x30] sm:$0xff]  }
 0x360   : > { %6111 = vmatpush1.bf16.msra.mxu1 %v9771_v8  ;;  %5940 = vmatprep.subr.bf16.mxu0 %v9776_v9  ;;  %v9812_v8 = vld [vmem:[%s10771_s5 + $0x78] sm:$0xff]  }
 0x361   : > { %6112 = vmatprep.subr.bf16.mxu1 %v9779_v41  ;;  %v9813_v9 = vld [vmem:[%s10771_s5 + $0x38] sm:$0xff]   ;;  %v9815_v41 = vld [vmem:[%s10771_s5 + $0x140] sm:$0xff]  }
 0x363   : > { %5941 = vmatpush1.bf16.msra.mxu0 %v9774_v10  ;;  %v9817_v10 = vld [vmem:[%s10771_s5 + $0x100] sm:$0xff]  }
 0x364   : > { %6113 = vmatpush1.bf16.msra.mxu1 %v9777_v18  ;;  %5942 = vmatprep.subr.bf16.mxu0 %v9782_v60  ;;  %v9819_v18 = vld [vmem:[%s10771_s5 + $0x148] sm:$0xff]  }
 0x365   : > { %6114 = vmatprep.subr.bf16.mxu1 %v9785_v61  ;;  %v9821_v60 = vld [vmem:[%s10771_s5 + $0x108] sm:$0xff]   ;;  %v9823_v61 = vld [vmem:[%s10771_s5 + $0x150] sm:$0xff]  }
 0x367   : > { %5943 = vmatpush1.bf16.msra.mxu0 %v9780_v12  ;;  %v9825_v12 = vld [vmem:[%s10771_s5 + $0x110] sm:$0xff]  }
 0x368   : > { %6115 = vmatpush1.bf16.msra.mxu1 %v9783_v13  ;;  %5944 = vmatprep.subr.bf16.mxu0 %v9788_v14  ;;  %v9833_v13 = vld [vmem:[%s10771_s5 + $0x120] sm:$0xff]   ;;  %v9835_v14 = vld [vmem:[%s10771_s5 + $0x168] sm:$0xff]  }
 0x369   : > { %6116 = vmatprep.subr.bf16.mxu1 %v9791_v15  ;;  %v9837_v15 = vld [vmem:[%s10771_s5 + $0x128] sm:$0xff]  }
 0x36b   : > { %5945 = vmatpush1.bf16.msra.mxu0 %v9786_v24  ;;  %v9838_v24 = vld [vmem:[%s10771_s5 + $0xf0] sm:$0xff]  }
 0x36c   : > { %6117 = vmatpush1.bf16.msra.mxu1 %v9789_v19  ;;  %5946 = vmatprep.subr.bf16.mxu0 %v9794_v20  ;;  %v9839_v19 = vld [vmem:[%s10771_s5 + $0x170] sm:$0xff]  }
 0x36d   : > { %6118 = vmatprep.subr.bf16.mxu1 %v9797_v22  ;;  %v9840_v20 = vld [vmem:[%s10771_s5 + $0xb0] sm:$0xff]  }
 0x36e   : > { %v9841_v22 = vld [vmem:[%s10771_s5 + $0x130] sm:$0xff]  }
 0x36f   : > { %5947 = vmatpush1.bf16.msra.mxu0 %v9792_v48  ;;  %v9842_v48 = vld [vmem:[%s10771_s5 + $0xf8] sm:$0xff]  }
 0x370   : > { %6119 = vmatpush1.bf16.msra.mxu1 %v9795_v23  ;;  %8304 = vmatprep.subr.bf16.mxu0 %v9798_v29  ;;  %v9843_v23 = vld [vmem:[%s10771_s5 + $0x178] sm:$0xff]  }
 0x371   : > { %8326 = vmatprep.subr.bf16.mxu1 %v9814_v53  ;;  %v9844_v29 = vld [vmem:[%s10771_s5 + $0xb8] sm:$0xff]  }
 0x372   : > { %5949 = vmatmul.mubr.bf16.vlgmr.msra.gmra.mrb[8].mxu0 %v10397_v43  ;;  %v9845_v53 = vld [vmem:[%s10771_s5 + $0x138] sm:$0xff]  }
 0x373   : > { %6121 = vmatmul.mubr.bf16.vlgmr.msra.gmra.mrb[8].mxu1 %v10397_v43  ;;  %8305 = vmatpush3.bf16.msra.mxu0 %v9799_v17  ;;  %v9822_v43 = vld [vmem:[%s10771_s5 + $0xd0] sm:$0xff]   ;;  %v9846_v17 = vld [vmem:[%s10770_s4 + $0x40] sm:$0xff]  }
 0x374   : > { %6679 = vmatprep.mubr.bf16.mxu0 %v6162_v59  ;;  %8306 = vmatprep.subr.bf16.mxu0 %v9800_v30  ;;  %v9824_v59 = vld [vmem:[%s10771_s5 + $0x90] sm:$0xff]   ;;  %v9847_v30 = vld [vmem:[%s10770_s4 + $0xc0] sm:$0xff]  }
 0x375   : > { %8327 = vmatpush3.bf16.msra.mxu1 %v9816_v31 }
 0x376   : > { %8328 = vmatprep.subr.bf16.mxu1 %v9818_v44 }
 0x377   : > { %8307 = vmatpush3.bf16.msra.mxu0 %v9801_v52 }
 0x378   : > { %8308 = vmatprep.subr.bf16.mxu0 %v9802_v50 }
 0x379   : > { %8329 = vmatpush3.bf16.msra.mxu1 %v9820_v33 }
 0x37a   : > { %8330 = vmatprep.subr.bf16.mxu1 %v9822_v43 }
 0x37b   : > { %8309 = vmatpush3.bf16.msra.mxu0 %v9803_v37 }
 0x37c   : > { %8310 = vmatprep.subr.bf16.mxu0 %v9804_v39 }
 0x37d   : > { %8331 = vmatpush3.bf16.msra.mxu1 %v9824_v59 }
 0x37e   : > { %8332 = vmatprep.subr.bf16.mxu1 %v9826_v36 }
 0x37f   : > { %8311 = vmatpush3.bf16.msra.mxu0 %v9805_v63 }
 0x380   : > { %8312 = vmatprep.subr.bf16.mxu0 %v9806_v46 }
 0x381   : > { %8333 = vmatpush3.bf16.msra.mxu1 %v9828_v11 }
 0x382   : > { %8334 = vmatprep.subr.bf16.mxu1 %v9830_v4 }
 0x383   : > { %8313 = vmatpush3.bf16.msra.mxu0 %v9807_v47 }
 0x384   : > { %8314 = vmatprep.subr.bf16.mxu0 %v9808_v0 }
 0x385   : > { %8335 = vmatpush3.bf16.msra.mxu1 %v9832_v35 }
 0x386   : > { %8336 = vmatprep.subr.bf16.mxu1 %v9834_v1 }
 0x387   : > { %8315 = vmatpush3.bf16.msra.mxu0 %v9809_v2 }
 0x388   : > { %8316 = vmatprep.subr.bf16.mxu0 %v9810_v6 }
 0x389   : > { %8337 = vmatpush3.bf16.msra.mxu1 %v9836_v3  ;;  %v9848_v3 = vld [vmem:[%s10770_s4] sm:$0xff]  }
 0x38a   : > { %8338 = vmatprep.subr.bf16.mxu1 %v9838_v24  ;;  %v9870_v24 = vld [vmem:[%s10770_s4 + $0x70] sm:$0xff]  }
 0x38b   : > { %8317 = vmatpush3.bf16.msra.mxu0 %v9811_v7  ;;  %v9849_v7 = vld [vmem:[%s10770_s4 + $0x80] sm:$0xff]  }
 0x38c   : > { %8318 = vmatprep.subr.bf16.mxu0 %v9812_v8  ;;  %v9850_v8 = vld [vmem:[%s10770_s4 + $0x48] sm:$0xff]  }
 0x38d   : > { %8339 = vmatpush3.bf16.msra.mxu1 %v9840_v20  ;;  %v9872_v20 = vld [vmem:[%s10770_s4 + $0x30] sm:$0xff]  }
 0x38e   : > { %8340 = vmatprep.subr.bf16.mxu1 %v9842_v48  ;;  %v9874_v48 = vld [vmem:[%s10770_s4 + $0x78] sm:$0xff]  }
 0x38f   : > { %8319 = vmatpush3.bf16.msra.mxu0 %v9813_v9  ;;  %v9851_v9 = vld [vmem:[%s10770_s4 + $0xc8] sm:$0xff]  }
 0x390   : > { %8348 = vmatprep.subr.bf16.mxu0 %v9815_v41  ;;  %v9852_v41 = vld [vmem:[%s10770_s4 + $0x8] sm:$0xff]  }
 0x391   : > { %8341 = vmatpush3.bf16.msra.mxu1 %v9844_v29 }
 0x392   : > { %6680 = vmatmul.mubr.bf16.vlgmr.msra.gmra.mrb[12].mxu0 %v6161_v26  ;;  %v9831_v26 = vld [vmem:[%s10771_s5 + $0x160] sm:$0xff]   ;;  %8370 = vmatprep.subr.bf16.mxu1 %v9846_v17 }
 0x393   : > { %8349 = vmatpush3.bf16.msra.mxu0 %v9817_v10  ;;  %v9853_v10 = vld [vmem:[%s10770_s4 + $0x88] sm:$0xff]  }
 0x394   : > { %8350 = vmatprep.subr.bf16.mxu0 %v9819_v18  ;;  %v9854_v18 = vld [vmem:[%s10770_s4 + $0x50] sm:$0xff]  }
 0x397   : > { %8351 = vmatpush3.bf16.msra.mxu0 %v9821_v60  ;;  %v9855_v60 = vld [vmem:[%s10770_s4 + $0xd0] sm:$0xff]  }
 0x398   : > { %8352 = vmatprep.subr.bf16.mxu0 %v9823_v61  ;;  %v9862_v61 = vld [vmem:[%s10770_s4 + $0x60] sm:$0xff]  }
 0x39b   : > { %8353 = vmatpush3.bf16.msra.mxu0 %v9825_v12  ;;  %v9863_v12 = vld [vmem:[%s10770_s4 + $0xe0] sm:$0xff]  }
 0x39c   : > { %8354 = vmatprep.subr.bf16.mxu0 %v9827_v27  ;;  %v9864_v27 = vld [vmem:[%s10770_s4 + $0x20] sm:$0xff]  }
 0x39f   : > { %8355 = vmatpush3.bf16.msra.mxu0 %v9829_v16  ;;  %v9865_v16 = vld [vmem:[%s10770_s4 + $0xa0] sm:$0xff]  }
 0x3a0   : > { %8356 = vmatprep.subr.bf16.mxu0 %v9831_v26  ;;  %v9866_v26 = vld [vmem:[%s10770_s4 + $0x68] sm:$0xff]  }
 0x3a3   : > { %8357 = vmatpush3.bf16.msra.mxu0 %v9833_v13  ;;  %v9867_v13 = vld [vmem:[%s10770_s4 + $0xe8] sm:$0xff]  }
 0x3a4   : > { %8358 = vmatprep.subr.bf16.mxu0 %v9835_v14  ;;  %v9868_v14 = vld [vmem:[%s10770_s4 + $0x28] sm:$0xff]  }
 0x3a7   : > { %8359 = vmatpush3.bf16.msra.mxu0 %v9837_v15  ;;  %v9869_v15 = vld [vmem:[%s10770_s4 + $0xa8] sm:$0xff]  }
 0x3a8   : > { %8360 = vmatprep.subr.bf16.mxu0 %v9839_v19  ;;  %v9871_v19 = vld [vmem:[%s10770_s4 + $0xf0] sm:$0xff]  }
 0x3ab   : > { %8361 = vmatpush3.bf16.msra.mxu0 %v9841_v22  ;;  %v9873_v22 = vld [vmem:[%s10770_s4 + $0xb0] sm:$0xff]  }
 0x3ac   : > { %8362 = vmatprep.subr.bf16.mxu0 %v9843_v23  ;;  %v9875_v23 = vld [vmem:[%s10770_s4 + $0xf8] sm:$0xff]  }
 0x3af   : > { %8363 = vmatpush3.bf16.msra.mxu0 %v9845_v53 }
 0x3b0   : > { %8392 = vmatprep.subr.bf16.mxu0 %v9847_v30 }
 0x445   : > { %v5950_v31 = vpop.f32.mrb[8].mxu0 }
 0x446   : > { %v6122_v44 = vpop.f32.mrb[8].mxu1  ;;  %v5952_v52 = vpop.f32.mrb[9].mxu0  ;;  %v6151_v37 = vmul.f32 %v5950_v31, %v5950_v31  ;;  %v9876_v31 = vld [vmem:[%s10770_s4 + $0x38] sm:$0xff]  }
 0x447   : > { %v6124_v50 = vpop.f32.mrb[9].mxu1  ;;  %v5954_v33 = vpop.f32.mrb[10].mxu0  ;;  %v6153_v39 = vmul.f32 %v6122_v44, %v6122_v44  ;;  %v6152_v11 = vmul.f32 %v5952_v52, %v5952_v52  ;;  %v9877_v44 = vld [vmem:[%s10770_s4 + $0xb8] sm:$0xff]  }
 0x448   : > { %v6126_v43 = vpop.f32.mrb[10].mxu1  ;;  %v6157_v59 = vmul.f32 %v5954_v33, %v5954_v33  ;;  %v5956_v63 = vpop.f32.mrb[11].mxu0  ;;  %v6154_v4 = vmul.f32 %v6124_v50, %v6124_v50  ;;  %v9878_v50 = vld [vmem:[%s10770_s4 + $0x140] sm:$0xff]  }
 0x449   : > { %v6159_v36 = vmul.f32 %v6126_v43, %v6126_v43  ;;  %v6128_v46 = vpop.f32.mrb[11].mxu1  ;;  %v6158_v47 = vmul.f32 %v5956_v63, %v5956_v63  ;;  %v9879_v43 = vld [vmem:[%s10770_s4 + $0x100] sm:$0xff]   ;;  %v9893_v63 = vld [vmem:[%s10770_s4 + $0x138] sm:$0xff]  }
 0x44a   : > { %v6160_v0 = vmul.f32 %v6128_v46, %v6128_v46  ;;  %v6163_v35 = vpack.c.bf16 %v6157_v59, %v6151_v37  ;;  %v9880_v37 = vld [vmem:[%s10770_s4 + $0x148] sm:$0xff]   ;;  %v9882_v59 = vld [vmem:[%s10770_s4 + $0x150] sm:$0xff]   ;;  %v7187_v46 = vld [vmem:[#allocation6] sm:$0xff] }
 0x44b   : > { %v6165_v1 = vpack.c.bf16 %v6159_v36, %v6153_v39  ;;  %v6164_v2 = vpack.c.bf16 %v6158_v47, %v6152_v11  ;;  %v9881_v39 = vld [vmem:[%s10770_s4 + $0x108] sm:$0xff]   ;;  %v9892_v36 = vld [vmem:[%s10770_s4 + $0x178] sm:$0xff]  }
 0x44c   : > { %v6166_v6 = vpack.c.bf16 %v6160_v0, %v6154_v4  ;;  %v7188_v11 = vld [vmem:[#allocation6 + $0x8] sm:$0xff]  ;;  %v7189_v4 = vld [vmem:[#allocation6 + $0x10] sm:$0xff]  ;;  %v7190_v0 = vld [vmem:[#allocation6 + $0x18] sm:$0xff] }
 0x44d   : > { %6720 = vmatprep.mubr.bf16.mxu1 %v6164_v2  ;;  %v8489_v47 = vpack.c.bf16 %v7188_v11, %v7187_v46  ;;  %v7192_v2 = vld [vmem:[#allocation6 + $0x28] sm:$0xff] }
 0x44e   : > { %6761 = vmatprep.mubr.bf16.mxu0 %v6166_v6  ;;  %6721 = vmatmul.mubr.bf16.vlgmr.msra.gmra.mrb[12].mxu1 %v6163_v35  ;;  %v8493_v35 = vpack.c.bf16 %v7190_v0, %v7189_v4 }
 0x44f   : > { %6762 = vmatmul.mubr.bf16.vlgmr.msra.gmra.mrb[16].mxu0 %v6165_v1  ;;  %8371 = vmatpush3.bf16.msra.mxu1 %v9848_v3  ;;  %v7191_v1 = vld [vmem:[#allocation6 + $0x20] sm:$0xff]  ;;  %v7193_v3 = vld [vmem:[#allocation6 + $0x30] sm:$0xff] }
 0x450   : > { %8393 = vmatpush3.bf16.msra.mxu0 %v9849_v7  ;;  %7090 = vmatprep.mubr.bf16.mxu1 %v6144_v62  ;;  %v9860_v62 = vld [vmem:[%s10770_s4 + $0x18] sm:$0xff]   ;;  %v8497_v6 = vpack.c.bf16 %v7192_v2, %v7191_v1  ;;  %v8299_v1 = vld [vmem:[#allocation7] ss:$0 sm:$0xff] }
 0x451   : > { %7131 = vmatprep.mubr.bf16.mxu0 %v6146_v34  ;;  %8372 = vmatprep.subr.bf16.mxu1 %v9850_v8  ;;  %v9861_v34 = vld [vmem:[%s10770_s4 + $0x98] sm:$0xff]  }
 0x452   : > { %8394 = vmatprep.subr.bf16.mxu0 %v9851_v9  ;;  %v7194_v7 = vld [vmem:[#allocation6 + $0x38] sm:$0xff]  ;;  %v7197_v9 = vld [vmem:[#allocation6 + $0x50] sm:$0xff] }
 0x453   : > { %8373 = vmatpush3.bf16.msra.mxu1 %v9852_v41  ;;  %v8501_v8 = vpack.c.bf16 %v7194_v7, %v7193_v3  ;;  %v7198_v41 = vld [vmem:[#allocation6 + $0x58] sm:$0xff] }
 0x454   : > { %8395 = vmatpush3.bf16.msra.mxu0 %v9853_v10  ;;  %8374 = vmatprep.subr.bf16.mxu1 %v9854_v18  ;;  %v8509_v10 = vpack.c.bf16 %v7198_v41, %v7197_v9  ;;  %v7199_v18 = vld [vmem:[#allocation6 + $0x60] sm:$0xff] }
 0x455   : > { %8396 = vmatprep.subr.bf16.mxu0 %v9855_v60  ;;  %v7200_v60 = vld [vmem:[#allocation6 + $0x68] sm:$0xff] }
 0x457   : > { %8375 = vmatpush3.bf16.msra.mxu1 %v9856_v54  ;;  %v8513_v54 = vpack.c.bf16 %v7200_v60, %v7199_v18 }
 0x458   : > { %8397 = vmatpush3.bf16.msra.mxu0 %v9857_v55  ;;  %8376 = vmatprep.subr.bf16.mxu1 %v9858_v56  ;;  %v7201_v55 = vld [vmem:[#allocation6 + $0x70] sm:$0xff]  ;;  %v7202_v56 = vld [vmem:[#allocation6 + $0x78] sm:$0xff] }
 0x459   : > { %8398 = vmatprep.subr.bf16.mxu0 %v9859_v57  ;;  %v8517_v57 = vpack.c.bf16 %v7202_v56, %v7201_v55 }
 0x45b   : > { %8377 = vmatpush3.bf16.msra.mxu1 %v9860_v62 }
 0x45c   : > { %8399 = vmatpush3.bf16.msra.mxu0 %v9861_v34  ;;  %8378 = vmatprep.subr.bf16.mxu1 %v9862_v61 }
 0x45d   : > { %8400 = vmatprep.subr.bf16.mxu0 %v9863_v12 }
 0x45f   : > { %8379 = vmatpush3.bf16.msra.mxu1 %v9864_v27 }
 0x460   : > { %8401 = vmatpush3.bf16.msra.mxu0 %v9865_v16  ;;  %8380 = vmatprep.subr.bf16.mxu1 %v9866_v26 }
 0x461   : > { %8402 = vmatprep.subr.bf16.mxu0 %v9867_v13 }
 0x463   : > { %8381 = vmatpush3.bf16.msra.mxu1 %v9868_v14 }
 0x464   : > { %8403 = vmatpush3.bf16.msra.mxu0 %v9869_v15  ;;  %8382 = vmatprep.subr.bf16.mxu1 %v9870_v24 }
 0x465   : > { %8404 = vmatprep.subr.bf16.mxu0 %v9871_v19  ;;  %v8320_v29 = vpop.f32.mrb[12].mxu0 }
 0x466   : > { %v8321_v53 = vpop.f32.mrb[13].mxu0 }
 0x467   : > { %v10687_v17 = vadd.f32 %v8321_v53, %v8320_v29  ;;  %8383 = vmatpush3.bf16.msra.mxu1 %v9872_v20  ;;  %v8323_v30 = vpop.f32.mrb[14].mxu0 }
 0x468   : > { %8405 = vmatpush3.bf16.msra.mxu0 %v9873_v22  ;;  %v8324_v52 = vpop.f32.mrb[15].mxu0  ;;  %8384 = vmatprep.subr.bf16.mxu1 %v9874_v48 }
 0x469   : > { %8406 = vmatprep.subr.bf16.mxu0 %v9875_v23  ;;  %v10698_v33 = vadd.f32 %v8324_v52, %v8323_v30 }
 0x46b   : > { %8385 = vmatpush3.bf16.msra.mxu1 %v9876_v31 }
 0x46c   : > { %8407 = vmatpush3.bf16.msra.mxu0 %v9877_v44  ;;  %8414 = vmatprep.subr.bf16.mxu1 %v9878_v50 }
 0x46d   : > { %8490 = vmatprep.subr.bf16.mxu0 %v8489_v47 }
 0x46e   : > { %7091 = vmatmul.mubr.bf16.vlgmr.msra.gmra.mrb[16].mxu1 %v6143_v5  ;;  %v9887_v5 = vld [vmem:[%s10770_s4 + $0x120] sm:$0xff]  }
 0x46f   : > { %7132 = vmatmul.mubr.bf16.vlgmr.msra.gmra.mrb[20].mxu0 %v6145_v58  ;;  %8415 = vmatpush3.bf16.msra.mxu1 %v9879_v43  ;;  %v9888_v58 = vld [vmem:[%s10770_s4 + $0x168] sm:$0xff]  }
 0x470   : > { %7172 = vmatprep.mubr.bf16.mxu1 %v6148_v42  ;;  %8416 = vmatprep.subr.bf16.mxu1 %v9880_v37  ;;  %v9891_v42 = vld [vmem:[%s10770_s4 + $0x130] sm:$0xff]  }
 0x471   : > { %8492 = vmatpush3.bf16.msra.mxu0 %v8489_v47 }
 0x472   : > { %8494 = vmatprep.subr.bf16.mxu0 %v8493_v35 }
 0x473   : > { %8417 = vmatpush3.bf16.msra.mxu1 %v9881_v39 }
 0x474   : > { %8418 = vmatprep.subr.bf16.mxu1 %v9882_v59 }
 0x475   : > { %8496 = vmatpush3.bf16.msra.mxu0 %v8493_v35 }
 0x476   : > { %8498 = vmatprep.subr.bf16.mxu0 %v8497_v6 }
 0x477   : > { %8419 = vmatpush3.bf16.msra.mxu1 %v9883_v25 }
 0x478   : > { %8420 = vmatprep.subr.bf16.mxu1 %v9884_v45 }
 0x479   : > { %8500 = vmatpush3.bf16.msra.mxu0 %v8497_v6 }
 0x47a   : > { %8502 = vmatprep.subr.bf16.mxu0 %v8501_v8 }
 0x47b   : > { %8421 = vmatpush3.bf16.msra.mxu1 %v9885_v49 }
 0x47c   : > { %8422 = vmatprep.subr.bf16.mxu1 %v9886_v51 }
 0x47d   : > { %8504 = vmatpush3.bf16.msra.mxu0 %v8501_v8 }
 0x47f   : > { %8423 = vmatpush3.bf16.msra.mxu1 %v9887_v5 }
 0x480   : > { %8424 = vmatprep.subr.bf16.mxu1 %v9888_v58 }
 0x483   : > { %8425 = vmatpush3.bf16.msra.mxu1 %v9889_v32 }
 0x484   : > { %8426 = vmatprep.subr.bf16.mxu1 %v9890_v38 }
 0x487   : > { %8427 = vmatpush3.bf16.msra.mxu1 %v9891_v42 }
 0x488   : > { %8428 = vmatprep.subr.bf16.mxu1 %v9892_v36 }
 0x48b   : > { %8429 = vmatpush3.bf16.msra.mxu1 %v9893_v63 }
 0x48e   : > { %7173 = vmatmul.mubr.bf16.vlgmr.msra.gmra.mrb[20].mxu1 %v6147_v40  ;;  %v8505_v40 = vpack.c.bf16 %v7196_v28, %v7195_v21 }
 0x490   : > { %8506 = vmatprep.subr.bf16.mxu0 %v8505_v40 }
 0x491   : > { %8508 = vmatpush3.bf16.msra.mxu0 %v8505_v40 }
 0x492   : > { %8510 = vmatprep.subr.bf16.mxu0 %v8509_v10 }
 0x495   : > { %8512 = vmatpush3.bf16.msra.mxu0 %v8509_v10 }
 0x496   : > { %8514 = vmatprep.subr.bf16.mxu0 %v8513_v54 }
 0x499   : > { %8516 = vmatpush3.bf16.msra.mxu0 %v8513_v54 }
 0x49a   : > { %8518 = vmatprep.subr.bf16.mxu0 %v8517_v57 }
 0x49d   : > { %8520 = vmatpush3.bf16.msra.mxu0 %v8517_v57 }
 0x521   : > { %v8342_v62 = vpop.f32.mrb[12].mxu1 }
 0x522   : > { %v8364_v34 = vpop.f32.mrb[16].mxu0  ;;  %v8343_v61 = vpop.f32.mrb[13].mxu1 }
 0x523   : > { %v8365_v12 = vpop.f32.mrb[17].mxu0  ;;  %v8344_v27 = vadd.f32 %v8343_v61, %v8342_v62  ;;  %v8345_v26 = vpop.f32.mrb[14].mxu1 }
 0x524   : > { %v8366_v16 = vadd.f32 %v8365_v12, %v8364_v34  ;;  %v8367_v13 = vpop.f32.mrb[18].mxu0  ;;  %v8346_v14 = vpop.f32.mrb[15].mxu1 }
 0x525   : > { %v8368_v15 = vpop.f32.mrb[19].mxu0  ;;  %v6723_v24 = vadd.f32 %v8344_v27, %v10687_v17  ;;  %v8347_v19 = vadd.f32 %v8346_v14, %v8345_v26 }
 0x526   : > { %v8369_v20 = vadd.f32 %v8368_v15, %v8367_v13 }
 0x527   : > { %v6764_v22 = vadd.f32 %v8366_v16, %v6723_v24  ;;  %v6726_v48 = vadd.f32 %v8347_v19, %v10698_v33 }
 0x529   : > { %v6767_v23 = vadd.f32 %v8369_v20, %v6726_v48 }
 0x541   : > { %v8386_v29 = vpop.f32.mrb[16].mxu1 }
 0x542   : > { %v8408_v53 = vpop.f32.mrb[20].mxu0  ;;  %v8387_v30 = vpop.f32.mrb[17].mxu1 }
 0x543   : > { %v8409_v31 = vpop.f32.mrb[21].mxu0  ;;  %v8388_v44 = vadd.f32 %v8387_v30, %v8386_v29  ;;  %v8389_v50 = vpop.f32.mrb[18].mxu1 }
 0x544   : > { %v8410_v52 = vadd.f32 %v8409_v31, %v8408_v53  ;;  %v8411_v43 = vpop.f32.mrb[22].mxu0  ;;  %v8390_v37 = vpop.f32.mrb[19].mxu1 }
 0x545   : > { %v8412_v39 = vpop.f32.mrb[23].mxu0  ;;  %v7093_v59 = vadd.f32 %v8388_v44, %v6764_v22  ;;  %v8391_v25 = vadd.f32 %v8390_v37, %v8389_v50 }
 0x546   : > { %v8413_v45 = vadd.f32 %v8412_v39, %v8411_v43 }
 0x547   : > { %v7134_v17 = vadd.f32 %v8410_v52, %v7093_v59  ;;  %v7096_v49 = vadd.f32 %v8391_v25, %v6767_v23 }
 0x549   : > { %v7137_v51 = vadd.f32 %v8413_v45, %v7096_v49 }
 0x561   : > { %v8430_v5 = vpop.f32.mrb[20].mxu1 }
 0x562   : > { %v8431_v58 = vpop.f32.mrb[21].mxu1 }
 0x563   : > { %v8432_v33 = vadd.f32 %v8431_v58, %v8430_v5  ;;  %v8433_v32 = vpop.f32.mrb[22].mxu1 }
 0x564   : > { %v8434_v38 = vpop.f32.mrb[23].mxu1 }
 0x565   : > { %v7175_v42 = vadd.f32 %v8432_v33, %v7134_v17  ;;  %v8435_v36 = vadd.f32 %v8434_v38, %v8433_v32 }
 0x567   : > { %v7181_v63 = vmax.f32 %v7175_v42, 1e-08  ;;  %v7178_v46 = vadd.f32 %v8435_v36, %v7137_v51 }
 0x569   : > { %9894 = vlog2.f32 %v7181_v63  ;;  %v7182_v11 = vmax.f32 %v7178_v46, 1e-08 }
 0x56b   : > { %9896 = vlog2.f32 %v7182_v11 }
 0x573   : > { %v9895_v4 = vpop.eup %9894 }
 0x574   : > { %v7184_v47 = vmul.f32 0.6931472, %v9895_v4 }
 0x575   : > { %v9897_v0 = vpop.eup %9896 }
 0x576   : > { %v7186_v35 = vmul.f32 0.6931472, %v9897_v0  ;;  %8486 = vmatprep.mubr.f32.mxu0 %v7184_v47 }
 0x578   : > { %8487 = vmatmul.mubr.f32.vlgmr.msra.gmra.mrb[24].mxu0 %v7186_v35 }
 0x64b   : > { %v8488_v2 = vpop.f32.mrb[24].mxu0 }
 0x64c   : > { %v7269_v6 = vpop.f32.mrb[25].mxu0  ;;  %v7286_v7 = vsub.f32 %v8488_v2, %v8299_v1 }
 0x64d   : > { %v7285_v3 = vsub.f32 %v7269_v6, %v8299_v1 }
 0x64e   : > { %7288 = vst [vmem:[%s392_s13 + $0x8] sm:$0xff] %v7286_v7 }
 0x64f   : > { %7287 = vst [vmem:[%s392_s13] sm:$0xff] %v7285_v3 }
 0x650 PF: > { %s21_s27 = sadd.s32 1, %s10028_s27  }
 0x651   : > { %p18_p3 = scmp.ge.s32.totalorder %s21_s27, 4  }
 0x653   :  { %20 = sbr.rel (!%p18_p3) target bundleno = 3 (0x3), region = 102 }
 0x65a   :  { %7311 = vsyncpa [#allocation3], 1 }
 0x65b   :  { %7313 = vsyncpa [#allocation3 + $0x1], 1 }
 0x65c   :  { %7314 = vsyncpa [#allocation5], 1 }
 0x65d   :  { %7315 = vsyncpa [#allocation8], 1 }

</bundles_post_ra>
